<compile_context>
chip_gen: v6e
topology: v6e:2x2x1
jax: 0.10.0
libtpu: 0.0.40
codegen_flags: <defaults>
</compile_context>

<pallas_src>
import functools
import math

import jax
import jax.numpy as jnp
from jax import lax
from jax.experimental import pallas as pl
from jax.experimental.pallas import tpu as pltpu

F32 = jnp.float32
BF16 = jnp.bfloat16


def _row_tile(M, pref=256):
    """Largest row-tile <= pref that divides M (multiple of 8), else full M."""
    if M <= pref:
        return M
    for t in range(pref, 7, -8):
        if M % t == 0:
            return t
    return M


def _act(x, activation):
    if activation == "gelu":  # exact (erf) gelu, matching torch.nn.functional.gelu
        return 0.5 * x * (1.0 + lax.erf(x * (1.0 / math.sqrt(2.0))))
    if activation == "relu":
        return jnp.maximum(x, 0.0)
    return x


# --------------------------------------------------------------------------
# Pallas kernels
# --------------------------------------------------------------------------
def _linear_kernel(x_ref, w_ref, b_ref, o_ref, *, activation):
    acc = jnp.dot(x_ref[...], w_ref[...], preferred_element_type=F32) + b_ref[...]
    acc = _act(acc, activation)
    o_ref[...] = acc.astype(o_ref.dtype)


def _linear_add_ln_kernel(x_ref, w_ref, b_ref, r_ref, g_ref, be_ref, o_ref, *, eps):
    acc = jnp.dot(x_ref[...], w_ref[...], preferred_element_type=F32) + b_ref[...]
    z = r_ref[...] + acc
    mean = jnp.mean(z, axis=-1, keepdims=True)
    var = jnp.mean((z - mean) ** 2, axis=-1, keepdims=True)
    o_ref[...] = ((z - mean) * lax.rsqrt(var + eps) * g_ref[...] + be_ref[...]).astype(o_ref.dtype)


def _ffn_add_ln_kernel(x_ref, w1_ref, b1_ref, w2_ref, b2_ref, g_ref, be_ref, o_ref,
                       *, activation, eps):
    x = x_ref[...]                                                    # f32 residual
    h = jnp.dot(x.astype(BF16), w1_ref[...], preferred_element_type=F32) + b1_ref[...]
    h = _act(h, activation)
    y = jnp.dot(h.astype(BF16), w2_ref[...], preferred_element_type=F32) + b2_ref[...]
    z = x + y
    mean = jnp.mean(z, axis=-1, keepdims=True)
    var = jnp.mean((z - mean) ** 2, axis=-1, keepdims=True)
    o_ref[...] = ((z - mean) * lax.rsqrt(var + eps) * g_ref[...] + be_ref[...]).astype(o_ref.dtype)


def _ln_kernel(x_ref, g_ref, b_ref, o_ref, *, eps):
    x = x_ref[...]
    mean = jnp.mean(x, axis=-1, keepdims=True)
    var = jnp.mean((x - mean) ** 2, axis=-1, keepdims=True)
    o_ref[...] = ((x - mean) * lax.rsqrt(var + eps) * g_ref[...] + b_ref[...]).astype(o_ref.dtype)


_NT_DIMS = (((1,), (1,)), ((), ()))  # contract over the E axis: q @ k^T without transpose


def _mha_kernel(q_ref, k_ref, v_ref, o_ref, *, n_heads, scale, causal):
    q = q_ref[0]          # (L, H*E) bf16
    k = k_ref[0]          # (S, H*E) bf16
    v = v_ref[0]          # (S, H*E) bf16
    L, HE = q.shape
    S = k.shape[0]
    E = HE // n_heads
    if causal:
        row = lax.broadcasted_iota(jnp.int32, (L, S), 0)
        col = lax.broadcasted_iota(jnp.int32, (L, S), 1)
        mask = col > row
    for h in range(n_heads):
        sl = pl.ds(h * E, E)
        s = lax.dot_general(q[:, h * E:(h + 1) * E], k[:, h * E:(h + 1) * E],
                            _NT_DIMS, preferred_element_type=F32) * scale
        if causal:
            s = jnp.where(mask, -jnp.inf, s)
        m = jnp.max(s, axis=-1, keepdims=True)
        p = jnp.exp(s - m)
        attn = p / jnp.sum(p, axis=-1, keepdims=True)
        oh = jnp.dot(attn.astype(v.dtype), v[:, h * E:(h + 1) * E],
                     preferred_element_type=F32)
        o_ref[0, :, sl] = oh.astype(o_ref.dtype)


def _circ_conv_kernel(*refs, has_pe):
    if has_pe:
        x_ref, wl_ref, wc_ref, wr_ref, b_ref, pe_ref, o_ref = refs
    else:
        x_ref, wl_ref, wc_ref, wr_ref, b_ref, o_ref = refs
    x = x_ref[0]                        # (L, C) f32
    L = x.shape[0]
    x_prev = pltpu.roll(x, 1, 0)        # x[l-1] (circular)
    x_next = pltpu.roll(x, L - 1, 0)    # x[l+1] (circular)
    acc = jnp.dot(x_prev, wl_ref[...], preferred_element_type=F32)
    acc = acc + jnp.dot(x, wc_ref[...], preferred_element_type=F32)
    acc = acc + jnp.dot(x_next, wr_ref[...], preferred_element_type=F32)
    acc = acc + b_ref[...]
    if has_pe:
        acc = acc + pe_ref[...]
    o_ref[0] = acc.astype(o_ref.dtype)


# --------------------------------------------------------------------------
# Pallas wrappers
# --------------------------------------------------------------------------
def pallas_linear(x, w, b, activation=None, out_dtype=F32):
    """x: (M, K) x w: (K, N) + b -> (M, N). bf16 operands, f32 accumulation."""
    M, K = x.shape
    N = w.shape[1]
    tm = _row_tile(M)
    return pl.pallas_call(
        functools.partial(_linear_kernel, activation=activation),
        grid=(M // tm,),
        in_specs=[pl.BlockSpec((tm, K), lambda i: (i, 0)),
                  pl.BlockSpec((K, N), lambda i: (0, 0)),
                  pl.BlockSpec((1, N), lambda i: (0, 0))],
        out_specs=pl.BlockSpec((tm, N), lambda i: (i, 0)),
        out_shape=jax.ShapeDtypeStruct((M, N), out_dtype),
        compiler_params=pltpu.CompilerParams(dimension_semantics=("parallel",)),
    )(x.astype(BF16), w.astype(BF16), b.reshape(1, N).astype(F32))


def pallas_linear_add_ln(x, w, b, residual, gamma, beta, eps=1e-5):
    """LayerNorm(residual + x @ w + b). Fuses projection + residual + LN."""
    M, K = x.shape
    N = w.shape[1]
    tm = _row_tile(M)
    return pl.pallas_call(
        functools.partial(_linear_add_ln_kernel, eps=eps),
        grid=(M // tm,),
        in_specs=[pl.BlockSpec((tm, K), lambda i: (i, 0)),
                  pl.BlockSpec((K, N), lambda i: (0, 0)),
                  pl.BlockSpec((1, N), lambda i: (0, 0)),
                  pl.BlockSpec((tm, N), lambda i: (i, 0)),
                  pl.BlockSpec((1, N), lambda i: (0, 0)),
                  pl.BlockSpec((1, N), lambda i: (0, 0))],
        out_specs=pl.BlockSpec((tm, N), lambda i: (i, 0)),
        out_shape=jax.ShapeDtypeStruct((M, N), F32),
        compiler_params=pltpu.CompilerParams(dimension_semantics=("parallel",)),
    )(x.astype(BF16), w.astype(BF16), b.reshape(1, N).astype(F32),
      residual.astype(F32), gamma.reshape(1, N).astype(F32), beta.reshape(1, N).astype(F32))


def pallas_ffn_add_ln(x, w1, b1, w2, b2, gamma, beta, activation="gelu", eps=1e-5):
    """LayerNorm(x + W2 @ act(W1 @ x)). Keeps the (tm, d_ff) hidden in VMEM only."""
    M, D = x.shape
    Fh = w1.shape[1]
    tm = _row_tile(M)
    return pl.pallas_call(
        functools.partial(_ffn_add_ln_kernel, activation=activation, eps=eps),
        grid=(M // tm,),
        in_specs=[pl.BlockSpec((tm, D), lambda i: (i, 0)),
                  pl.BlockSpec((D, Fh), lambda i: (0, 0)),
                  pl.BlockSpec((1, Fh), lambda i: (0, 0)),
                  pl.BlockSpec((Fh, D), lambda i: (0, 0)),
                  pl.BlockSpec((1, D), lambda i: (0, 0)),
                  pl.BlockSpec((1, D), lambda i: (0, 0)),
                  pl.BlockSpec((1, D), lambda i: (0, 0))],
        out_specs=pl.BlockSpec((tm, D), lambda i: (i, 0)),
        out_shape=jax.ShapeDtypeStruct((M, D), F32),
        compiler_params=pltpu.CompilerParams(dimension_semantics=("parallel",)),
    )(x.astype(F32), w1.astype(BF16), b1.reshape(1, Fh).astype(F32),
      w2.astype(BF16), b2.reshape(1, D).astype(F32),
      gamma.reshape(1, D).astype(F32), beta.reshape(1, D).astype(F32))


def pallas_layernorm(x3d, gamma, beta, eps=1e-5):
    B, L, D = x3d.shape
    M = B * L
    tm = _row_tile(M)
    out = pl.pallas_call(
        functools.partial(_ln_kernel, eps=eps),
        grid=(M // tm,),
        in_specs=[pl.BlockSpec((tm, D), lambda i: (i, 0)),
                  pl.BlockSpec((1, D), lambda i: (0, 0)),
                  pl.BlockSpec((1, D), lambda i: (0, 0))],
        out_specs=pl.BlockSpec((tm, D), lambda i: (i, 0)),
        out_shape=jax.ShapeDtypeStruct((M, D), F32),
        compiler_params=pltpu.CompilerParams(dimension_semantics=("parallel",)),
    )(x3d.reshape(M, D).astype(F32),
      gamma.reshape(1, D).astype(F32), beta.reshape(1, D).astype(F32))
    return out.reshape(B, L, D)


def pallas_mha(q, k, v, n_heads, causal):
    """FullAttention. q: (B, L, H*E), k/v: (B, S, H*E) -> (B, L, H*E) lane-dense."""
    B, L, HE = q.shape
    S = k.shape[1]
    E = HE // n_heads
    scale = 1.0 / math.sqrt(E)
    return pl.pallas_call(
        functools.partial(_mha_kernel, n_heads=n_heads, scale=scale, causal=causal),
        grid=(B,),
        in_specs=[pl.BlockSpec((1, L, HE), lambda i: (i, 0, 0)),
                  pl.BlockSpec((1, S, HE), lambda i: (i, 0, 0)),
                  pl.BlockSpec((1, S, HE), lambda i: (i, 0, 0))],
        out_specs=pl.BlockSpec((1, L, HE), lambda i: (i, 0, 0)),
        out_shape=jax.ShapeDtypeStruct((B, L, HE), BF16),
        compiler_params=pltpu.CompilerParams(dimension_semantics=("parallel",)),
    )(q.astype(BF16), k.astype(BF16), v.astype(BF16))


def pallas_circular_conv(x3d, w, b, pe=None):
    """Conv1d(kernel=3, padding=1, padding_mode='circular') on (B, L, C_in).

    w: (3*C_in, C_out), row blocks ordered [tap l-1, tap l, tap l+1].
    Optional pe: (L, C_out) positional embedding added in-kernel.
    """
    B, L, C = x3d.shape
    N = w.shape[1]
    wl, wc, wr = w[:C], w[C:2 * C], w[2 * C:]
    has_pe = pe is not None
    in_specs = [pl.BlockSpec((1, L, C), lambda i: (i, 0, 0)),
                pl.BlockSpec((C, N), lambda i: (0, 0)),
                pl.BlockSpec((C, N), lambda i: (0, 0)),
                pl.BlockSpec((C, N), lambda i: (0, 0)),
                pl.BlockSpec((1, N), lambda i: (0, 0))]
    args = [x3d.astype(F32), wl.astype(F32), wc.astype(F32), wr.astype(F32),
            b.reshape(1, N).astype(F32)]
    if has_pe:
        in_specs.append(pl.BlockSpec((L, N), lambda i: (0, 0)))
        args.append(pe.astype(F32))
    return pl.pallas_call(
        functools.partial(_circ_conv_kernel, has_pe=has_pe),
        grid=(B,),
        in_specs=in_specs,
        out_specs=pl.BlockSpec((1, L, N), lambda i: (i, 0, 0)),
        out_shape=jax.ShapeDtypeStruct((B, L, N), F32),
        compiler_params=pltpu.CompilerParams(dimension_semantics=("parallel",)),
    )(*args)


# --------------------------------------------------------------------------
# Model glue
# --------------------------------------------------------------------------
def positional_embedding(L, d_model):
    pos = jnp.arange(L, dtype=F32)[:, None]
    i = jnp.arange(0, d_model, 2, dtype=F32)
    div = jnp.exp(i * (-math.log(10000.0) / d_model))
    pe = jnp.zeros((L, d_model), F32)
    pe = pe.at[:, 0::2].set(jnp.sin(pos * div))
    pe = pe.at[:, 1::2].set(jnp.cos(pos * div)[:, : d_model // 2])
    return pe


def data_embedding(p, x):
    """TokenEmbedding (circular conv) + fixed sinusoidal positions, fused; dropout=0."""
    B, L, _ = x.shape
    d_model = p["tok_w"].shape[1]
    pe = positional_embedding(L, d_model)
    return pallas_circular_conv(x, p["tok_w"], p["tok_b"], pe=pe)


def _self_attention(wqkv, bqkv, x3d, n_heads, causal):
    B, L, dm = x3d.shape
    qkv = pallas_linear(x3d.reshape(B * L, dm), wqkv, bqkv, out_dtype=BF16)
    HE = qkv.shape[-1] // 3
    qkv = qkv.reshape(B, L, 3 * HE)
    return pallas_mha(qkv[..., :HE], qkv[..., HE:2 * HE], qkv[..., 2 * HE:],
                      n_heads, causal)


def encoder_layer(p, x, n_heads):
    B, L, dm = x.shape
    x2 = x.reshape(B * L, dm)
    ctx = _self_attention(p["wqkv"], p["bqkv"], x, n_heads, causal=False)   # (B,L,HE)
    x2 = pallas_linear_add_ln(ctx.reshape(B * L, -1), p["wo"], p["bo"], x2,
                              p["ln1_g"], p["ln1_b"])
    x2 = pallas_ffn_add_ln(x2, p["w1"], p["b1"], p["w2"], p["b2"],
                           p["ln2_g"], p["ln2_b"], activation="gelu")
    return x2.reshape(B, L, dm)


def conv_layer(p, x):
    """Informer distilling ConvLayer: circular Conv1d(k=3) -> BN -> ELU -> MaxPool1d(3,2,1)."""
    y = pallas_circular_conv(x, p["w"], p["b"])
    # BatchNorm1d (training-mode batch statistics, per-channel over (B, L))
    mean = jnp.mean(y, axis=(0, 1), keepdims=True)
    var = jnp.mean((y - mean) ** 2, axis=(0, 1), keepdims=True)
    y = (y - mean) * lax.rsqrt(var + 1e-5) * p["bn_g"][None, None] + p["bn_b"][None, None]
    y = jnp.where(y > 0, y, jnp.expm1(y))                       # ELU(alpha=1)
    y = lax.reduce_window(y, -jnp.inf, lax.max,                 # MaxPool1d(3, 2, 1)
                          window_dimensions=(1, 3, 1), window_strides=(1, 2, 1),
                          padding=((0, 0), (1, 1), (0, 0)))
    return y


def decoder_layer(p, x, cross, n_heads):
    B, L, dm = x.shape
    S = cross.shape[1]
    x2 = x.reshape(B * L, dm)
    # masked self-attention
    ctx = _self_attention(p["self_wqkv"], p["self_bqkv"], x, n_heads, causal=True)
    x2 = pallas_linear_add_ln(ctx.reshape(B * L, -1), p["self_wo"], p["self_bo"], x2,
                              p["ln1_g"], p["ln1_b"])
    # cross-attention (Q from decoder stream, fused K/V from encoder output)
    q = pallas_linear(x2, p["cross_wq"], p["cross_bq"], out_dtype=BF16).reshape(B, L, -1)
    kv = pallas_linear(cross.reshape(B * S, dm), p["cross_wkv"], p["cross_bkv"],
                       out_dtype=BF16).reshape(B, S, -1)
    HE = kv.shape[-1] // 2
    ctx = pallas_mha(q, kv[..., :HE], kv[..., HE:], n_heads, causal=False)
    x2 = pallas_linear_add_ln(ctx.reshape(B * L, -1), p["cross_wo"], p["cross_bo"], x2,
                              p["ln2_g"], p["ln2_b"])
    # feed-forward
    x2 = pallas_ffn_add_ln(x2, p["w1"], p["b1"], p["w2"], p["b2"],
                           p["ln3_g"], p["ln3_b"], activation="gelu")
    return x2.reshape(B, L, dm)


def informer_forward(params, x_enc, x_dec, *, n_heads, pred_len):
    # ---- encoder ----
    enc = data_embedding(params["enc_emb"], x_enc)
    for i, conv_p in enumerate(params["enc_convs"]):
        enc = encoder_layer(params["enc_layers"][i], enc, n_heads)
        enc = conv_layer(conv_p, enc)
    enc = encoder_layer(params["enc_layers"][-1], enc, n_heads)
    enc = pallas_layernorm(enc, params["enc_norm_g"], params["enc_norm_b"])
    # ---- decoder ----
    dec = data_embedding(params["dec_emb"], x_dec)
    for lp in params["dec_layers"]:
        dec = decoder_layer(lp, dec, enc, n_heads)
    dec = pallas_layernorm(dec, params["dec_norm_g"], params["dec_norm_b"])
    B, L, dm = dec.shape
    dec = pallas_linear(dec.reshape(B * L, dm), params["proj_w"], params["proj_b"])
    dec = dec.reshape(B, L, -1)
    return dec[:, -pred_len:, :]


# --------------------------------------------------------------------------
# Deterministic parameter initialization (synthetic)
# --------------------------------------------------------------------------
def init_params(key, enc_in, dec_in, c_out, d_model, n_heads, d_ff, e_layers, d_layers):
    keys = iter(jax.random.split(key, 1024))

    def w(shape):
        return jax.random.normal(next(keys), shape, F32) * 0.02

    zeros = lambda s: jnp.zeros(s, F32)
    ones = lambda s: jnp.ones(s, F32)
    HE = d_model  # d_keys * n_heads == d_model

    def enc_layer_p():
        return dict(
            wqkv=w((d_model, 3 * HE)), bqkv=zeros((3 * HE,)),
            wo=w((HE, d_model)), bo=zeros((d_model,)),
            ln1_g=ones((d_model,)), ln1_b=zeros((d_model,)),
            w1=w((d_model, d_ff)), b1=zeros((d_ff,)),
            w2=w((d_ff, d_model)), b2=zeros((d_model,)),
            ln2_g=ones((d_model,)), ln2_b=zeros((d_model,)),
        )

    def dec_layer_p():
        return dict(
            self_wqkv=w((d_model, 3 * HE)), self_bqkv=zeros((3 * HE,)),
            self_wo=w((HE, d_model)), self_bo=zeros((d_model,)),
            cross_wq=w((d_model, HE)), cross_bq=zeros((HE,)),
            cross_wkv=w((d_model, 2 * HE)), cross_bkv=zeros((2 * HE,)),
            cross_wo=w((HE, d_model)), cross_bo=zeros((d_model,)),
            ln1_g=ones((d_model,)), ln1_b=zeros((d_model,)),
            ln2_g=ones((d_model,)), ln2_b=zeros((d_model,)),
            ln3_g=ones((d_model,)), ln3_b=zeros((d_model,)),
            w1=w((d_model, d_ff)), b1=zeros((d_ff,)),
            w2=w((d_ff, d_model)), b2=zeros((d_model,)),
        )

    params = dict(
        enc_emb=dict(tok_w=w((3 * enc_in, d_model)), tok_b=zeros((d_model,))),
        dec_emb=dict(tok_w=w((3 * dec_in, d_model)), tok_b=zeros((d_model,))),
        enc_layers=[enc_layer_p() for _ in range(e_layers)],
        enc_convs=[dict(w=w((3 * d_model, d_model)), b=zeros((d_model,)),
                        bn_g=ones((d_model,)), bn_b=zeros((d_model,)))
                   for _ in range(e_layers - 1)],
        enc_norm_g=ones((d_model,)), enc_norm_b=zeros((d_model,)),
        dec_layers=[dec_layer_p() for _ in range(d_layers)],
        dec_norm_g=ones((d_model,)), dec_norm_b=zeros((d_model,)),
        proj_w=w((d_model, c_out)), proj_b=zeros((c_out,)),
    )
    return params


# --------------------------------------------------------------------------
if __name__ == "__main__":
    # Small, forward-consistent config:
    B = 2
    enc_in = dec_in = c_out = 4
    seq_len, label_len, out_len = 16, 8, 8   # decoder input length = 16
    d_model, n_heads, d_ff = 32, 4, 32
    e_layers, d_layers = 2, 1                # distil=True -> 1 ConvLayer

    key = jax.random.PRNGKey(0)
    k_p, k_enc, k_dec = jax.random.split(key, 3)
    params = init_params(k_p, enc_in, dec_in, c_out, d_model, n_heads, d_ff,
                         e_layers, d_layers)

    x_enc = jax.random.normal(k_enc, (B, seq_len, enc_in), F32)
    x_dec = jax.random.normal(k_dec, (B, label_len + out_len, dec_in), F32)

    fwd = jax.jit(functools.partial(informer_forward,
                                    n_heads=n_heads, pred_len=out_len))
    out = fwd(params, x_enc, x_dec)
    out = jax.block_until_ready(out)
    assert out.shape == (B, out_len, c_out), out.shape
    assert bool(jnp.all(jnp.isfinite(out)))
    print("KERNEL_OK")
</pallas_src>

<mosaic_0001>
module attributes {stable_mosaic.version = 11 : i64} {
  func.func @_circ_conv_kernel(%arg0: i32, %arg1: memref<1x16x4xf32, #tpu.memory_space<vmem>>, %arg2: memref<4x32xf32, #tpu.memory_space<vmem>>, %arg3: memref<4x32xf32, #tpu.memory_space<vmem>>, %arg4: memref<4x32xf32, #tpu.memory_space<vmem>>, %arg5: memref<1x32xf32, #tpu.memory_space<vmem>>, %arg6: memref<16x32xf32, #tpu.memory_space<vmem>>, %arg7: memref<1x16x32xf32, #tpu.memory_space<vmem>>) attributes {dimension_semantics = [#tpu.dimension_semantics<parallel>], iteration_bounds = array<i64: 2>, scalar_prefetch = 0 : i64, scratch_operands = 0 : i64, tpu.core_type = #tpu.core_type<tc>, window_params = [{transform_indices = @transform_0, window_bounds = array<i64: 1, 16, 4>}, {pipeline_mode = #tpu.pipeline_mode<synchronous>, transform_indices = @transform_1, window_bounds = array<i64: 4, 32>}, {pipeline_mode = #tpu.pipeline_mode<synchronous>, transform_indices = @transform_2, window_bounds = array<i64: 4, 32>}, {pipeline_mode = #tpu.pipeline_mode<synchronous>, transform_indices = @transform_3, window_bounds = array<i64: 4, 32>}, {pipeline_mode = #tpu.pipeline_mode<synchronous>, transform_indices = @transform_4, window_bounds = array<i64: 1, 32>}, {pipeline_mode = #tpu.pipeline_mode<synchronous>, transform_indices = @transform_5, window_bounds = array<i64: 16, 32>}, {transform_indices = @transform_6, window_bounds = array<i64: 1, 16, 32>}]} {
    %c0 = arith.constant 0 : index
    %c0_0 = arith.constant 0 : index
    %c0_1 = arith.constant 0 : index
    %0 = vector.load %arg1[%c0, %c0_0, %c0_1] : memref<1x16x4xf32, #tpu.memory_space<vmem>>, vector<1x16x4xf32>
    %1 = vector.shape_cast %0 : vector<1x16x4xf32> to vector<16x4xf32>
    %c1_i32 = arith.constant 1 : i32
    %2 = tpu.dynamic_rotate %1 by %c1_i32 dim 0 : vector<16x4xf32>, i32 -> vector<16x4xf32>
    %c15_i32 = arith.constant 15 : i32
    %3 = tpu.dynamic_rotate %1 by %c15_i32 dim 0 : vector<16x4xf32>, i32 -> vector<16x4xf32>
    %c0_2 = arith.constant 0 : index
    %c0_3 = arith.constant 0 : index
    %4 = vector.load %arg2[%c0_2, %c0_3] : memref<4x32xf32, #tpu.memory_space<vmem>>, vector<4x32xf32>
    %cst = arith.constant dense<0.000000e+00> : vector<16x32xf32>
    %5 = tpu.matmul %2, %4, %cst {dimension_numbers = #tpu.dot_dimension_numbers<[1], [0], [0], [1], [0, 0, 1, 1], [], []>} : vector<16x4xf32>, vector<4x32xf32>, vector<16x32xf32> -> vector<16x32xf32>
    %c0_4 = arith.constant 0 : index
    %c0_5 = arith.constant 0 : index
    %6 = vector.load %arg3[%c0_4, %c0_5] : memref<4x32xf32, #tpu.memory_space<vmem>>, vector<4x32xf32>
    %cst_6 = arith.constant dense<0.000000e+00> : vector<16x32xf32>
    %7 = tpu.matmul %1, %6, %cst_6 {dimension_numbers = #tpu.dot_dimension_numbers<[1], [0], [0], [1], [0, 0, 1, 1], [], []>} : vector<16x4xf32>, vector<4x32xf32>, vector<16x32xf32> -> vector<16x32xf32>
    %8 = arith.addf %5, %7 : vector<16x32xf32>
    %c0_7 = arith.constant 0 : index
    %c0_8 = arith.constant 0 : index
    %9 = vector.load %arg4[%c0_7, %c0_8] : memref<4x32xf32, #tpu.memory_space<vmem>>, vector<4x32xf32>
    %cst_9 = arith.constant dense<0.000000e+00> : vector<16x32xf32>
    %10 = tpu.matmul %3, %9, %cst_9 {dimension_numbers = #tpu.dot_dimension_numbers<[1], [0], [0], [1], [0, 0, 1, 1], [], []>} : vector<16x4xf32>, vector<4x32xf32>, vector<16x32xf32> -> vector<16x32xf32>
    %11 = arith.addf %8, %10 : vector<16x32xf32>
    %c0_10 = arith.constant 0 : index
    %c0_11 = arith.constant 0 : index
    %12 = vector.load %arg5[%c0_10, %c0_11] : memref<1x32xf32, #tpu.memory_space<vmem>>, vector<1x32xf32>
    %13 = vector.broadcast %12 : vector<1x32xf32> to vector<16x32xf32>
    %14 = arith.addf %11, %13 : vector<16x32xf32>
    %c0_12 = arith.constant 0 : index
    %c0_13 = arith.constant 0 : index
    %15 = vector.load %arg6[%c0_12, %c0_13] : memref<16x32xf32, #tpu.memory_space<vmem>>, vector<16x32xf32>
    %16 = arith.addf %14, %15 : vector<16x32xf32>
    %c0_14 = arith.constant 0 : index
    %c0_15 = arith.constant 0 : index
    %c0_16 = arith.constant 0 : index
    %17 = vector.load %arg7[%c0_14, %c0_15, %c0_16] : memref<1x16x32xf32, #tpu.memory_space<vmem>>, vector<1x16x32xf32>
    %18 = vector.shape_cast %17 : vector<1x16x32xf32> to vector<16x32xf32>
    %19 = vector.shape_cast %16 : vector<16x32xf32> to vector<1x16x32xf32>
    tpu.vector_store %arg7[%c0_14, %c0_15, %c0_16], %19 {strides = array<i32>} : memref<1x16x32xf32, #tpu.memory_space<vmem>>, vector<1x16x32xf32>,
    return
  }
  func.func @transform_0(%arg0: i32) -> (i32, i32, i32) {
    %c0_i32 = arith.constant 0 : i32
    %c0_i32_0 = arith.constant 0 : i32
    %c0_i32_1 = arith.constant 0 : i32
    return %arg0, %c0_i32, %c0_i32_0 : i32, i32, i32
  }
  func.func @transform_1(%arg0: i32) -> (i32, i32) {
    %c0_i32 = arith.constant 0 : i32
    %c0_i32_0 = arith.constant 0 : i32
    %c0_i32_1 = arith.constant 0 : i32
    return %c0_i32, %c0_i32_0 : i32, i32
  }
  func.func @transform_2(%arg0: i32) -> (i32, i32) {
    %c0_i32 = arith.constant 0 : i32
    %c0_i32_0 = arith.constant 0 : i32
    %c0_i32_1 = arith.constant 0 : i32
    return %c0_i32, %c0_i32_0 : i32, i32
  }
  func.func @transform_3(%arg0: i32) -> (i32, i32) {
    %c0_i32 = arith.constant 0 : i32
    %c0_i32_0 = arith.constant 0 : i32
    %c0_i32_1 = arith.constant 0 : i32
    return %c0_i32, %c0_i32_0 : i32, i32
  }
  func.func @transform_4(%arg0: i32) -> (i32, i32) {
    %c0_i32 = arith.constant 0 : i32
    %c0_i32_0 = arith.constant 0 : i32
    %c0_i32_1 = arith.constant 0 : i32
    return %c0_i32, %c0_i32_0 : i32, i32
  }
  func.func @transform_5(%arg0: i32) -> (i32, i32) {
    %c0_i32 = arith.constant 0 : i32
    %c0_i32_0 = arith.constant 0 : i32
    %c0_i32_1 = arith.constant 0 : i32
    return %c0_i32, %c0_i32_0 : i32, i32
  }
  func.func @transform_6(%arg0: i32) -> (i32, i32, i32) {
    %c0_i32 = arith.constant 0 : i32
    %c0_i32_0 = arith.constant 0 : i32
    %c0_i32_1 = arith.constant 0 : i32
    return %arg0, %c0_i32, %c0_i32_0 : i32, i32, i32
  }
}

module attributes {stable_mosaic.version = 11 : i64} {
  func.func @_linear_kernel(%arg0: i32, %arg1: memref<32x32xbf16, #tpu.memory_space<vmem>>, %arg2: memref<32x96xbf16, #tpu.memory_space<vmem>>, %arg3: memref<1x96xf32, #tpu.memory_space<vmem>>, %arg4: memref<32x96xbf16, #tpu.memory_space<vmem>>) attributes {dimension_semantics = [#tpu.dimension_semantics<parallel>], iteration_bounds = array<i64: 1>, scalar_prefetch = 0 : i64, scratch_operands = 0 : i64, tpu.core_type = #tpu.core_type<tc>, window_params = [{transform_indices = @transform_0, window_bounds = array<i64: 32, 32>}, {pipeline_mode = #tpu.pipeline_mode<synchronous>, transform_indices = @transform_1, window_bounds = array<i64: 32, 96>}, {pipeline_mode = #tpu.pipeline_mode<synchronous>, transform_indices = @transform_2, window_bounds = array<i64: 1, 96>}, {transform_indices = @transform_3, window_bounds = array<i64: 32, 96>}]} {
    %c0 = arith.constant 0 : index
    %c0_0 = arith.constant 0 : index
    %0 = vector.load %arg1[%c0, %c0_0] : memref<32x32xbf16, #tpu.memory_space<vmem>>, vector<32x32xbf16>
    %c0_1 = arith.constant 0 : index
    %c0_2 = arith.constant 0 : index
    %1 = vector.load %arg2[%c0_1, %c0_2] : memref<32x96xbf16, #tpu.memory_space<vmem>>, vector<32x96xbf16>
    %cst = arith.constant dense<0.000000e+00> : vector<32x96xf32>
    %2 = tpu.matmul %0, %1, %cst {dimension_numbers = #tpu.dot_dimension_numbers<[1], [0], [0], [1], [0, 0, 1, 1], [], []>} : vector<32x32xbf16>, vector<32x96xbf16>, vector<32x96xf32> -> vector<32x96xf32>
    %c0_3 = arith.constant 0 : index
    %c0_4 = arith.constant 0 : index
    %3 = vector.load %arg3[%c0_3, %c0_4] : memref<1x96xf32, #tpu.memory_space<vmem>>, vector<1x96xf32>
    %4 = vector.broadcast %3 : vector<1x96xf32> to vector<32x96xf32>
    %5 = arith.addf %2, %4 : vector<32x96xf32>
    %6 = arith.truncf %5 : vector<32x96xf32> to vector<32x96xbf16>
    %c0_5 = arith.constant 0 : index
    %c0_6 = arith.constant 0 : index
    %7 = vector.load %arg4[%c0_5, %c0_6] : memref<32x96xbf16, #tpu.memory_space<vmem>>, vector<32x96xbf16>
    tpu.vector_store %arg4[%c0_5, %c0_6], %6 {strides = array<i32>} : memref<32x96xbf16, #tpu.memory_space<vmem>>, vector<32x96xbf16>,
    return
  }
  func.func @transform_0(%arg0: i32) -> (i32, i32) {
    %c0_i32 = arith.constant 0 : i32
    %c0_i32_0 = arith.constant 0 : i32
    return %arg0, %c0_i32 : i32, i32
  }
  func.func @transform_1(%arg0: i32) -> (i32, i32) {
    %c0_i32 = arith.constant 0 : i32
    %c0_i32_0 = arith.constant 0 : i32
    %c0_i32_1 = arith.constant 0 : i32
    return %c0_i32, %c0_i32_0 : i32, i32
  }
  func.func @transform_2(%arg0: i32) -> (i32, i32) {
    %c0_i32 = arith.constant 0 : i32
    %c0_i32_0 = arith.constant 0 : i32
    %c0_i32_1 = arith.constant 0 : i32
    return %c0_i32, %c0_i32_0 : i32, i32
  }
  func.func @transform_3(%arg0: i32) -> (i32, i32) {
    %c0_i32 = arith.constant 0 : i32
    %c0_i32_0 = arith.constant 0 : i32
    return %arg0, %c0_i32 : i32, i32
  }
}

module attributes {stable_mosaic.version = 11 : i64} {
  func.func @_mha_kernel(%arg0: i32, %arg1: memref<1x16x32xbf16, #tpu.memory_space<vmem>>, %arg2: memref<1x16x32xbf16, #tpu.memory_space<vmem>>, %arg3: memref<1x16x32xbf16, #tpu.memory_space<vmem>>, %arg4: memref<1x16x32xbf16, #tpu.memory_space<vmem>>) attributes {dimension_semantics = [#tpu.dimension_semantics<parallel>], iteration_bounds = array<i64: 2>, scalar_prefetch = 0 : i64, scratch_operands = 0 : i64, tpu.core_type = #tpu.core_type<tc>, window_params = [{transform_indices = @transform_0, window_bounds = array<i64: 1, 16, 32>}, {transform_indices = @transform_1, window_bounds = array<i64: 1, 16, 32>}, {transform_indices = @transform_2, window_bounds = array<i64: 1, 16, 32>}, {transform_indices = @transform_3, window_bounds = array<i64: 1, 16, 32>}]} {
    %c0 = arith.constant 0 : index
    %c0_0 = arith.constant 0 : index
    %c0_1 = arith.constant 0 : index
    %0 = vector.load %arg1[%c0, %c0_0, %c0_1] : memref<1x16x32xbf16, #tpu.memory_space<vmem>>, vector<1x16x32xbf16>
    %1 = vector.shape_cast %0 : vector<1x16x32xbf16> to vector<16x32xbf16>
    %c0_2 = arith.constant 0 : index
    %c0_3 = arith.constant 0 : index
    %c0_4 = arith.constant 0 : index
    %2 = vector.load %arg2[%c0_2, %c0_3, %c0_4] : memref<1x16x32xbf16, #tpu.memory_space<vmem>>, vector<1x16x32xbf16>
    %3 = vector.shape_cast %2 : vector<1x16x32xbf16> to vector<16x32xbf16>
    %c0_5 = arith.constant 0 : index
    %c0_6 = arith.constant 0 : index
    %c0_7 = arith.constant 0 : index
    %4 = vector.load %arg3[%c0_5, %c0_6, %c0_7] : memref<1x16x32xbf16, #tpu.memory_space<vmem>>, vector<1x16x32xbf16>
    %5 = vector.shape_cast %4 : vector<1x16x32xbf16> to vector<16x32xbf16>
    %6 = vector.extract_strided_slice %1 {offsets = [0, 0], sizes = [16, 8], strides = [1, 1]} : vector<16x32xbf16> to vector<16x8xbf16>
    %7 = vector.extract_strided_slice %3 {offsets = [0, 0], sizes = [16, 8], strides = [1, 1]} : vector<16x32xbf16> to vector<16x8xbf16>
    %cst = arith.constant dense<0.000000e+00> : vector<16x16xf32>
    %8 = tpu.matmul %6, %7, %cst {dimension_numbers = #tpu.dot_dimension_numbers<[1], [1], [0], [0], [0, 0, 1, 0], [], []>} : vector<16x8xbf16>, vector<16x8xbf16>, vector<16x16xf32> -> vector<16x16xf32>
    %cst_8 = arith.constant 0.353553385 : f32
    %9 = vector.broadcast %cst_8 : f32 to vector<16x16xf32>
    %10 = arith.mulf %8, %9 : vector<16x16xf32>
    %cst_9 = arith.constant dense<0xFF800000> : vector<16xf32>
    %11 = vector.multi_reduction <maximumf>, %10, %cst_9 [1] : vector<16x16xf32> to vector<16xf32>
    %12 = vector.shape_cast %11 : vector<16xf32> to vector<16x1xf32>
    %13 = vector.broadcast %12 : vector<16x1xf32> to vector<16x16xf32>
    %14 = arith.subf %10, %13 : vector<16x16xf32>
    %15 = math.exp %14 : vector<16x16xf32>
    %cst_10 = arith.constant dense<0.000000e+00> : vector<16xf32>
    %16 = vector.multi_reduction <add>, %15, %cst_10 [1] : vector<16x16xf32> to vector<16xf32>
    %17 = vector.shape_cast %16 : vector<16xf32> to vector<16x1xf32>
    %18 = vector.broadcast %17 : vector<16x1xf32> to vector<16x16xf32>
    %19 = arith.divf %15, %18 : vector<16x16xf32>
    %20 = arith.truncf %19 : vector<16x16xf32> to vector<16x16xbf16>
    %21 = vector.extract_strided_slice %5 {offsets = [0, 0], sizes = [16, 8], strides = [1, 1]} : vector<16x32xbf16> to vector<16x8xbf16>
    %cst_11 = arith.constant dense<0.000000e+00> : vector<16x8xf32>
    %22 = tpu.matmul %20, %21, %cst_11 {dimension_numbers = #tpu.dot_dimension_numbers<[1], [0], [0], [1], [0, 0, 1, 1], [], []>} : vector<16x16xbf16>, vector<16x8xbf16>, vector<16x8xf32> -> vector<16x8xf32>
    %23 = arith.truncf %22 : vector<16x8xf32> to vector<16x8xbf16>
    %c0_12 = arith.constant 0 : index
    %c0_13 = arith.constant 0 : index
    %c0_14 = arith.constant 0 : index
    %24 = vector.load %arg4[%c0_12, %c0_13, %c0_14] : memref<1x16x32xbf16, #tpu.memory_space<vmem>>, vector<1x16x8xbf16>
    %25 = vector.shape_cast %24 : vector<1x16x8xbf16> to vector<16x8xbf16>
    %26 = vector.shape_cast %23 : vector<16x8xbf16> to vector<1x16x8xbf16>
    tpu.vector_store %arg4[%c0_12, %c0_13, %c0_14], %26 {strides = array<i32>} : memref<1x16x32xbf16, #tpu.memory_space<vmem>>, vector<1x16x8xbf16>,
    %27 = vector.extract_strided_slice %1 {offsets = [0, 8], sizes = [16, 8], strides = [1, 1]} : vector<16x32xbf16> to vector<16x8xbf16>
    %28 = vector.extract_strided_slice %3 {offsets = [0, 8], sizes = [16, 8], strides = [1, 1]} : vector<16x32xbf16> to vector<16x8xbf16>
    %cst_15 = arith.constant dense<0.000000e+00> : vector<16x16xf32>
    %29 = tpu.matmul %27, %28, %cst_15 {dimension_numbers = #tpu.dot_dimension_numbers<[1], [1], [0], [0], [0, 0, 1, 0], [], []>} : vector<16x8xbf16>, vector<16x8xbf16>, vector<16x16xf32> -> vector<16x16xf32>
    %cst_16 = arith.constant 0.353553385 : f32
    %30 = vector.broadcast %cst_16 : f32 to vector<16x16xf32>
    %31 = arith.mulf %29, %30 : vector<16x16xf32>
    %cst_17 = arith.constant dense<0xFF800000> : vector<16xf32>
    %32 = vector.multi_reduction <maximumf>, %31, %cst_17 [1] : vector<16x16xf32> to vector<16xf32>
    %33 = vector.shape_cast %32 : vector<16xf32> to vector<16x1xf32>
    %34 = vector.broadcast %33 : vector<16x1xf32> to vector<16x16xf32>
    %35 = arith.subf %31, %34 : vector<16x16xf32>
    %36 = math.exp %35 : vector<16x16xf32>
    %cst_18 = arith.constant dense<0.000000e+00> : vector<16xf32>
    %37 = vector.multi_reduction <add>, %36, %cst_18 [1] : vector<16x16xf32> to vector<16xf32>
    %38 = vector.shape_cast %37 : vector<16xf32> to vector<16x1xf32>
    %39 = vector.broadcast %38 : vector<16x1xf32> to vector<16x16xf32>
    %40 = arith.divf %36, %39 : vector<16x16xf32>
    %41 = arith.truncf %40 : vector<16x16xf32> to vector<16x16xbf16>
    %42 = vector.extract_strided_slice %5 {offsets = [0, 8], sizes = [16, 8], strides = [1, 1]} : vector<16x32xbf16> to vector<16x8xbf16>
    %cst_19 = arith.constant dense<0.000000e+00> : vector<16x8xf32>
    %43 = tpu.matmul %41, %42, %cst_19 {dimension_numbers = #tpu.dot_dimension_numbers<[1], [0], [0], [1], [0, 0, 1, 1], [], []>} : vector<16x16xbf16>, vector<16x8xbf16>, vector<16x8xf32> -> vector<16x8xf32>
    %44 = arith.truncf %43 : vector<16x8xf32> to vector<16x8xbf16>
    %c0_20 = arith.constant 0 : index
    %c0_21 = arith.constant 0 : index
    %c8 = arith.constant 8 : index
    %45 = vector.load %arg4[%c0_20, %c0_21, %c8] : memref<1x16x32xbf16, #tpu.memory_space<vmem>>, vector<1x16x8xbf16>
    %46 = vector.shape_cast %45 : vector<1x16x8xbf16> to vector<16x8xbf16>
    %47 = vector.shape_cast %44 : vector<16x8xbf16> to vector<1x16x8xbf16>
    tpu.vector_store %arg4[%c0_20, %c0_21, %c8], %47 {strides = array<i32>} : memref<1x16x32xbf16, #tpu.memory_space<vmem>>, vector<1x16x8xbf16>,
    %48 = vector.extract_strided_slice %1 {offsets = [0, 16], sizes = [16, 8], strides = [1, 1]} : vector<16x32xbf16> to vector<16x8xbf16>
    %49 = vector.extract_strided_slice %3 {offsets = [0, 16], sizes = [16, 8], strides = [1, 1]} : vector<16x32xbf16> to vector<16x8xbf16>
    %cst_22 = arith.constant dense<0.000000e+00> : vector<16x16xf32>
    %50 = tpu.matmul %48, %49, %cst_22 {dimension_numbers = #tpu.dot_dimension_numbers<[1], [1], [0], [0], [0, 0, 1, 0], [], []>} : vector<16x8xbf16>, vector<16x8xbf16>, vector<16x16xf32> -> vector<16x16xf32>
    %cst_23 = arith.constant 0.353553385 : f32
    %51 = vector.broadcast %cst_23 : f32 to vector<16x16xf32>
    %52 = arith.mulf %50, %51 : vector<16x16xf32>
    %cst_24 = arith.constant dense<0xFF800000> : vector<16xf32>
    %53 = vector.multi_reduction <maximumf>, %52, %cst_24 [1] : vector<16x16xf32> to vector<16xf32>
    %54 = vector.shape_cast %53 : vector<16xf32> to vector<16x1xf32>
    %55 = vector.broadcast %54 : vector<16x1xf32> to vector<16x16xf32>
    %56 = arith.subf %52, %55 : vector<16x16xf32>
    %57 = math.exp %56 : vector<16x16xf32>
    %cst_25 = arith.constant dense<0.000000e+00> : vector<16xf32>
    %58 = vector.multi_reduction <add>, %57, %cst_25 [1] : vector<16x16xf32> to vector<16xf32>
    %59 = vector.shape_cast %58 : vector<16xf32> to vector<16x1xf32>
    %60 = vector.broadcast %59 : vector<16x1xf32> to vector<16x16xf32>
    %61 = arith.divf %57, %60 : vector<16x16xf32>
    %62 = arith.truncf %61 : vector<16x16xf32> to vector<16x16xbf16>
    %63 = vector.extract_strided_slice %5 {offsets = [0, 16], sizes = [16, 8], strides = [1, 1]} : vector<16x32xbf16> to vector<16x8xbf16>
    %cst_26 = arith.constant dense<0.000000e+00> : vector<16x8xf32>
    %64 = tpu.matmul %62, %63, %cst_26 {dimension_numbers = #tpu.dot_dimension_numbers<[1], [0], [0], [1], [0, 0, 1, 1], [], []>} : vector<16x16xbf16>, vector<16x8xbf16>, vector<16x8xf32> -> vector<16x8xf32>
    %65 = arith.truncf %64 : vector<16x8xf32> to vector<16x8xbf16>
    %c0_27 = arith.constant 0 : index
    %c0_28 = arith.constant 0 : index
    %c16 = arith.constant 16 : index
    %66 = vector.load %arg4[%c0_27, %c0_28, %c16] : memref<1x16x32xbf16, #tpu.memory_space<vmem>>, vector<1x16x8xbf16>
    %67 = vector.shape_cast %66 : vector<1x16x8xbf16> to vector<16x8xbf16>
    %68 = vector.shape_cast %65 : vector<16x8xbf16> to vector<1x16x8xbf16>
    tpu.vector_store %arg4[%c0_27, %c0_28, %c16], %68 {strides = array<i32>} : memref<1x16x32xbf16, #tpu.memory_space<vmem>>, vector<1x16x8xbf16>,
    %69 = vector.extract_strided_slice %1 {offsets = [0, 24], sizes = [16, 8], strides = [1, 1]} : vector<16x32xbf16> to vector<16x8xbf16>
    %70 = vector.extract_strided_slice %3 {offsets = [0, 24], sizes = [16, 8], strides = [1, 1]} : vector<16x32xbf16> to vector<16x8xbf16>
    %cst_29 = arith.constant dense<0.000000e+00> : vector<16x16xf32>
    %71 = tpu.matmul %69, %70, %cst_29 {dimension_numbers = #tpu.dot_dimension_numbers<[1], [1], [0], [0], [0, 0, 1, 0], [], []>} : vector<16x8xbf16>, vector<16x8xbf16>, vector<16x16xf32> -> vector<16x16xf32>
    %cst_30 = arith.constant 0.353553385 : f32
    %72 = vector.broadcast %cst_30 : f32 to vector<16x16xf32>
    %73 = arith.mulf %71, %72 : vector<16x16xf32>
    %cst_31 = arith.constant dense<0xFF800000> : vector<16xf32>
    %74 = vector.multi_reduction <maximumf>, %73, %cst_31 [1] : vector<16x16xf32> to vector<16xf32>
    %75 = vector.shape_cast %74 : vector<16xf32> to vector<16x1xf32>
    %76 = vector.broadcast %75 : vector<16x1xf32> to vector<16x16xf32>
    %77 = arith.subf %73, %76 : vector<16x16xf32>
    %78 = math.exp %77 : vector<16x16xf32>
    %cst_32 = arith.constant dense<0.000000e+00> : vector<16xf32>
    %79 = vector.multi_reduction <add>, %78, %cst_32 [1] : vector<16x16xf32> to vector<16xf32>
    %80 = vector.shape_cast %79 : vector<16xf32> to vector<16x1xf32>
    %81 = vector.broadcast %80 : vector<16x1xf32> to vector<16x16xf32>
    %82 = arith.divf %78, %81 : vector<16x16xf32>
    %83 = arith.truncf %82 : vector<16x16xf32> to vector<16x16xbf16>
    %84 = vector.extract_strided_slice %5 {offsets = [0, 24], sizes = [16, 8], strides = [1, 1]} : vector<16x32xbf16> to vector<16x8xbf16>
    %cst_33 = arith.constant dense<0.000000e+00> : vector<16x8xf32>
    %85 = tpu.matmul %83, %84, %cst_33 {dimension_numbers = #tpu.dot_dimension_numbers<[1], [0], [0], [1], [0, 0, 1, 1], [], []>} : vector<16x16xbf16>, vector<16x8xbf16>, vector<16x8xf32> -> vector<16x8xf32>
    %86 = arith.truncf %85 : vector<16x8xf32> to vector<16x8xbf16>
    %c0_34 = arith.constant 0 : index
    %c0_35 = arith.constant 0 : index
    %c24 = arith.constant 24 : index
    %87 = vector.load %arg4[%c0_34, %c0_35, %c24] : memref<1x16x32xbf16, #tpu.memory_space<vmem>>, vector<1x16x8xbf16>
    %88 = vector.shape_cast %87 : vector<1x16x8xbf16> to vector<16x8xbf16>
    %89 = vector.shape_cast %86 : vector<16x8xbf16> to vector<1x16x8xbf16>
    tpu.vector_store %arg4[%c0_34, %c0_35, %c24], %89 {strides = array<i32>} : memref<1x16x32xbf16, #tpu.memory_space<vmem>>, vector<1x16x8xbf16>,
    return
  }
  func.func @transform_0(%arg0: i32) -> (i32, i32, i32) {
    %c0_i32 = arith.constant 0 : i32
    %c0_i32_0 = arith.constant 0 : i32
    %c0_i32_1 = arith.constant 0 : i32
    return %arg0, %c0_i32, %c0_i32_0 : i32, i32, i32
  }
  func.func @transform_1(%arg0: i32) -> (i32, i32, i32) {
    %c0_i32 = arith.constant 0 : i32
    %c0_i32_0 = arith.constant 0 : i32
    %c0_i32_1 = arith.constant 0 : i32
    return %arg0, %c0_i32, %c0_i32_0 : i32, i32, i32
  }
  func.func @transform_2(%arg0: i32) -> (i32, i32, i32) {
    %c0_i32 = arith.constant 0 : i32
    %c0_i32_0 = arith.constant 0 : i32
    %c0_i32_1 = arith.constant 0 : i32
    return %arg0, %c0_i32, %c0_i32_0 : i32, i32, i32
  }
  func.func @transform_3(%arg0: i32) -> (i32, i32, i32) {
    %c0_i32 = arith.constant 0 : i32
    %c0_i32_0 = arith.constant 0 : i32
    %c0_i32_1 = arith.constant 0 : i32
    return %arg0, %c0_i32, %c0_i32_0 : i32, i32, i32
  }
}

module attributes {stable_mosaic.version = 11 : i64} {
  func.func @_linear_add_ln_kernel(%arg0: i32, %arg1: memref<32x32xbf16, #tpu.memory_space<vmem>>, %arg2: memref<32x32xbf16, #tpu.memory_space<vmem>>, %arg3: memref<1x32xf32, #tpu.memory_space<vmem>>, %arg4: memref<32x32xf32, #tpu.memory_space<vmem>>, %arg5: memref<1x32xf32, #tpu.memory_space<vmem>>, %arg6: memref<1x32xf32, #tpu.memory_space<vmem>>, %arg7: memref<32x32xf32, #tpu.memory_space<vmem>>) attributes {dimension_semantics = [#tpu.dimension_semantics<parallel>], iteration_bounds = array<i64: 1>, scalar_prefetch = 0 : i64, scratch_operands = 0 : i64, tpu.core_type = #tpu.core_type<tc>, window_params = [{transform_indices = @transform_0, window_bounds = array<i64: 32, 32>}, {pipeline_mode = #tpu.pipeline_mode<synchronous>, transform_indices = @transform_1, window_bounds = array<i64: 32, 32>}, {pipeline_mode = #tpu.pipeline_mode<synchronous>, transform_indices = @transform_2, window_bounds = array<i64: 1, 32>}, {transform_indices = @transform_3, window_bounds = array<i64: 32, 32>}, {pipeline_mode = #tpu.pipeline_mode<synchronous>, transform_indices = @transform_4, window_bounds = array<i64: 1, 32>}, {pipeline_mode = #tpu.pipeline_mode<synchronous>, transform_indices = @transform_5, window_bounds = array<i64: 1, 32>}, {transform_indices = @transform_6, window_bounds = array<i64: 32, 32>}]} {
    %c0 = arith.constant 0 : index
    %c0_0 = arith.constant 0 : index
    %0 = vector.load %arg1[%c0, %c0_0] : memref<32x32xbf16, #tpu.memory_space<vmem>>, vector<32x32xbf16>
    %c0_1 = arith.constant 0 : index
    %c0_2 = arith.constant 0 : index
    %1 = vector.load %arg2[%c0_1, %c0_2] : memref<32x32xbf16, #tpu.memory_space<vmem>>, vector<32x32xbf16>
    %cst = arith.constant dense<0.000000e+00> : vector<32x32xf32>
    %2 = tpu.matmul %0, %1, %cst {dimension_numbers = #tpu.dot_dimension_numbers<[1], [0], [0], [1], [0, 0, 1, 1], [], []>} : vector<32x32xbf16>, vector<32x32xbf16>, vector<32x32xf32> -> vector<32x32xf32>
    %c0_3 = arith.constant 0 : index
    %c0_4 = arith.constant 0 : index
    %3 = vector.load %arg3[%c0_3, %c0_4] : memref<1x32xf32, #tpu.memory_space<vmem>>, vector<1x32xf32>
    %4 = vector.broadcast %3 : vector<1x32xf32> to vector<32x32xf32>
    %5 = arith.addf %2, %4 : vector<32x32xf32>
    %c0_5 = arith.constant 0 : index
    %c0_6 = arith.constant 0 : index
    %6 = vector.load %arg4[%c0_5, %c0_6] : memref<32x32xf32, #tpu.memory_space<vmem>>, vector<32x32xf32>
    %7 = arith.addf %6, %5 : vector<32x32xf32>
    %cst_7 = arith.constant dense<0.000000e+00> : vector<32xf32>
    %8 = vector.multi_reduction <add>, %7, %cst_7 [1] : vector<32x32xf32> to vector<32xf32>
    %9 = vector.shape_cast %8 : vector<32xf32> to vector<32x1xf32>
    %cst_8 = arith.constant 3.200000e+01 : f32
    %10 = vector.broadcast %cst_8 : f32 to vector<32x1xf32>
    %11 = arith.divf %9, %10 : vector<32x1xf32>
    %12 = vector.broadcast %11 : vector<32x1xf32> to vector<32x32xf32>
    %13 = arith.subf %7, %12 : vector<32x32xf32>
    %14 = arith.mulf %13, %13 : vector<32x32xf32>
    %cst_9 = arith.constant dense<0.000000e+00> : vector<32xf32>
    %15 = vector.multi_reduction <add>, %14, %cst_9 [1] : vector<32x32xf32> to vector<32xf32>
    %16 = vector.shape_cast %15 : vector<32xf32> to vector<32x1xf32>
    %cst_10 = arith.constant 3.200000e+01 : f32
    %17 = vector.broadcast %cst_10 : f32 to vector<32x1xf32>
    %18 = arith.divf %16, %17 : vector<32x1xf32>
    %19 = vector.broadcast %11 : vector<32x1xf32> to vector<32x32xf32>
    %20 = arith.subf %7, %19 : vector<32x32xf32>
    %cst_11 = arith.constant 9.99999974E-6 : f32
    %21 = vector.broadcast %cst_11 : f32 to vector<32x1xf32>
    %22 = arith.addf %18, %21 : vector<32x1xf32>
    %23 = math.rsqrt %22 : vector<32x1xf32>
    %24 = vector.broadcast %23 : vector<32x1xf32> to vector<32x32xf32>
    %25 = arith.mulf %20, %24 : vector<32x32xf32>
    %c0_12 = arith.constant 0 : index
    %c0_13 = arith.constant 0 : index
    %26 = vector.load %arg5[%c0_12, %c0_13] : memref<1x32xf32, #tpu.memory_space<vmem>>, vector<1x32xf32>
    %27 = vector.broadcast %26 : vector<1x32xf32> to vector<32x32xf32>
    %28 = arith.mulf %25, %27 : vector<32x32xf32>
    %c0_14 = arith.constant 0 : index
    %c0_15 = arith.constant 0 : index
    %29 = vector.load %arg6[%c0_14, %c0_15] : memref<1x32xf32, #tpu.memory_space<vmem>>, vector<1x32xf32>
    %30 = vector.broadcast %29 : vector<1x32xf32> to vector<32x32xf32>
    %31 = arith.addf %28, %30 : vector<32x32xf32>
    %c0_16 = arith.constant 0 : index
    %c0_17 = arith.constant 0 : index
    %32 = vector.load %arg7[%c0_16, %c0_17] : memref<32x32xf32, #tpu.memory_space<vmem>>, vector<32x32xf32>
    tpu.vector_store %arg7[%c0_16, %c0_17], %31 {strides = array<i32>} : memref<32x32xf32, #tpu.memory_space<vmem>>, vector<32x32xf32>,
    return
  }
  func.func @transform_0(%arg0: i32) -> (i32, i32) {
    %c0_i32 = arith.constant 0 : i32
    %c0_i32_0 = arith.constant 0 : i32
    return %arg0, %c0_i32 : i32, i32
  }
  func.func @transform_1(%arg0: i32) -> (i32, i32) {
    %c0_i32 = arith.constant 0 : i32
    %c0_i32_0 = arith.constant 0 : i32
    %c0_i32_1 = arith.constant 0 : i32
    return %c0_i32, %c0_i32_0 : i32, i32
  }
  func.func @transform_2(%arg0: i32) -> (i32, i32) {
    %c0_i32 = arith.constant 0 : i32
    %c0_i32_0 = arith.constant 0 : i32
    %c0_i32_1 = arith.constant 0 : i32
    return %c0_i32, %c0_i32_0 : i32, i32
  }
  func.func @transform_3(%arg0: i32) -> (i32, i32) {
    %c0_i32 = arith.constant 0 : i32
    %c0_i32_0 = arith.constant 0 : i32
    return %arg0, %c0_i32 : i32, i32
  }
  func.func @transform_4(%arg0: i32) -> (i32, i32) {
    %c0_i32 = arith.constant 0 : i32
    %c0_i32_0 = arith.constant 0 : i32
    %c0_i32_1 = arith.constant 0 : i32
    return %c0_i32, %c0_i32_0 : i32, i32
  }
  func.func @transform_5(%arg0: i32) -> (i32, i32) {
    %c0_i32 = arith.constant 0 : i32
    %c0_i32_0 = arith.constant 0 : i32
    %c0_i32_1 = arith.constant 0 : i32
    return %c0_i32, %c0_i32_0 : i32, i32
  }
  func.func @transform_6(%arg0: i32) -> (i32, i32) {
    %c0_i32 = arith.constant 0 : i32
    %c0_i32_0 = arith.constant 0 : i32
    return %arg0, %c0_i32 : i32, i32
  }
}

module attributes {stable_mosaic.version = 11 : i64} {
  func.func @_ffn_add_ln_kernel(%arg0: i32, %arg1: memref<32x32xf32, #tpu.memory_space<vmem>>, %arg2: memref<32x32xbf16, #tpu.memory_space<vmem>>, %arg3: memref<1x32xf32, #tpu.memory_space<vmem>>, %arg4: memref<32x32xbf16, #tpu.memory_space<vmem>>, %arg5: memref<1x32xf32, #tpu.memory_space<vmem>>, %arg6: memref<1x32xf32, #tpu.memory_space<vmem>>, %arg7: memref<1x32xf32, #tpu.memory_space<vmem>>, %arg8: memref<32x32xf32, #tpu.memory_space<vmem>>) attributes {dimension_semantics = [#tpu.dimension_semantics<parallel>], iteration_bounds = array<i64: 1>, scalar_prefetch = 0 : i64, scratch_operands = 0 : i64, tpu.core_type = #tpu.core_type<tc>, window_params = [{transform_indices = @transform_0, window_bounds = array<i64: 32, 32>}, {pipeline_mode = #tpu.pipeline_mode<synchronous>, transform_indices = @transform_1, window_bounds = array<i64: 32, 32>}, {pipeline_mode = #tpu.pipeline_mode<synchronous>, transform_indices = @transform_2, window_bounds = array<i64: 1, 32>}, {pipeline_mode = #tpu.pipeline_mode<synchronous>, transform_indices = @transform_3, window_bounds = array<i64: 32, 32>}, {pipeline_mode = #tpu.pipeline_mode<synchronous>, transform_indices = @transform_4, window_bounds = array<i64: 1, 32>}, {pipeline_mode = #tpu.pipeline_mode<synchronous>, transform_indices = @transform_5, window_bounds = array<i64: 1, 32>}, {pipeline_mode = #tpu.pipeline_mode<synchronous>, transform_indices = @transform_6, window_bounds = array<i64: 1, 32>}, {transform_indices = @transform_7, window_bounds = array<i64: 32, 32>}]} {
    %c0 = arith.constant 0 : index
    %c0_0 = arith.constant 0 : index
    %0 = vector.load %arg1[%c0, %c0_0] : memref<32x32xf32, #tpu.memory_space<vmem>>, vector<32x32xf32>
    %1 = arith.truncf %0 : vector<32x32xf32> to vector<32x32xbf16>
    %c0_1 = arith.constant 0 : index
    %c0_2 = arith.constant 0 : index
    %2 = vector.load %arg2[%c0_1, %c0_2] : memref<32x32xbf16, #tpu.memory_space<vmem>>, vector<32x32xbf16>
    %cst = arith.constant dense<0.000000e+00> : vector<32x32xf32>
    %3 = tpu.matmul %1, %2, %cst {dimension_numbers = #tpu.dot_dimension_numbers<[1], [0], [0], [1], [0, 0, 1, 1], [], []>} : vector<32x32xbf16>, vector<32x32xbf16>, vector<32x32xf32> -> vector<32x32xf32>
    %c0_3 = arith.constant 0 : index
    %c0_4 = arith.constant 0 : index
    %4 = vector.load %arg3[%c0_3, %c0_4] : memref<1x32xf32, #tpu.memory_space<vmem>>, vector<1x32xf32>
    %5 = vector.broadcast %4 : vector<1x32xf32> to vector<32x32xf32>
    %6 = arith.addf %3, %5 : vector<32x32xf32>
    %cst_5 = arith.constant 5.000000e-01 : f32
    %7 = vector.broadcast %cst_5 : f32 to vector<32x32xf32>
    %8 = arith.mulf %7, %6 : vector<32x32xf32>
    %cst_6 = arith.constant 0.707106769 : f32
    %9 = vector.broadcast %cst_6 : f32 to vector<32x32xf32>
    %10 = arith.mulf %6, %9 : vector<32x32xf32>
    %11 = math.erf %10 : vector<32x32xf32>
    %cst_7 = arith.constant 1.000000e+00 : f32
    %12 = vector.broadcast %cst_7 : f32 to vector<32x32xf32>
    %13 = arith.addf %12, %11 : vector<32x32xf32>
    %14 = arith.mulf %8, %13 : vector<32x32xf32>
    %15 = arith.truncf %14 : vector<32x32xf32> to vector<32x32xbf16>
    %c0_8 = arith.constant 0 : index
    %c0_9 = arith.constant 0 : index
    %16 = vector.load %arg4[%c0_8, %c0_9] : memref<32x32xbf16, #tpu.memory_space<vmem>>, vector<32x32xbf16>
    %cst_10 = arith.constant dense<0.000000e+00> : vector<32x32xf32>
    %17 = tpu.matmul %15, %16, %cst_10 {dimension_numbers = #tpu.dot_dimension_numbers<[1], [0], [0], [1], [0, 0, 1, 1], [], []>} : vector<32x32xbf16>, vector<32x32xbf16>, vector<32x32xf32> -> vector<32x32xf32>
    %c0_11 = arith.constant 0 : index
    %c0_12 = arith.constant 0 : index
    %18 = vector.load %arg5[%c0_11, %c0_12] : memref<1x32xf32, #tpu.memory_space<vmem>>, vector<1x32xf32>
    %19 = vector.broadcast %18 : vector<1x32xf32> to vector<32x32xf32>
    %20 = arith.addf %17, %19 : vector<32x32xf32>
    %21 = arith.addf %0, %20 : vector<32x32xf32>
    %cst_13 = arith.constant dense<0.000000e+00> : vector<32xf32>
    %22 = vector.multi_reduction <add>, %21, %cst_13 [1] : vector<32x32xf32> to vector<32xf32>
    %23 = vector.shape_cast %22 : vector<32xf32> to vector<32x1xf32>
    %cst_14 = arith.constant 3.200000e+01 : f32
    %24 = vector.broadcast %cst_14 : f32 to vector<32x1xf32>
    %25 = arith.divf %23, %24 : vector<32x1xf32>
    %26 = vector.broadcast %25 : vector<32x1xf32> to vector<32x32xf32>
    %27 = arith.subf %21, %26 : vector<32x32xf32>
    %28 = arith.mulf %27, %27 : vector<32x32xf32>
    %cst_15 = arith.constant dense<0.000000e+00> : vector<32xf32>
    %29 = vector.multi_reduction <add>, %28, %cst_15 [1] : vector<32x32xf32> to vector<32xf32>
    %30 = vector.shape_cast %29 : vector<32xf32> to vector<32x1xf32>
    %cst_16 = arith.constant 3.200000e+01 : f32
    %31 = vector.broadcast %cst_16 : f32 to vector<32x1xf32>
    %32 = arith.divf %30, %31 : vector<32x1xf32>
    %33 = vector.broadcast %25 : vector<32x1xf32> to vector<32x32xf32>
    %34 = arith.subf %21, %33 : vector<32x32xf32>
    %cst_17 = arith.constant 9.99999974E-6 : f32
    %35 = vector.broadcast %cst_17 : f32 to vector<32x1xf32>
    %36 = arith.addf %32, %35 : vector<32x1xf32>
    %37 = math.rsqrt %36 : vector<32x1xf32>
    %38 = vector.broadcast %37 : vector<32x1xf32> to vector<32x32xf32>
    %39 = arith.mulf %34, %38 : vector<32x32xf32>
    %c0_18 = arith.constant 0 : index
    %c0_19 = arith.constant 0 : index
    %40 = vector.load %arg6[%c0_18, %c0_19] : memref<1x32xf32, #tpu.memory_space<vmem>>, vector<1x32xf32>
    %41 = vector.broadcast %40 : vector<1x32xf32> to vector<32x32xf32>
    %42 = arith.mulf %39, %41 : vector<32x32xf32>
    %c0_20 = arith.constant 0 : index
    %c0_21 = arith.constant 0 : index
    %43 = vector.load %arg7[%c0_20, %c0_21] : memref<1x32xf32, #tpu.memory_space<vmem>>, vector<1x32xf32>
    %44 = vector.broadcast %43 : vector<1x32xf32> to vector<32x32xf32>
    %45 = arith.addf %42, %44 : vector<32x32xf32>
    %c0_22 = arith.constant 0 : index
    %c0_23 = arith.constant 0 : index
    %46 = vector.load %arg8[%c0_22, %c0_23] : memref<32x32xf32, #tpu.memory_space<vmem>>, vector<32x32xf32>
    tpu.vector_store %arg8[%c0_22, %c0_23], %45 {strides = array<i32>} : memref<32x32xf32, #tpu.memory_space<vmem>>, vector<32x32xf32>,
    return
  }
  func.func @transform_0(%arg0: i32) -> (i32, i32) {
    %c0_i32 = arith.constant 0 : i32
    %c0_i32_0 = arith.constant 0 : i32
    return %arg0, %c0_i32 : i32, i32
  }
  func.func @transform_1(%arg0: i32) -> (i32, i32) {
    %c0_i32 = arith.constant 0 : i32
    %c0_i32_0 = arith.constant 0 : i32
    %c0_i32_1 = arith.constant 0 : i32
    return %c0_i32, %c0_i32_0 : i32, i32
  }
  func.func @transform_2(%arg0: i32) -> (i32, i32) {
    %c0_i32 = arith.constant 0 : i32
    %c0_i32_0 = arith.constant 0 : i32
    %c0_i32_1 = arith.constant 0 : i32
    return %c0_i32, %c0_i32_0 : i32, i32
  }
  func.func @transform_3(%arg0: i32) -> (i32, i32) {
    %c0_i32 = arith.constant 0 : i32
    %c0_i32_0 = arith.constant 0 : i32
    %c0_i32_1 = arith.constant 0 : i32
    return %c0_i32, %c0_i32_0 : i32, i32
  }
  func.func @transform_4(%arg0: i32) -> (i32, i32) {
    %c0_i32 = arith.constant 0 : i32
    %c0_i32_0 = arith.constant 0 : i32
    %c0_i32_1 = arith.constant 0 : i32
    return %c0_i32, %c0_i32_0 : i32, i32
  }
  func.func @transform_5(%arg0: i32) -> (i32, i32) {
    %c0_i32 = arith.constant 0 : i32
    %c0_i32_0 = arith.constant 0 : i32
    %c0_i32_1 = arith.constant 0 : i32
    return %c0_i32, %c0_i32_0 : i32, i32
  }
  func.func @transform_6(%arg0: i32) -> (i32, i32) {
    %c0_i32 = arith.constant 0 : i32
    %c0_i32_0 = arith.constant 0 : i32
    %c0_i32_1 = arith.constant 0 : i32
    return %c0_i32, %c0_i32_0 : i32, i32
  }
  func.func @transform_7(%arg0: i32) -> (i32, i32) {
    %c0_i32 = arith.constant 0 : i32
    %c0_i32_0 = arith.constant 0 : i32
    return %arg0, %c0_i32 : i32, i32
  }
}

module attributes {stable_mosaic.version = 11 : i64} {
  func.func @_circ_conv_kernel(%arg0: i32, %arg1: memref<1x16x32xf32, #tpu.memory_space<vmem>>, %arg2: memref<32x32xf32, #tpu.memory_space<vmem>>, %arg3: memref<32x32xf32, #tpu.memory_space<vmem>>, %arg4: memref<32x32xf32, #tpu.memory_space<vmem>>, %arg5: memref<1x32xf32, #tpu.memory_space<vmem>>, %arg6: memref<1x16x32xf32, #tpu.memory_space<vmem>>) attributes {dimension_semantics = [#tpu.dimension_semantics<parallel>], iteration_bounds = array<i64: 2>, scalar_prefetch = 0 : i64, scratch_operands = 0 : i64, tpu.core_type = #tpu.core_type<tc>, window_params = [{transform_indices = @transform_0, window_bounds = array<i64: 1, 16, 32>}, {pipeline_mode = #tpu.pipeline_mode<synchronous>, transform_indices = @transform_1, window_bounds = array<i64: 32, 32>}, {pipeline_mode = #tpu.pipeline_mode<synchronous>, transform_indices = @transform_2, window_bounds = array<i64: 32, 32>}, {pipeline_mode = #tpu.pipeline_mode<synchronous>, transform_indices = @transform_3, window_bounds = array<i64: 32, 32>}, {pipeline_mode = #tpu.pipeline_mode<synchronous>, transform_indices = @transform_4, window_bounds = array<i64: 1, 32>}, {transform_indices = @transform_5, window_bounds = array<i64: 1, 16, 32>}]} {
    %c0 = arith.constant 0 : index
    %c0_0 = arith.constant 0 : index
    %c0_1 = arith.constant 0 : index
    %0 = vector.load %arg1[%c0, %c0_0, %c0_1] : memref<1x16x32xf32, #tpu.memory_space<vmem>>, vector<1x16x32xf32>
    %1 = vector.shape_cast %0 : vector<1x16x32xf32> to vector<16x32xf32>
    %c1_i32 = arith.constant 1 : i32
    %2 = tpu.dynamic_rotate %1 by %c1_i32 dim 0 : vector<16x32xf32>, i32 -> vector<16x32xf32>
    %c15_i32 = arith.constant 15 : i32
    %3 = tpu.dynamic_rotate %1 by %c15_i32 dim 0 : vector<16x32xf32>, i32 -> vector<16x32xf32>
    %c0_2 = arith.constant 0 : index
    %c0_3 = arith.constant 0 : index
    %4 = vector.load %arg2[%c0_2, %c0_3] : memref<32x32xf32, #tpu.memory_space<vmem>>, vector<32x32xf32>
    %cst = arith.constant dense<0.000000e+00> : vector<16x32xf32>
    %5 = tpu.matmul %2, %4, %cst {dimension_numbers = #tpu.dot_dimension_numbers<[1], [0], [0], [1], [0, 0, 1, 1], [], []>} : vector<16x32xf32>, vector<32x32xf32>, vector<16x32xf32> -> vector<16x32xf32>
    %c0_4 = arith.constant 0 : index
    %c0_5 = arith.constant 0 : index
    %6 = vector.load %arg3[%c0_4, %c0_5] : memref<32x32xf32, #tpu.memory_space<vmem>>, vector<32x32xf32>
    %cst_6 = arith.constant dense<0.000000e+00> : vector<16x32xf32>
    %7 = tpu.matmul %1, %6, %cst_6 {dimension_numbers = #tpu.dot_dimension_numbers<[1], [0], [0], [1], [0, 0, 1, 1], [], []>} : vector<16x32xf32>, vector<32x32xf32>, vector<16x32xf32> -> vector<16x32xf32>
    %8 = arith.addf %5, %7 : vector<16x32xf32>
    %c0_7 = arith.constant 0 : index
    %c0_8 = arith.constant 0 : index
    %9 = vector.load %arg4[%c0_7, %c0_8] : memref<32x32xf32, #tpu.memory_space<vmem>>, vector<32x32xf32>
    %cst_9 = arith.constant dense<0.000000e+00> : vector<16x32xf32>
    %10 = tpu.matmul %3, %9, %cst_9 {dimension_numbers = #tpu.dot_dimension_numbers<[1], [0], [0], [1], [0, 0, 1, 1], [], []>} : vector<16x32xf32>, vector<32x32xf32>, vector<16x32xf32> -> vector<16x32xf32>
    %11 = arith.addf %8, %10 : vector<16x32xf32>
    %c0_10 = arith.constant 0 : index
    %c0_11 = arith.constant 0 : index
    %12 = vector.load %arg5[%c0_10, %c0_11] : memref<1x32xf32, #tpu.memory_space<vmem>>, vector<1x32xf32>
    %13 = vector.broadcast %12 : vector<1x32xf32> to vector<16x32xf32>
    %14 = arith.addf %11, %13 : vector<16x32xf32>
    %c0_12 = arith.constant 0 : index
    %c0_13 = arith.constant 0 : index
    %c0_14 = arith.constant 0 : index
    %15 = vector.load %arg6[%c0_12, %c0_13, %c0_14] : memref<1x16x32xf32, #tpu.memory_space<vmem>>, vector<1x16x32xf32>
    %16 = vector.shape_cast %15 : vector<1x16x32xf32> to vector<16x32xf32>
    %17 = vector.shape_cast %14 : vector<16x32xf32> to vector<1x16x32xf32>
    tpu.vector_store %arg6[%c0_12, %c0_13, %c0_14], %17 {strides = array<i32>} : memref<1x16x32xf32, #tpu.memory_space<vmem>>, vector<1x16x32xf32>,
    return
  }
  func.func @transform_0(%arg0: i32) -> (i32, i32, i32) {
    %c0_i32 = arith.constant 0 : i32
    %c0_i32_0 = arith.constant 0 : i32
    %c0_i32_1 = arith.constant 0 : i32
    return %arg0, %c0_i32, %c0_i32_0 : i32, i32, i32
  }
  func.func @transform_1(%arg0: i32) -> (i32, i32) {
    %c0_i32 = arith.constant 0 : i32
    %c0_i32_0 = arith.constant 0 : i32
    %c0_i32_1 = arith.constant 0 : i32
    return %c0_i32, %c0_i32_0 : i32, i32
  }
  func.func @transform_2(%arg0: i32) -> (i32, i32) {
    %c0_i32 = arith.constant 0 : i32
    %c0_i32_0 = arith.constant 0 : i32
    %c0_i32_1 = arith.constant 0 : i32
    return %c0_i32, %c0_i32_0 : i32, i32
  }
  func.func @transform_3(%arg0: i32) -> (i32, i32) {
    %c0_i32 = arith.constant 0 : i32
    %c0_i32_0 = arith.constant 0 : i32
    %c0_i32_1 = arith.constant 0 : i32
    return %c0_i32, %c0_i32_0 : i32, i32
  }
  func.func @transform_4(%arg0: i32) -> (i32, i32) {
    %c0_i32 = arith.constant 0 : i32
    %c0_i32_0 = arith.constant 0 : i32
    %c0_i32_1 = arith.constant 0 : i32
    return %c0_i32, %c0_i32_0 : i32, i32
  }
  func.func @transform_5(%arg0: i32) -> (i32, i32, i32) {
    %c0_i32 = arith.constant 0 : i32
    %c0_i32_0 = arith.constant 0 : i32
    %c0_i32_1 = arith.constant 0 : i32
    return %arg0, %c0_i32, %c0_i32_0 : i32, i32, i32
  }
}

module attributes {stable_mosaic.version = 11 : i64} {
  func.func @_linear_kernel(%arg0: i32, %arg1: memref<16x32xbf16, #tpu.memory_space<vmem>>, %arg2: memref<32x96xbf16, #tpu.memory_space<vmem>>, %arg3: memref<1x96xf32, #tpu.memory_space<vmem>>, %arg4: memref<16x96xbf16, #tpu.memory_space<vmem>>) attributes {dimension_semantics = [#tpu.dimension_semantics<parallel>], iteration_bounds = array<i64: 1>, scalar_prefetch = 0 : i64, scratch_operands = 0 : i64, tpu.core_type = #tpu.core_type<tc>, window_params = [{transform_indices = @transform_0, window_bounds = array<i64: 16, 32>}, {pipeline_mode = #tpu.pipeline_mode<synchronous>, transform_indices = @transform_1, window_bounds = array<i64: 32, 96>}, {pipeline_mode = #tpu.pipeline_mode<synchronous>, transform_indices = @transform_2, window_bounds = array<i64: 1, 96>}, {transform_indices = @transform_3, window_bounds = array<i64: 16, 96>}]} {
    %c0 = arith.constant 0 : index
    %c0_0 = arith.constant 0 : index
    %0 = vector.load %arg1[%c0, %c0_0] : memref<16x32xbf16, #tpu.memory_space<vmem>>, vector<16x32xbf16>
    %c0_1 = arith.constant 0 : index
    %c0_2 = arith.constant 0 : index
    %1 = vector.load %arg2[%c0_1, %c0_2] : memref<32x96xbf16, #tpu.memory_space<vmem>>, vector<32x96xbf16>
    %cst = arith.constant dense<0.000000e+00> : vector<16x96xf32>
    %2 = tpu.matmul %0, %1, %cst {dimension_numbers = #tpu.dot_dimension_numbers<[1], [0], [0], [1], [0, 0, 1, 1], [], []>} : vector<16x32xbf16>, vector<32x96xbf16>, vector<16x96xf32> -> vector<16x96xf32>
    %c0_3 = arith.constant 0 : index
    %c0_4 = arith.constant 0 : index
    %3 = vector.load %arg3[%c0_3, %c0_4] : memref<1x96xf32, #tpu.memory_space<vmem>>, vector<1x96xf32>
    %4 = vector.broadcast %3 : vector<1x96xf32> to vector<16x96xf32>
    %5 = arith.addf %2, %4 : vector<16x96xf32>
    %6 = arith.truncf %5 : vector<16x96xf32> to vector<16x96xbf16>
    %c0_5 = arith.constant 0 : index
    %c0_6 = arith.constant 0 : index
    %7 = vector.load %arg4[%c0_5, %c0_6] : memref<16x96xbf16, #tpu.memory_space<vmem>>, vector<16x96xbf16>
    tpu.vector_store %arg4[%c0_5, %c0_6], %6 {strides = array<i32>} : memref<16x96xbf16, #tpu.memory_space<vmem>>, vector<16x96xbf16>,
    return
  }
  func.func @transform_0(%arg0: i32) -> (i32, i32) {
    %c0_i32 = arith.constant 0 : i32
    %c0_i32_0 = arith.constant 0 : i32
    return %arg0, %c0_i32 : i32, i32
  }
  func.func @transform_1(%arg0: i32) -> (i32, i32) {
    %c0_i32 = arith.constant 0 : i32
    %c0_i32_0 = arith.constant 0 : i32
    %c0_i32_1 = arith.constant 0 : i32
    return %c0_i32, %c0_i32_0 : i32, i32
  }
  func.func @transform_2(%arg0: i32) -> (i32, i32) {
    %c0_i32 = arith.constant 0 : i32
    %c0_i32_0 = arith.constant 0 : i32
    %c0_i32_1 = arith.constant 0 : i32
    return %c0_i32, %c0_i32_0 : i32, i32
  }
  func.func @transform_3(%arg0: i32) -> (i32, i32) {
    %c0_i32 = arith.constant 0 : i32
    %c0_i32_0 = arith.constant 0 : i32
    return %arg0, %c0_i32 : i32, i32
  }
}

module attributes {stable_mosaic.version = 11 : i64} {
  func.func @_mha_kernel(%arg0: i32, %arg1: memref<1x8x32xbf16, #tpu.memory_space<vmem>>, %arg2: memref<1x8x32xbf16, #tpu.memory_space<vmem>>, %arg3: memref<1x8x32xbf16, #tpu.memory_space<vmem>>, %arg4: memref<1x8x32xbf16, #tpu.memory_space<vmem>>) attributes {dimension_semantics = [#tpu.dimension_semantics<parallel>], iteration_bounds = array<i64: 2>, scalar_prefetch = 0 : i64, scratch_operands = 0 : i64, tpu.core_type = #tpu.core_type<tc>, window_params = [{transform_indices = @transform_0, window_bounds = array<i64: 1, 8, 32>}, {transform_indices = @transform_1, window_bounds = array<i64: 1, 8, 32>}, {transform_indices = @transform_2, window_bounds = array<i64: 1, 8, 32>}, {transform_indices = @transform_3, window_bounds = array<i64: 1, 8, 32>}]} {
    %c0 = arith.constant 0 : index
    %c0_0 = arith.constant 0 : index
    %c0_1 = arith.constant 0 : index
    %0 = vector.load %arg1[%c0, %c0_0, %c0_1] : memref<1x8x32xbf16, #tpu.memory_space<vmem>>, vector<1x8x32xbf16>
    %1 = vector.shape_cast %0 : vector<1x8x32xbf16> to vector<8x32xbf16>
    %c0_2 = arith.constant 0 : index
    %c0_3 = arith.constant 0 : index
    %c0_4 = arith.constant 0 : index
    %2 = vector.load %arg2[%c0_2, %c0_3, %c0_4] : memref<1x8x32xbf16, #tpu.memory_space<vmem>>, vector<1x8x32xbf16>
    %3 = vector.shape_cast %2 : vector<1x8x32xbf16> to vector<8x32xbf16>
    %c0_5 = arith.constant 0 : index
    %c0_6 = arith.constant 0 : index
    %c0_7 = arith.constant 0 : index
    %4 = vector.load %arg3[%c0_5, %c0_6, %c0_7] : memref<1x8x32xbf16, #tpu.memory_space<vmem>>, vector<1x8x32xbf16>
    %5 = vector.shape_cast %4 : vector<1x8x32xbf16> to vector<8x32xbf16>
    %6 = vector.extract_strided_slice %1 {offsets = [0, 0], sizes = [8, 8], strides = [1, 1]} : vector<8x32xbf16> to vector<8x8xbf16>
    %7 = vector.extract_strided_slice %3 {offsets = [0, 0], sizes = [8, 8], strides = [1, 1]} : vector<8x32xbf16> to vector<8x8xbf16>
    %cst = arith.constant dense<0.000000e+00> : vector<8x8xf32>
    %8 = tpu.matmul %6, %7, %cst {dimension_numbers = #tpu.dot_dimension_numbers<[1], [1], [0], [0], [0, 0, 1, 0], [], []>} : vector<8x8xbf16>, vector<8x8xbf16>, vector<8x8xf32> -> vector<8x8xf32>
    %cst_8 = arith.constant 0.353553385 : f32
    %9 = vector.broadcast %cst_8 : f32 to vector<8x8xf32>
    %10 = arith.mulf %8, %9 : vector<8x8xf32>
    %cst_9 = arith.constant dense<0xFF800000> : vector<8xf32>
    %11 = vector.multi_reduction <maximumf>, %10, %cst_9 [1] : vector<8x8xf32> to vector<8xf32>
    %12 = vector.shape_cast %11 : vector<8xf32> to vector<8x1xf32>
    %13 = vector.broadcast %12 : vector<8x1xf32> to vector<8x8xf32>
    %14 = arith.subf %10, %13 : vector<8x8xf32>
    %15 = math.exp %14 : vector<8x8xf32>
    %cst_10 = arith.constant dense<0.000000e+00> : vector<8xf32>
    %16 = vector.multi_reduction <add>, %15, %cst_10 [1] : vector<8x8xf32> to vector<8xf32>
    %17 = vector.shape_cast %16 : vector<8xf32> to vector<8x1xf32>
    %18 = vector.broadcast %17 : vector<8x1xf32> to vector<8x8xf32>
    %19 = arith.divf %15, %18 : vector<8x8xf32>
    %20 = arith.truncf %19 : vector<8x8xf32> to vector<8x8xbf16>
    %21 = vector.extract_strided_slice %5 {offsets = [0, 0], sizes = [8, 8], strides = [1, 1]} : vector<8x32xbf16> to vector<8x8xbf16>
    %cst_11 = arith.constant dense<0.000000e+00> : vector<8x8xf32>
    %22 = tpu.matmul %20, %21, %cst_11 {dimension_numbers = #tpu.dot_dimension_numbers<[1], [0], [0], [1], [0, 0, 1, 1], [], []>} : vector<8x8xbf16>, vector<8x8xbf16>, vector<8x8xf32> -> vector<8x8xf32>
    %23 = arith.truncf %22 : vector<8x8xf32> to vector<8x8xbf16>
    %c0_12 = arith.constant 0 : index
    %c0_13 = arith.constant 0 : index
    %c0_14 = arith.constant 0 : index
    %24 = vector.load %arg4[%c0_12, %c0_13, %c0_14] : memref<1x8x32xbf16, #tpu.memory_space<vmem>>, vector<1x8x8xbf16>
    %25 = vector.shape_cast %24 : vector<1x8x8xbf16> to vector<8x8xbf16>
    %26 = vector.shape_cast %23 : vector<8x8xbf16> to vector<1x8x8xbf16>
    tpu.vector_store %arg4[%c0_12, %c0_13, %c0_14], %26 {strides = array<i32>} : memref<1x8x32xbf16, #tpu.memory_space<vmem>>, vector<1x8x8xbf16>,
    %27 = vector.extract_strided_slice %1 {offsets = [0, 8], sizes = [8, 8], strides = [1, 1]} : vector<8x32xbf16> to vector<8x8xbf16>
    %28 = vector.extract_strided_slice %3 {offsets = [0, 8], sizes = [8, 8], strides = [1, 1]} : vector<8x32xbf16> to vector<8x8xbf16>
    %cst_15 = arith.constant dense<0.000000e+00> : vector<8x8xf32>
    %29 = tpu.matmul %27, %28, %cst_15 {dimension_numbers = #tpu.dot_dimension_numbers<[1], [1], [0], [0], [0, 0, 1, 0], [], []>} : vector<8x8xbf16>, vector<8x8xbf16>, vector<8x8xf32> -> vector<8x8xf32>
    %cst_16 = arith.constant 0.353553385 : f32
    %30 = vector.broadcast %cst_16 : f32 to vector<8x8xf32>
    %31 = arith.mulf %29, %30 : vector<8x8xf32>
    %cst_17 = arith.constant dense<0xFF800000> : vector<8xf32>
    %32 = vector.multi_reduction <maximumf>, %31, %cst_17 [1] : vector<8x8xf32> to vector<8xf32>
    %33 = vector.shape_cast %32 : vector<8xf32> to vector<8x1xf32>
    %34 = vector.broadcast %33 : vector<8x1xf32> to vector<8x8xf32>
    %35 = arith.subf %31, %34 : vector<8x8xf32>
    %36 = math.exp %35 : vector<8x8xf32>
    %cst_18 = arith.constant dense<0.000000e+00> : vector<8xf32>
    %37 = vector.multi_reduction <add>, %36, %cst_18 [1] : vector<8x8xf32> to vector<8xf32>
    %38 = vector.shape_cast %37 : vector<8xf32> to vector<8x1xf32>
    %39 = vector.broadcast %38 : vector<8x1xf32> to vector<8x8xf32>
    %40 = arith.divf %36, %39 : vector<8x8xf32>
    %41 = arith.truncf %40 : vector<8x8xf32> to vector<8x8xbf16>
    %42 = vector.extract_strided_slice %5 {offsets = [0, 8], sizes = [8, 8], strides = [1, 1]} : vector<8x32xbf16> to vector<8x8xbf16>
    %cst_19 = arith.constant dense<0.000000e+00> : vector<8x8xf32>
    %43 = tpu.matmul %41, %42, %cst_19 {dimension_numbers = #tpu.dot_dimension_numbers<[1], [0], [0], [1], [0, 0, 1, 1], [], []>} : vector<8x8xbf16>, vector<8x8xbf16>, vector<8x8xf32> -> vector<8x8xf32>
    %44 = arith.truncf %43 : vector<8x8xf32> to vector<8x8xbf16>
    %c0_20 = arith.constant 0 : index
    %c0_21 = arith.constant 0 : index
    %c8 = arith.constant 8 : index
    %45 = vector.load %arg4[%c0_20, %c0_21, %c8] : memref<1x8x32xbf16, #tpu.memory_space<vmem>>, vector<1x8x8xbf16>
    %46 = vector.shape_cast %45 : vector<1x8x8xbf16> to vector<8x8xbf16>
    %47 = vector.shape_cast %44 : vector<8x8xbf16> to vector<1x8x8xbf16>
    tpu.vector_store %arg4[%c0_20, %c0_21, %c8], %47 {strides = array<i32>} : memref<1x8x32xbf16, #tpu.memory_space<vmem>>, vector<1x8x8xbf16>,
    %48 = vector.extract_strided_slice %1 {offsets = [0, 16], sizes = [8, 8], strides = [1, 1]} : vector<8x32xbf16> to vector<8x8xbf16>
    %49 = vector.extract_strided_slice %3 {offsets = [0, 16], sizes = [8, 8], strides = [1, 1]} : vector<8x32xbf16> to vector<8x8xbf16>
    %cst_22 = arith.constant dense<0.000000e+00> : vector<8x8xf32>
    %50 = tpu.matmul %48, %49, %cst_22 {dimension_numbers = #tpu.dot_dimension_numbers<[1], [1], [0], [0], [0, 0, 1, 0], [], []>} : vector<8x8xbf16>, vector<8x8xbf16>, vector<8x8xf32> -> vector<8x8xf32>
    %cst_23 = arith.constant 0.353553385 : f32
    %51 = vector.broadcast %cst_23 : f32 to vector<8x8xf32>
    %52 = arith.mulf %50, %51 : vector<8x8xf32>
    %cst_24 = arith.constant dense<0xFF800000> : vector<8xf32>
    %53 = vector.multi_reduction <maximumf>, %52, %cst_24 [1] : vector<8x8xf32> to vector<8xf32>
    %54 = vector.shape_cast %53 : vector<8xf32> to vector<8x1xf32>
    %55 = vector.broadcast %54 : vector<8x1xf32> to vector<8x8xf32>
    %56 = arith.subf %52, %55 : vector<8x8xf32>
    %57 = math.exp %56 : vector<8x8xf32>
    %cst_25 = arith.constant dense<0.000000e+00> : vector<8xf32>
    %58 = vector.multi_reduction <add>, %57, %cst_25 [1] : vector<8x8xf32> to vector<8xf32>
    %59 = vector.shape_cast %58 : vector<8xf32> to vector<8x1xf32>
    %60 = vector.broadcast %59 : vector<8x1xf32> to vector<8x8xf32>
    %61 = arith.divf %57, %60 : vector<8x8xf32>
    %62 = arith.truncf %61 : vector<8x8xf32> to vector<8x8xbf16>
    %63 = vector.extract_strided_slice %5 {offsets = [0, 16], sizes = [8, 8], strides = [1, 1]} : vector<8x32xbf16> to vector<8x8xbf16>
    %cst_26 = arith.constant dense<0.000000e+00> : vector<8x8xf32>
    %64 = tpu.matmul %62, %63, %cst_26 {dimension_numbers = #tpu.dot_dimension_numbers<[1], [0], [0], [1], [0, 0, 1, 1], [], []>} : vector<8x8xbf16>, vector<8x8xbf16>, vector<8x8xf32> -> vector<8x8xf32>
    %65 = arith.truncf %64 : vector<8x8xf32> to vector<8x8xbf16>
    %c0_27 = arith.constant 0 : index
    %c0_28 = arith.constant 0 : index
    %c16 = arith.constant 16 : index
    %66 = vector.load %arg4[%c0_27, %c0_28, %c16] : memref<1x8x32xbf16, #tpu.memory_space<vmem>>, vector<1x8x8xbf16>
    %67 = vector.shape_cast %66 : vector<1x8x8xbf16> to vector<8x8xbf16>
    %68 = vector.shape_cast %65 : vector<8x8xbf16> to vector<1x8x8xbf16>
    tpu.vector_store %arg4[%c0_27, %c0_28, %c16], %68 {strides = array<i32>} : memref<1x8x32xbf16, #tpu.memory_space<vmem>>, vector<1x8x8xbf16>,
    %69 = vector.extract_strided_slice %1 {offsets = [0, 24], sizes = [8, 8], strides = [1, 1]} : vector<8x32xbf16> to vector<8x8xbf16>
    %70 = vector.extract_strided_slice %3 {offsets = [0, 24], sizes = [8, 8], strides = [1, 1]} : vector<8x32xbf16> to vector<8x8xbf16>
    %cst_29 = arith.constant dense<0.000000e+00> : vector<8x8xf32>
    %71 = tpu.matmul %69, %70, %cst_29 {dimension_numbers = #tpu.dot_dimension_numbers<[1], [1], [0], [0], [0, 0, 1, 0], [], []>} : vector<8x8xbf16>, vector<8x8xbf16>, vector<8x8xf32> -> vector<8x8xf32>
    %cst_30 = arith.constant 0.353553385 : f32
    %72 = vector.broadcast %cst_30 : f32 to vector<8x8xf32>
    %73 = arith.mulf %71, %72 : vector<8x8xf32>
    %cst_31 = arith.constant dense<0xFF800000> : vector<8xf32>
    %74 = vector.multi_reduction <maximumf>, %73, %cst_31 [1] : vector<8x8xf32> to vector<8xf32>
    %75 = vector.shape_cast %74 : vector<8xf32> to vector<8x1xf32>
    %76 = vector.broadcast %75 : vector<8x1xf32> to vector<8x8xf32>
    %77 = arith.subf %73, %76 : vector<8x8xf32>
    %78 = math.exp %77 : vector<8x8xf32>
    %cst_32 = arith.constant dense<0.000000e+00> : vector<8xf32>
    %79 = vector.multi_reduction <add>, %78, %cst_32 [1] : vector<8x8xf32> to vector<8xf32>
    %80 = vector.shape_cast %79 : vector<8xf32> to vector<8x1xf32>
    %81 = vector.broadcast %80 : vector<8x1xf32> to vector<8x8xf32>
    %82 = arith.divf %78, %81 : vector<8x8xf32>
    %83 = arith.truncf %82 : vector<8x8xf32> to vector<8x8xbf16>
    %84 = vector.extract_strided_slice %5 {offsets = [0, 24], sizes = [8, 8], strides = [1, 1]} : vector<8x32xbf16> to vector<8x8xbf16>
    %cst_33 = arith.constant dense<0.000000e+00> : vector<8x8xf32>
    %85 = tpu.matmul %83, %84, %cst_33 {dimension_numbers = #tpu.dot_dimension_numbers<[1], [0], [0], [1], [0, 0, 1, 1], [], []>} : vector<8x8xbf16>, vector<8x8xbf16>, vector<8x8xf32> -> vector<8x8xf32>
    %86 = arith.truncf %85 : vector<8x8xf32> to vector<8x8xbf16>
    %c0_34 = arith.constant 0 : index
    %c0_35 = arith.constant 0 : index
    %c24 = arith.constant 24 : index
    %87 = vector.load %arg4[%c0_34, %c0_35, %c24] : memref<1x8x32xbf16, #tpu.memory_space<vmem>>, vector<1x8x8xbf16>
    %88 = vector.shape_cast %87 : vector<1x8x8xbf16> to vector<8x8xbf16>
    %89 = vector.shape_cast %86 : vector<8x8xbf16> to vector<1x8x8xbf16>
    tpu.vector_store %arg4[%c0_34, %c0_35, %c24], %89 {strides = array<i32>} : memref<1x8x32xbf16, #tpu.memory_space<vmem>>, vector<1x8x8xbf16>,
    return
  }
  func.func @transform_0(%arg0: i32) -> (i32, i32, i32) {
    %c0_i32 = arith.constant 0 : i32
    %c0_i32_0 = arith.constant 0 : i32
    %c0_i32_1 = arith.constant 0 : i32
    return %arg0, %c0_i32, %c0_i32_0 : i32, i32, i32
  }
  func.func @transform_1(%arg0: i32) -> (i32, i32, i32) {
    %c0_i32 = arith.constant 0 : i32
    %c0_i32_0 = arith.constant 0 : i32
    %c0_i32_1 = arith.constant 0 : i32
    return %arg0, %c0_i32, %c0_i32_0 : i32, i32, i32
  }
  func.func @transform_2(%arg0: i32) -> (i32, i32, i32) {
    %c0_i32 = arith.constant 0 : i32
    %c0_i32_0 = arith.constant 0 : i32
    %c0_i32_1 = arith.constant 0 : i32
    return %arg0, %c0_i32, %c0_i32_0 : i32, i32, i32
  }
  func.func @transform_3(%arg0: i32) -> (i32, i32, i32) {
    %c0_i32 = arith.constant 0 : i32
    %c0_i32_0 = arith.constant 0 : i32
    %c0_i32_1 = arith.constant 0 : i32
    return %arg0, %c0_i32, %c0_i32_0 : i32, i32, i32
  }
}

module attributes {stable_mosaic.version = 11 : i64} {
  func.func @_linear_add_ln_kernel(%arg0: i32, %arg1: memref<16x32xbf16, #tpu.memory_space<vmem>>, %arg2: memref<32x32xbf16, #tpu.memory_space<vmem>>, %arg3: memref<1x32xf32, #tpu.memory_space<vmem>>, %arg4: memref<16x32xf32, #tpu.memory_space<vmem>>, %arg5: memref<1x32xf32, #tpu.memory_space<vmem>>, %arg6: memref<1x32xf32, #tpu.memory_space<vmem>>, %arg7: memref<16x32xf32, #tpu.memory_space<vmem>>) attributes {dimension_semantics = [#tpu.dimension_semantics<parallel>], iteration_bounds = array<i64: 1>, scalar_prefetch = 0 : i64, scratch_operands = 0 : i64, tpu.core_type = #tpu.core_type<tc>, window_params = [{transform_indices = @transform_0, window_bounds = array<i64: 16, 32>}, {pipeline_mode = #tpu.pipeline_mode<synchronous>, transform_indices = @transform_1, window_bounds = array<i64: 32, 32>}, {pipeline_mode = #tpu.pipeline_mode<synchronous>, transform_indices = @transform_2, window_bounds = array<i64: 1, 32>}, {transform_indices = @transform_3, window_bounds = array<i64: 16, 32>}, {pipeline_mode = #tpu.pipeline_mode<synchronous>, transform_indices = @transform_4, window_bounds = array<i64: 1, 32>}, {pipeline_mode = #tpu.pipeline_mode<synchronous>, transform_indices = @transform_5, window_bounds = array<i64: 1, 32>}, {transform_indices = @transform_6, window_bounds = array<i64: 16, 32>}]} {
    %c0 = arith.constant 0 : index
    %c0_0 = arith.constant 0 : index
    %0 = vector.load %arg1[%c0, %c0_0] : memref<16x32xbf16, #tpu.memory_space<vmem>>, vector<16x32xbf16>
    %c0_1 = arith.constant 0 : index
    %c0_2 = arith.constant 0 : index
    %1 = vector.load %arg2[%c0_1, %c0_2] : memref<32x32xbf16, #tpu.memory_space<vmem>>, vector<32x32xbf16>
    %cst = arith.constant dense<0.000000e+00> : vector<16x32xf32>
    %2 = tpu.matmul %0, %1, %cst {dimension_numbers = #tpu.dot_dimension_numbers<[1], [0], [0], [1], [0, 0, 1, 1], [], []>} : vector<16x32xbf16>, vector<32x32xbf16>, vector<16x32xf32> -> vector<16x32xf32>
    %c0_3 = arith.constant 0 : index
    %c0_4 = arith.constant 0 : index
    %3 = vector.load %arg3[%c0_3, %c0_4] : memref<1x32xf32, #tpu.memory_space<vmem>>, vector<1x32xf32>
    %4 = vector.broadcast %3 : vector<1x32xf32> to vector<16x32xf32>
    %5 = arith.addf %2, %4 : vector<16x32xf32>
    %c0_5 = arith.constant 0 : index
    %c0_6 = arith.constant 0 : index
    %6 = vector.load %arg4[%c0_5, %c0_6] : memref<16x32xf32, #tpu.memory_space<vmem>>, vector<16x32xf32>
    %7 = arith.addf %6, %5 : vector<16x32xf32>
    %cst_7 = arith.constant dense<0.000000e+00> : vector<16xf32>
    %8 = vector.multi_reduction <add>, %7, %cst_7 [1] : vector<16x32xf32> to vector<16xf32>
    %9 = vector.shape_cast %8 : vector<16xf32> to vector<16x1xf32>
    %cst_8 = arith.constant 3.200000e+01 : f32
    %10 = vector.broadcast %cst_8 : f32 to vector<16x1xf32>
    %11 = arith.divf %9, %10 : vector<16x1xf32>
    %12 = vector.broadcast %11 : vector<16x1xf32> to vector<16x32xf32>
    %13 = arith.subf %7, %12 : vector<16x32xf32>
    %14 = arith.mulf %13, %13 : vector<16x32xf32>
    %cst_9 = arith.constant dense<0.000000e+00> : vector<16xf32>
    %15 = vector.multi_reduction <add>, %14, %cst_9 [1] : vector<16x32xf32> to vector<16xf32>
    %16 = vector.shape_cast %15 : vector<16xf32> to vector<16x1xf32>
    %cst_10 = arith.constant 3.200000e+01 : f32
    %17 = vector.broadcast %cst_10 : f32 to vector<16x1xf32>
    %18 = arith.divf %16, %17 : vector<16x1xf32>
    %19 = vector.broadcast %11 : vector<16x1xf32> to vector<16x32xf32>
    %20 = arith.subf %7, %19 : vector<16x32xf32>
    %cst_11 = arith.constant 9.99999974E-6 : f32
    %21 = vector.broadcast %cst_11 : f32 to vector<16x1xf32>
    %22 = arith.addf %18, %21 : vector<16x1xf32>
    %23 = math.rsqrt %22 : vector<16x1xf32>
    %24 = vector.broadcast %23 : vector<16x1xf32> to vector<16x32xf32>
    %25 = arith.mulf %20, %24 : vector<16x32xf32>
    %c0_12 = arith.constant 0 : index
    %c0_13 = arith.constant 0 : index
    %26 = vector.load %arg5[%c0_12, %c0_13] : memref<1x32xf32, #tpu.memory_space<vmem>>, vector<1x32xf32>
    %27 = vector.broadcast %26 : vector<1x32xf32> to vector<16x32xf32>
    %28 = arith.mulf %25, %27 : vector<16x32xf32>
    %c0_14 = arith.constant 0 : index
    %c0_15 = arith.constant 0 : index
    %29 = vector.load %arg6[%c0_14, %c0_15] : memref<1x32xf32, #tpu.memory_space<vmem>>, vector<1x32xf32>
    %30 = vector.broadcast %29 : vector<1x32xf32> to vector<16x32xf32>
    %31 = arith.addf %28, %30 : vector<16x32xf32>
    %c0_16 = arith.constant 0 : index
    %c0_17 = arith.constant 0 : index
    %32 = vector.load %arg7[%c0_16, %c0_17] : memref<16x32xf32, #tpu.memory_space<vmem>>, vector<16x32xf32>
    tpu.vector_store %arg7[%c0_16, %c0_17], %31 {strides = array<i32>} : memref<16x32xf32, #tpu.memory_space<vmem>>, vector<16x32xf32>,
    return
  }
  func.func @transform_0(%arg0: i32) -> (i32, i32) {
    %c0_i32 = arith.constant 0 : i32
    %c0_i32_0 = arith.constant 0 : i32
    return %arg0, %c0_i32 : i32, i32
  }
  func.func @transform_1(%arg0: i32) -> (i32, i32) {
    %c0_i32 = arith.constant 0 : i32
    %c0_i32_0 = arith.constant 0 : i32
    %c0_i32_1 = arith.constant 0 : i32
    return %c0_i32, %c0_i32_0 : i32, i32
  }
  func.func @transform_2(%arg0: i32) -> (i32, i32) {
    %c0_i32 = arith.constant 0 : i32
    %c0_i32_0 = arith.constant 0 : i32
    %c0_i32_1 = arith.constant 0 : i32
    return %c0_i32, %c0_i32_0 : i32, i32
  }
  func.func @transform_3(%arg0: i32) -> (i32, i32) {
    %c0_i32 = arith.constant 0 : i32
    %c0_i32_0 = arith.constant 0 : i32
    return %arg0, %c0_i32 : i32, i32
  }
  func.func @transform_4(%arg0: i32) -> (i32, i32) {
    %c0_i32 = arith.constant 0 : i32
    %c0_i32_0 = arith.constant 0 : i32
    %c0_i32_1 = arith.constant 0 : i32
    return %c0_i32, %c0_i32_0 : i32, i32
  }
  func.func @transform_5(%arg0: i32) -> (i32, i32) {
    %c0_i32 = arith.constant 0 : i32
    %c0_i32_0 = arith.constant 0 : i32
    %c0_i32_1 = arith.constant 0 : i32
    return %c0_i32, %c0_i32_0 : i32, i32
  }
  func.func @transform_6(%arg0: i32) -> (i32, i32) {
    %c0_i32 = arith.constant 0 : i32
    %c0_i32_0 = arith.constant 0 : i32
    return %arg0, %c0_i32 : i32, i32
  }
}

module attributes {stable_mosaic.version = 11 : i64} {
  func.func @_ffn_add_ln_kernel(%arg0: i32, %arg1: memref<16x32xf32, #tpu.memory_space<vmem>>, %arg2: memref<32x32xbf16, #tpu.memory_space<vmem>>, %arg3: memref<1x32xf32, #tpu.memory_space<vmem>>, %arg4: memref<32x32xbf16, #tpu.memory_space<vmem>>, %arg5: memref<1x32xf32, #tpu.memory_space<vmem>>, %arg6: memref<1x32xf32, #tpu.memory_space<vmem>>, %arg7: memref<1x32xf32, #tpu.memory_space<vmem>>, %arg8: memref<16x32xf32, #tpu.memory_space<vmem>>) attributes {dimension_semantics = [#tpu.dimension_semantics<parallel>], iteration_bounds = array<i64: 1>, scalar_prefetch = 0 : i64, scratch_operands = 0 : i64, tpu.core_type = #tpu.core_type<tc>, window_params = [{transform_indices = @transform_0, window_bounds = array<i64: 16, 32>}, {pipeline_mode = #tpu.pipeline_mode<synchronous>, transform_indices = @transform_1, window_bounds = array<i64: 32, 32>}, {pipeline_mode = #tpu.pipeline_mode<synchronous>, transform_indices = @transform_2, window_bounds = array<i64: 1, 32>}, {pipeline_mode = #tpu.pipeline_mode<synchronous>, transform_indices = @transform_3, window_bounds = array<i64: 32, 32>}, {pipeline_mode = #tpu.pipeline_mode<synchronous>, transform_indices = @transform_4, window_bounds = array<i64: 1, 32>}, {pipeline_mode = #tpu.pipeline_mode<synchronous>, transform_indices = @transform_5, window_bounds = array<i64: 1, 32>}, {pipeline_mode = #tpu.pipeline_mode<synchronous>, transform_indices = @transform_6, window_bounds = array<i64: 1, 32>}, {transform_indices = @transform_7, window_bounds = array<i64: 16, 32>}]} {
    %c0 = arith.constant 0 : index
    %c0_0 = arith.constant 0 : index
    %0 = vector.load %arg1[%c0, %c0_0] : memref<16x32xf32, #tpu.memory_space<vmem>>, vector<16x32xf32>
    %1 = arith.truncf %0 : vector<16x32xf32> to vector<16x32xbf16>
    %c0_1 = arith.constant 0 : index
    %c0_2 = arith.constant 0 : index
    %2 = vector.load %arg2[%c0_1, %c0_2] : memref<32x32xbf16, #tpu.memory_space<vmem>>, vector<32x32xbf16>
    %cst = arith.constant dense<0.000000e+00> : vector<16x32xf32>
    %3 = tpu.matmul %1, %2, %cst {dimension_numbers = #tpu.dot_dimension_numbers<[1], [0], [0], [1], [0, 0, 1, 1], [], []>} : vector<16x32xbf16>, vector<32x32xbf16>, vector<16x32xf32> -> vector<16x32xf32>
    %c0_3 = arith.constant 0 : index
    %c0_4 = arith.constant 0 : index
    %4 = vector.load %arg3[%c0_3, %c0_4] : memref<1x32xf32, #tpu.memory_space<vmem>>, vector<1x32xf32>
    %5 = vector.broadcast %4 : vector<1x32xf32> to vector<16x32xf32>
    %6 = arith.addf %3, %5 : vector<16x32xf32>
    %cst_5 = arith.constant 5.000000e-01 : f32
    %7 = vector.broadcast %cst_5 : f32 to vector<16x32xf32>
    %8 = arith.mulf %7, %6 : vector<16x32xf32>
    %cst_6 = arith.constant 0.707106769 : f32
    %9 = vector.broadcast %cst_6 : f32 to vector<16x32xf32>
    %10 = arith.mulf %6, %9 : vector<16x32xf32>
    %11 = math.erf %10 : vector<16x32xf32>
    %cst_7 = arith.constant 1.000000e+00 : f32
    %12 = vector.broadcast %cst_7 : f32 to vector<16x32xf32>
    %13 = arith.addf %12, %11 : vector<16x32xf32>
    %14 = arith.mulf %8, %13 : vector<16x32xf32>
    %15 = arith.truncf %14 : vector<16x32xf32> to vector<16x32xbf16>
    %c0_8 = arith.constant 0 : index
    %c0_9 = arith.constant 0 : index
    %16 = vector.load %arg4[%c0_8, %c0_9] : memref<32x32xbf16, #tpu.memory_space<vmem>>, vector<32x32xbf16>
    %cst_10 = arith.constant dense<0.000000e+00> : vector<16x32xf32>
    %17 = tpu.matmul %15, %16, %cst_10 {dimension_numbers = #tpu.dot_dimension_numbers<[1], [0], [0], [1], [0, 0, 1, 1], [], []>} : vector<16x32xbf16>, vector<32x32xbf16>, vector<16x32xf32> -> vector<16x32xf32>
    %c0_11 = arith.constant 0 : index
    %c0_12 = arith.constant 0 : index
    %18 = vector.load %arg5[%c0_11, %c0_12] : memref<1x32xf32, #tpu.memory_space<vmem>>, vector<1x32xf32>
    %19 = vector.broadcast %18 : vector<1x32xf32> to vector<16x32xf32>
    %20 = arith.addf %17, %19 : vector<16x32xf32>
    %21 = arith.addf %0, %20 : vector<16x32xf32>
    %cst_13 = arith.constant dense<0.000000e+00> : vector<16xf32>
    %22 = vector.multi_reduction <add>, %21, %cst_13 [1] : vector<16x32xf32> to vector<16xf32>
    %23 = vector.shape_cast %22 : vector<16xf32> to vector<16x1xf32>
    %cst_14 = arith.constant 3.200000e+01 : f32
    %24 = vector.broadcast %cst_14 : f32 to vector<16x1xf32>
    %25 = arith.divf %23, %24 : vector<16x1xf32>
    %26 = vector.broadcast %25 : vector<16x1xf32> to vector<16x32xf32>
    %27 = arith.subf %21, %26 : vector<16x32xf32>
    %28 = arith.mulf %27, %27 : vector<16x32xf32>
    %cst_15 = arith.constant dense<0.000000e+00> : vector<16xf32>
    %29 = vector.multi_reduction <add>, %28, %cst_15 [1] : vector<16x32xf32> to vector<16xf32>
    %30 = vector.shape_cast %29 : vector<16xf32> to vector<16x1xf32>
    %cst_16 = arith.constant 3.200000e+01 : f32
    %31 = vector.broadcast %cst_16 : f32 to vector<16x1xf32>
    %32 = arith.divf %30, %31 : vector<16x1xf32>
    %33 = vector.broadcast %25 : vector<16x1xf32> to vector<16x32xf32>
    %34 = arith.subf %21, %33 : vector<16x32xf32>
    %cst_17 = arith.constant 9.99999974E-6 : f32
    %35 = vector.broadcast %cst_17 : f32 to vector<16x1xf32>
    %36 = arith.addf %32, %35 : vector<16x1xf32>
    %37 = math.rsqrt %36 : vector<16x1xf32>
    %38 = vector.broadcast %37 : vector<16x1xf32> to vector<16x32xf32>
    %39 = arith.mulf %34, %38 : vector<16x32xf32>
    %c0_18 = arith.constant 0 : index
    %c0_19 = arith.constant 0 : index
    %40 = vector.load %arg6[%c0_18, %c0_19] : memref<1x32xf32, #tpu.memory_space<vmem>>, vector<1x32xf32>
    %41 = vector.broadcast %40 : vector<1x32xf32> to vector<16x32xf32>
    %42 = arith.mulf %39, %41 : vector<16x32xf32>
    %c0_20 = arith.constant 0 : index
    %c0_21 = arith.constant 0 : index
    %43 = vector.load %arg7[%c0_20, %c0_21] : memref<1x32xf32, #tpu.memory_space<vmem>>, vector<1x32xf32>
    %44 = vector.broadcast %43 : vector<1x32xf32> to vector<16x32xf32>
    %45 = arith.addf %42, %44 : vector<16x32xf32>
    %c0_22 = arith.constant 0 : index
    %c0_23 = arith.constant 0 : index
    %46 = vector.load %arg8[%c0_22, %c0_23] : memref<16x32xf32, #tpu.memory_space<vmem>>, vector<16x32xf32>
    tpu.vector_store %arg8[%c0_22, %c0_23], %45 {strides = array<i32>} : memref<16x32xf32, #tpu.memory_space<vmem>>, vector<16x32xf32>,
    return
  }
  func.func @transform_0(%arg0: i32) -> (i32, i32) {
    %c0_i32 = arith.constant 0 : i32
    %c0_i32_0 = arith.constant 0 : i32
    return %arg0, %c0_i32 : i32, i32
  }
  func.func @transform_1(%arg0: i32) -> (i32, i32) {
    %c0_i32 = arith.constant 0 : i32
    %c0_i32_0 = arith.constant 0 : i32
    %c0_i32_1 = arith.constant 0 : i32
    return %c0_i32, %c0_i32_0 : i32, i32
  }
  func.func @transform_2(%arg0: i32) -> (i32, i32) {
    %c0_i32 = arith.constant 0 : i32
    %c0_i32_0 = arith.constant 0 : i32
    %c0_i32_1 = arith.constant 0 : i32
    return %c0_i32, %c0_i32_0 : i32, i32
  }
  func.func @transform_3(%arg0: i32) -> (i32, i32) {
    %c0_i32 = arith.constant 0 : i32
    %c0_i32_0 = arith.constant 0 : i32
    %c0_i32_1 = arith.constant 0 : i32
    return %c0_i32, %c0_i32_0 : i32, i32
  }
  func.func @transform_4(%arg0: i32) -> (i32, i32) {
    %c0_i32 = arith.constant 0 : i32
    %c0_i32_0 = arith.constant 0 : i32
    %c0_i32_1 = arith.constant 0 : i32
    return %c0_i32, %c0_i32_0 : i32, i32
  }
  func.func @transform_5(%arg0: i32) -> (i32, i32) {
    %c0_i32 = arith.constant 0 : i32
    %c0_i32_0 = arith.constant 0 : i32
    %c0_i32_1 = arith.constant 0 : i32
    return %c0_i32, %c0_i32_0 : i32, i32
  }
  func.func @transform_6(%arg0: i32) -> (i32, i32) {
    %c0_i32 = arith.constant 0 : i32
    %c0_i32_0 = arith.constant 0 : i32
    %c0_i32_1 = arith.constant 0 : i32
    return %c0_i32, %c0_i32_0 : i32, i32
  }
  func.func @transform_7(%arg0: i32) -> (i32, i32) {
    %c0_i32 = arith.constant 0 : i32
    %c0_i32_0 = arith.constant 0 : i32
    return %arg0, %c0_i32 : i32, i32
  }
}

module attributes {stable_mosaic.version = 11 : i64} {
  func.func @_ln_kernel(%arg0: i32, %arg1: memref<16x32xf32, #tpu.memory_space<vmem>>, %arg2: memref<1x32xf32, #tpu.memory_space<vmem>>, %arg3: memref<1x32xf32, #tpu.memory_space<vmem>>, %arg4: memref<16x32xf32, #tpu.memory_space<vmem>>) attributes {dimension_semantics = [#tpu.dimension_semantics<parallel>], iteration_bounds = array<i64: 1>, scalar_prefetch = 0 : i64, scratch_operands = 0 : i64, tpu.core_type = #tpu.core_type<tc>, window_params = [{transform_indices = @transform_0, window_bounds = array<i64: 16, 32>}, {pipeline_mode = #tpu.pipeline_mode<synchronous>, transform_indices = @transform_1, window_bounds = array<i64: 1, 32>}, {pipeline_mode = #tpu.pipeline_mode<synchronous>, transform_indices = @transform_2, window_bounds = array<i64: 1, 32>}, {transform_indices = @transform_3, window_bounds = array<i64: 16, 32>}]} {
    %c0 = arith.constant 0 : index
    %c0_0 = arith.constant 0 : index
    %0 = vector.load %arg1[%c0, %c0_0] : memref<16x32xf32, #tpu.memory_space<vmem>>, vector<16x32xf32>
    %cst = arith.constant dense<0.000000e+00> : vector<16xf32>
    %1 = vector.multi_reduction <add>, %0, %cst [1] : vector<16x32xf32> to vector<16xf32>
    %2 = vector.shape_cast %1 : vector<16xf32> to vector<16x1xf32>
    %cst_1 = arith.constant 3.200000e+01 : f32
    %3 = vector.broadcast %cst_1 : f32 to vector<16x1xf32>
    %4 = arith.divf %2, %3 : vector<16x1xf32>
    %5 = vector.broadcast %4 : vector<16x1xf32> to vector<16x32xf32>
    %6 = arith.subf %0, %5 : vector<16x32xf32>
    %7 = arith.mulf %6, %6 : vector<16x32xf32>
    %cst_2 = arith.constant dense<0.000000e+00> : vector<16xf32>
    %8 = vector.multi_reduction <add>, %7, %cst_2 [1] : vector<16x32xf32> to vector<16xf32>
    %9 = vector.shape_cast %8 : vector<16xf32> to vector<16x1xf32>
    %cst_3 = arith.constant 3.200000e+01 : f32
    %10 = vector.broadcast %cst_3 : f32 to vector<16x1xf32>
    %11 = arith.divf %9, %10 : vector<16x1xf32>
    %12 = vector.broadcast %4 : vector<16x1xf32> to vector<16x32xf32>
    %13 = arith.subf %0, %12 : vector<16x32xf32>
    %cst_4 = arith.constant 9.99999974E-6 : f32
    %14 = vector.broadcast %cst_4 : f32 to vector<16x1xf32>
    %15 = arith.addf %11, %14 : vector<16x1xf32>
    %16 = math.rsqrt %15 : vector<16x1xf32>
    %17 = vector.broadcast %16 : vector<16x1xf32> to vector<16x32xf32>
    %18 = arith.mulf %13, %17 : vector<16x32xf32>
    %c0_5 = arith.constant 0 : index
    %c0_6 = arith.constant 0 : index
    %19 = vector.load %arg2[%c0_5, %c0_6] : memref<1x32xf32, #tpu.memory_space<vmem>>, vector<1x32xf32>
    %20 = vector.broadcast %19 : vector<1x32xf32> to vector<16x32xf32>
    %21 = arith.mulf %18, %20 : vector<16x32xf32>
    %c0_7 = arith.constant 0 : index
    %c0_8 = arith.constant 0 : index
    %22 = vector.load %arg3[%c0_7, %c0_8] : memref<1x32xf32, #tpu.memory_space<vmem>>, vector<1x32xf32>
    %23 = vector.broadcast %22 : vector<1x32xf32> to vector<16x32xf32>
    %24 = arith.addf %21, %23 : vector<16x32xf32>
    %c0_9 = arith.constant 0 : index
    %c0_10 = arith.constant 0 : index
    %25 = vector.load %arg4[%c0_9, %c0_10] : memref<16x32xf32, #tpu.memory_space<vmem>>, vector<16x32xf32>
    tpu.vector_store %arg4[%c0_9, %c0_10], %24 {strides = array<i32>} : memref<16x32xf32, #tpu.memory_space<vmem>>, vector<16x32xf32>,
    return
  }
  func.func @transform_0(%arg0: i32) -> (i32, i32) {
    %c0_i32 = arith.constant 0 : i32
    %c0_i32_0 = arith.constant 0 : i32
    return %arg0, %c0_i32 : i32, i32
  }
  func.func @transform_1(%arg0: i32) -> (i32, i32) {
    %c0_i32 = arith.constant 0 : i32
    %c0_i32_0 = arith.constant 0 : i32
    %c0_i32_1 = arith.constant 0 : i32
    return %c0_i32, %c0_i32_0 : i32, i32
  }
  func.func @transform_2(%arg0: i32) -> (i32, i32) {
    %c0_i32 = arith.constant 0 : i32
    %c0_i32_0 = arith.constant 0 : i32
    %c0_i32_1 = arith.constant 0 : i32
    return %c0_i32, %c0_i32_0 : i32, i32
  }
  func.func @transform_3(%arg0: i32) -> (i32, i32) {
    %c0_i32 = arith.constant 0 : i32
    %c0_i32_0 = arith.constant 0 : i32
    return %arg0, %c0_i32 : i32, i32
  }
}

module attributes {stable_mosaic.version = 11 : i64} {
  func.func @_linear_kernel(%arg0: i32, %arg1: memref<16x32xbf16, #tpu.memory_space<vmem>>, %arg2: memref<32x64xbf16, #tpu.memory_space<vmem>>, %arg3: memref<1x64xf32, #tpu.memory_space<vmem>>, %arg4: memref<16x64xbf16, #tpu.memory_space<vmem>>) attributes {dimension_semantics = [#tpu.dimension_semantics<parallel>], iteration_bounds = array<i64: 1>, scalar_prefetch = 0 : i64, scratch_operands = 0 : i64, tpu.core_type = #tpu.core_type<tc>, window_params = [{transform_indices = @transform_0, window_bounds = array<i64: 16, 32>}, {pipeline_mode = #tpu.pipeline_mode<synchronous>, transform_indices = @transform_1, window_bounds = array<i64: 32, 64>}, {pipeline_mode = #tpu.pipeline_mode<synchronous>, transform_indices = @transform_2, window_bounds = array<i64: 1, 64>}, {transform_indices = @transform_3, window_bounds = array<i64: 16, 64>}]} {
    %c0 = arith.constant 0 : index
    %c0_0 = arith.constant 0 : index
    %0 = vector.load %arg1[%c0, %c0_0] : memref<16x32xbf16, #tpu.memory_space<vmem>>, vector<16x32xbf16>
    %c0_1 = arith.constant 0 : index
    %c0_2 = arith.constant 0 : index
    %1 = vector.load %arg2[%c0_1, %c0_2] : memref<32x64xbf16, #tpu.memory_space<vmem>>, vector<32x64xbf16>
    %cst = arith.constant dense<0.000000e+00> : vector<16x64xf32>
    %2 = tpu.matmul %0, %1, %cst {dimension_numbers = #tpu.dot_dimension_numbers<[1], [0], [0], [1], [0, 0, 1, 1], [], []>} : vector<16x32xbf16>, vector<32x64xbf16>, vector<16x64xf32> -> vector<16x64xf32>
    %c0_3 = arith.constant 0 : index
    %c0_4 = arith.constant 0 : index
    %3 = vector.load %arg3[%c0_3, %c0_4] : memref<1x64xf32, #tpu.memory_space<vmem>>, vector<1x64xf32>
    %4 = vector.broadcast %3 : vector<1x64xf32> to vector<16x64xf32>
    %5 = arith.addf %2, %4 : vector<16x64xf32>
    %6 = arith.truncf %5 : vector<16x64xf32> to vector<16x64xbf16>
    %c0_5 = arith.constant 0 : index
    %c0_6 = arith.constant 0 : index
    %7 = vector.load %arg4[%c0_5, %c0_6] : memref<16x64xbf16, #tpu.memory_space<vmem>>, vector<16x64xbf16>
    tpu.vector_store %arg4[%c0_5, %c0_6], %6 {strides = array<i32>} : memref<16x64xbf16, #tpu.memory_space<vmem>>, vector<16x64xbf16>,
    return
  }
  func.func @transform_0(%arg0: i32) -> (i32, i32) {
    %c0_i32 = arith.constant 0 : i32
    %c0_i32_0 = arith.constant 0 : i32
    return %arg0, %c0_i32 : i32, i32
  }
  func.func @transform_1(%arg0: i32) -> (i32, i32) {
    %c0_i32 = arith.constant 0 : i32
    %c0_i32_0 = arith.constant 0 : i32
    %c0_i32_1 = arith.constant 0 : i32
    return %c0_i32, %c0_i32_0 : i32, i32
  }
  func.func @transform_2(%arg0: i32) -> (i32, i32) {
    %c0_i32 = arith.constant 0 : i32
    %c0_i32_0 = arith.constant 0 : i32
    %c0_i32_1 = arith.constant 0 : i32
    return %c0_i32, %c0_i32_0 : i32, i32
  }
  func.func @transform_3(%arg0: i32) -> (i32, i32) {
    %c0_i32 = arith.constant 0 : i32
    %c0_i32_0 = arith.constant 0 : i32
    return %arg0, %c0_i32 : i32, i32
  }
}

module attributes {stable_mosaic.version = 11 : i64} {
  func.func @_linear_kernel(%arg0: i32, %arg1: memref<32x32xbf16, #tpu.memory_space<vmem>>, %arg2: memref<32x32xbf16, #tpu.memory_space<vmem>>, %arg3: memref<1x32xf32, #tpu.memory_space<vmem>>, %arg4: memref<32x32xbf16, #tpu.memory_space<vmem>>) attributes {dimension_semantics = [#tpu.dimension_semantics<parallel>], iteration_bounds = array<i64: 1>, scalar_prefetch = 0 : i64, scratch_operands = 0 : i64, tpu.core_type = #tpu.core_type<tc>, window_params = [{transform_indices = @transform_0, window_bounds = array<i64: 32, 32>}, {pipeline_mode = #tpu.pipeline_mode<synchronous>, transform_indices = @transform_1, window_bounds = array<i64: 32, 32>}, {pipeline_mode = #tpu.pipeline_mode<synchronous>, transform_indices = @transform_2, window_bounds = array<i64: 1, 32>}, {transform_indices = @transform_3, window_bounds = array<i64: 32, 32>}]} {
    %c0 = arith.constant 0 : index
    %c0_0 = arith.constant 0 : index
    %0 = vector.load %arg1[%c0, %c0_0] : memref<32x32xbf16, #tpu.memory_space<vmem>>, vector<32x32xbf16>
    %c0_1 = arith.constant 0 : index
    %c0_2 = arith.constant 0 : index
    %1 = vector.load %arg2[%c0_1, %c0_2] : memref<32x32xbf16, #tpu.memory_space<vmem>>, vector<32x32xbf16>
    %cst = arith.constant dense<0.000000e+00> : vector<32x32xf32>
    %2 = tpu.matmul %0, %1, %cst {dimension_numbers = #tpu.dot_dimension_numbers<[1], [0], [0], [1], [0, 0, 1, 1], [], []>} : vector<32x32xbf16>, vector<32x32xbf16>, vector<32x32xf32> -> vector<32x32xf32>
    %c0_3 = arith.constant 0 : index
    %c0_4 = arith.constant 0 : index
    %3 = vector.load %arg3[%c0_3, %c0_4] : memref<1x32xf32, #tpu.memory_space<vmem>>, vector<1x32xf32>
    %4 = vector.broadcast %3 : vector<1x32xf32> to vector<32x32xf32>
    %5 = arith.addf %2, %4 : vector<32x32xf32>
    %6 = arith.truncf %5 : vector<32x32xf32> to vector<32x32xbf16>
    %c0_5 = arith.constant 0 : index
    %c0_6 = arith.constant 0 : index
    %7 = vector.load %arg4[%c0_5, %c0_6] : memref<32x32xbf16, #tpu.memory_space<vmem>>, vector<32x32xbf16>
    tpu.vector_store %arg4[%c0_5, %c0_6], %6 {strides = array<i32>} : memref<32x32xbf16, #tpu.memory_space<vmem>>, vector<32x32xbf16>,
    return
  }
  func.func @transform_0(%arg0: i32) -> (i32, i32) {
    %c0_i32 = arith.constant 0 : i32
    %c0_i32_0 = arith.constant 0 : i32
    return %arg0, %c0_i32 : i32, i32
  }
  func.func @transform_1(%arg0: i32) -> (i32, i32) {
    %c0_i32 = arith.constant 0 : i32
    %c0_i32_0 = arith.constant 0 : i32
    %c0_i32_1 = arith.constant 0 : i32
    return %c0_i32, %c0_i32_0 : i32, i32
  }
  func.func @transform_2(%arg0: i32) -> (i32, i32) {
    %c0_i32 = arith.constant 0 : i32
    %c0_i32_0 = arith.constant 0 : i32
    %c0_i32_1 = arith.constant 0 : i32
    return %c0_i32, %c0_i32_0 : i32, i32
  }
  func.func @transform_3(%arg0: i32) -> (i32, i32) {
    %c0_i32 = arith.constant 0 : i32
    %c0_i32_0 = arith.constant 0 : i32
    return %arg0, %c0_i32 : i32, i32
  }
}

module attributes {stable_mosaic.version = 11 : i64} {
  func.func @_mha_kernel(%arg0: i32, %arg1: memref<1x16x32xbf16, #tpu.memory_space<vmem>>, %arg2: memref<1x16x32xbf16, #tpu.memory_space<vmem>>, %arg3: memref<1x16x32xbf16, #tpu.memory_space<vmem>>, %arg4: memref<1x16x32xbf16, #tpu.memory_space<vmem>>) attributes {dimension_semantics = [#tpu.dimension_semantics<parallel>], iteration_bounds = array<i64: 2>, scalar_prefetch = 0 : i64, scratch_operands = 0 : i64, tpu.core_type = #tpu.core_type<tc>, window_params = [{transform_indices = @transform_0, window_bounds = array<i64: 1, 16, 32>}, {transform_indices = @transform_1, window_bounds = array<i64: 1, 16, 32>}, {transform_indices = @transform_2, window_bounds = array<i64: 1, 16, 32>}, {transform_indices = @transform_3, window_bounds = array<i64: 1, 16, 32>}]} {
    %c0 = arith.constant 0 : index
    %c0_0 = arith.constant 0 : index
    %c0_1 = arith.constant 0 : index
    %0 = vector.load %arg1[%c0, %c0_0, %c0_1] : memref<1x16x32xbf16, #tpu.memory_space<vmem>>, vector<1x16x32xbf16>
    %1 = vector.shape_cast %0 : vector<1x16x32xbf16> to vector<16x32xbf16>
    %c0_2 = arith.constant 0 : index
    %c0_3 = arith.constant 0 : index
    %c0_4 = arith.constant 0 : index
    %2 = vector.load %arg2[%c0_2, %c0_3, %c0_4] : memref<1x16x32xbf16, #tpu.memory_space<vmem>>, vector<1x16x32xbf16>
    %3 = vector.shape_cast %2 : vector<1x16x32xbf16> to vector<16x32xbf16>
    %c0_5 = arith.constant 0 : index
    %c0_6 = arith.constant 0 : index
    %c0_7 = arith.constant 0 : index
    %4 = vector.load %arg3[%c0_5, %c0_6, %c0_7] : memref<1x16x32xbf16, #tpu.memory_space<vmem>>, vector<1x16x32xbf16>
    %5 = vector.shape_cast %4 : vector<1x16x32xbf16> to vector<16x32xbf16>
    %6 = tpu.iota {dimensions = array<i32: 0>} : vector<16x16xi32>
    %7 = tpu.iota {dimensions = array<i32: 1>} : vector<16x16xi32>
    %8 = arith.cmpi sgt, %7, %6 : vector<16x16xi32>
    %9 = vector.extract_strided_slice %1 {offsets = [0, 0], sizes = [16, 8], strides = [1, 1]} : vector<16x32xbf16> to vector<16x8xbf16>
    %10 = vector.extract_strided_slice %3 {offsets = [0, 0], sizes = [16, 8], strides = [1, 1]} : vector<16x32xbf16> to vector<16x8xbf16>
    %cst = arith.constant dense<0.000000e+00> : vector<16x16xf32>
    %11 = tpu.matmul %9, %10, %cst {dimension_numbers = #tpu.dot_dimension_numbers<[1], [1], [0], [0], [0, 0, 1, 0], [], []>} : vector<16x8xbf16>, vector<16x8xbf16>, vector<16x16xf32> -> vector<16x16xf32>
    %cst_8 = arith.constant 0.353553385 : f32
    %12 = vector.broadcast %cst_8 : f32 to vector<16x16xf32>
    %13 = arith.mulf %11, %12 : vector<16x16xf32>
    %cst_9 = arith.constant 0xFF800000 : f32
    %14 = vector.broadcast %cst_9 : f32 to vector<16x16xf32>
    %15 = arith.select %8, %14, %13 : vector<16x16xi1>, vector<16x16xf32>
    %cst_10 = arith.constant dense<0xFF800000> : vector<16xf32>
    %16 = vector.multi_reduction <maximumf>, %15, %cst_10 [1] : vector<16x16xf32> to vector<16xf32>
    %17 = vector.shape_cast %16 : vector<16xf32> to vector<16x1xf32>
    %18 = vector.broadcast %17 : vector<16x1xf32> to vector<16x16xf32>
    %19 = arith.subf %15, %18 : vector<16x16xf32>
    %20 = math.exp %19 : vector<16x16xf32>
    %cst_11 = arith.constant dense<0.000000e+00> : vector<16xf32>
    %21 = vector.multi_reduction <add>, %20, %cst_11 [1] : vector<16x16xf32> to vector<16xf32>
    %22 = vector.shape_cast %21 : vector<16xf32> to vector<16x1xf32>
    %23 = vector.broadcast %22 : vector<16x1xf32> to vector<16x16xf32>
    %24 = arith.divf %20, %23 : vector<16x16xf32>
    %25 = arith.truncf %24 : vector<16x16xf32> to vector<16x16xbf16>
    %26 = vector.extract_strided_slice %5 {offsets = [0, 0], sizes = [16, 8], strides = [1, 1]} : vector<16x32xbf16> to vector<16x8xbf16>
    %cst_12 = arith.constant dense<0.000000e+00> : vector<16x8xf32>
    %27 = tpu.matmul %25, %26, %cst_12 {dimension_numbers = #tpu.dot_dimension_numbers<[1], [0], [0], [1], [0, 0, 1, 1], [], []>} : vector<16x16xbf16>, vector<16x8xbf16>, vector<16x8xf32> -> vector<16x8xf32>
    %28 = arith.truncf %27 : vector<16x8xf32> to vector<16x8xbf16>
    %c0_13 = arith.constant 0 : index
    %c0_14 = arith.constant 0 : index
    %c0_15 = arith.constant 0 : index
    %29 = vector.load %arg4[%c0_13, %c0_14, %c0_15] : memref<1x16x32xbf16, #tpu.memory_space<vmem>>, vector<1x16x8xbf16>
    %30 = vector.shape_cast %29 : vector<1x16x8xbf16> to vector<16x8xbf16>
    %31 = vector.shape_cast %28 : vector<16x8xbf16> to vector<1x16x8xbf16>
    tpu.vector_store %arg4[%c0_13, %c0_14, %c0_15], %31 {strides = array<i32>} : memref<1x16x32xbf16, #tpu.memory_space<vmem>>, vector<1x16x8xbf16>,
    %32 = vector.extract_strided_slice %1 {offsets = [0, 8], sizes = [16, 8], strides = [1, 1]} : vector<16x32xbf16> to vector<16x8xbf16>
    %33 = vector.extract_strided_slice %3 {offsets = [0, 8], sizes = [16, 8], strides = [1, 1]} : vector<16x32xbf16> to vector<16x8xbf16>
    %cst_16 = arith.constant dense<0.000000e+00> : vector<16x16xf32>
    %34 = tpu.matmul %32, %33, %cst_16 {dimension_numbers = #tpu.dot_dimension_numbers<[1], [1], [0], [0], [0, 0, 1, 0], [], []>} : vector<16x8xbf16>, vector<16x8xbf16>, vector<16x16xf32> -> vector<16x16xf32>
    %cst_17 = arith.constant 0.353553385 : f32
    %35 = vector.broadcast %cst_17 : f32 to vector<16x16xf32>
    %36 = arith.mulf %34, %35 : vector<16x16xf32>
    %cst_18 = arith.constant 0xFF800000 : f32
    %37 = vector.broadcast %cst_18 : f32 to vector<16x16xf32>
    %38 = arith.select %8, %37, %36 : vector<16x16xi1>, vector<16x16xf32>
    %cst_19 = arith.constant dense<0xFF800000> : vector<16xf32>
    %39 = vector.multi_reduction <maximumf>, %38, %cst_19 [1] : vector<16x16xf32> to vector<16xf32>
    %40 = vector.shape_cast %39 : vector<16xf32> to vector<16x1xf32>
    %41 = vector.broadcast %40 : vector<16x1xf32> to vector<16x16xf32>
    %42 = arith.subf %38, %41 : vector<16x16xf32>
    %43 = math.exp %42 : vector<16x16xf32>
    %cst_20 = arith.constant dense<0.000000e+00> : vector<16xf32>
    %44 = vector.multi_reduction <add>, %43, %cst_20 [1] : vector<16x16xf32> to vector<16xf32>
    %45 = vector.shape_cast %44 : vector<16xf32> to vector<16x1xf32>
    %46 = vector.broadcast %45 : vector<16x1xf32> to vector<16x16xf32>
    %47 = arith.divf %43, %46 : vector<16x16xf32>
    %48 = arith.truncf %47 : vector<16x16xf32> to vector<16x16xbf16>
    %49 = vector.extract_strided_slice %5 {offsets = [0, 8], sizes = [16, 8], strides = [1, 1]} : vector<16x32xbf16> to vector<16x8xbf16>
    %cst_21 = arith.constant dense<0.000000e+00> : vector<16x8xf32>
    %50 = tpu.matmul %48, %49, %cst_21 {dimension_numbers = #tpu.dot_dimension_numbers<[1], [0], [0], [1], [0, 0, 1, 1], [], []>} : vector<16x16xbf16>, vector<16x8xbf16>, vector<16x8xf32> -> vector<16x8xf32>
    %51 = arith.truncf %50 : vector<16x8xf32> to vector<16x8xbf16>
    %c0_22 = arith.constant 0 : index
    %c0_23 = arith.constant 0 : index
    %c8 = arith.constant 8 : index
    %52 = vector.load %arg4[%c0_22, %c0_23, %c8] : memref<1x16x32xbf16, #tpu.memory_space<vmem>>, vector<1x16x8xbf16>
    %53 = vector.shape_cast %52 : vector<1x16x8xbf16> to vector<16x8xbf16>
    %54 = vector.shape_cast %51 : vector<16x8xbf16> to vector<1x16x8xbf16>
    tpu.vector_store %arg4[%c0_22, %c0_23, %c8], %54 {strides = array<i32>} : memref<1x16x32xbf16, #tpu.memory_space<vmem>>, vector<1x16x8xbf16>,
    %55 = vector.extract_strided_slice %1 {offsets = [0, 16], sizes = [16, 8], strides = [1, 1]} : vector<16x32xbf16> to vector<16x8xbf16>
    %56 = vector.extract_strided_slice %3 {offsets = [0, 16], sizes = [16, 8], strides = [1, 1]} : vector<16x32xbf16> to vector<16x8xbf16>
    %cst_24 = arith.constant dense<0.000000e+00> : vector<16x16xf32>
    %57 = tpu.matmul %55, %56, %cst_24 {dimension_numbers = #tpu.dot_dimension_numbers<[1], [1], [0], [0], [0, 0, 1, 0], [], []>} : vector<16x8xbf16>, vector<16x8xbf16>, vector<16x16xf32> -> vector<16x16xf32>
    %cst_25 = arith.constant 0.353553385 : f32
    %58 = vector.broadcast %cst_25 : f32 to vector<16x16xf32>
    %59 = arith.mulf %57, %58 : vector<16x16xf32>
    %cst_26 = arith.constant 0xFF800000 : f32
    %60 = vector.broadcast %cst_26 : f32 to vector<16x16xf32>
    %61 = arith.select %8, %60, %59 : vector<16x16xi1>, vector<16x16xf32>
    %cst_27 = arith.constant dense<0xFF800000> : vector<16xf32>
    %62 = vector.multi_reduction <maximumf>, %61, %cst_27 [1] : vector<16x16xf32> to vector<16xf32>
    %63 = vector.shape_cast %62 : vector<16xf32> to vector<16x1xf32>
    %64 = vector.broadcast %63 : vector<16x1xf32> to vector<16x16xf32>
    %65 = arith.subf %61, %64 : vector<16x16xf32>
    %66 = math.exp %65 : vector<16x16xf32>
    %cst_28 = arith.constant dense<0.000000e+00> : vector<16xf32>
    %67 = vector.multi_reduction <add>, %66, %cst_28 [1] : vector<16x16xf32> to vector<16xf32>
    %68 = vector.shape_cast %67 : vector<16xf32> to vector<16x1xf32>
    %69 = vector.broadcast %68 : vector<16x1xf32> to vector<16x16xf32>
    %70 = arith.divf %66, %69 : vector<16x16xf32>
    %71 = arith.truncf %70 : vector<16x16xf32> to vector<16x16xbf16>
    %72 = vector.extract_strided_slice %5 {offsets = [0, 16], sizes = [16, 8], strides = [1, 1]} : vector<16x32xbf16> to vector<16x8xbf16>
    %cst_29 = arith.constant dense<0.000000e+00> : vector<16x8xf32>
    %73 = tpu.matmul %71, %72, %cst_29 {dimension_numbers = #tpu.dot_dimension_numbers<[1], [0], [0], [1], [0, 0, 1, 1], [], []>} : vector<16x16xbf16>, vector<16x8xbf16>, vector<16x8xf32> -> vector<16x8xf32>
    %74 = arith.truncf %73 : vector<16x8xf32> to vector<16x8xbf16>
    %c0_30 = arith.constant 0 : index
    %c0_31 = arith.constant 0 : index
    %c16 = arith.constant 16 : index
    %75 = vector.load %arg4[%c0_30, %c0_31, %c16] : memref<1x16x32xbf16, #tpu.memory_space<vmem>>, vector<1x16x8xbf16>
    %76 = vector.shape_cast %75 : vector<1x16x8xbf16> to vector<16x8xbf16>
    %77 = vector.shape_cast %74 : vector<16x8xbf16> to vector<1x16x8xbf16>
    tpu.vector_store %arg4[%c0_30, %c0_31, %c16], %77 {strides = array<i32>} : memref<1x16x32xbf16, #tpu.memory_space<vmem>>, vector<1x16x8xbf16>,
    %78 = vector.extract_strided_slice %1 {offsets = [0, 24], sizes = [16, 8], strides = [1, 1]} : vector<16x32xbf16> to vector<16x8xbf16>
    %79 = vector.extract_strided_slice %3 {offsets = [0, 24], sizes = [16, 8], strides = [1, 1]} : vector<16x32xbf16> to vector<16x8xbf16>
    %cst_32 = arith.constant dense<0.000000e+00> : vector<16x16xf32>
    %80 = tpu.matmul %78, %79, %cst_32 {dimension_numbers = #tpu.dot_dimension_numbers<[1], [1], [0], [0], [0, 0, 1, 0], [], []>} : vector<16x8xbf16>, vector<16x8xbf16>, vector<16x16xf32> -> vector<16x16xf32>
    %cst_33 = arith.constant 0.353553385 : f32
    %81 = vector.broadcast %cst_33 : f32 to vector<16x16xf32>
    %82 = arith.mulf %80, %81 : vector<16x16xf32>
    %cst_34 = arith.constant 0xFF800000 : f32
    %83 = vector.broadcast %cst_34 : f32 to vector<16x16xf32>
    %84 = arith.select %8, %83, %82 : vector<16x16xi1>, vector<16x16xf32>
    %cst_35 = arith.constant dense<0xFF800000> : vector<16xf32>
    %85 = vector.multi_reduction <maximumf>, %84, %cst_35 [1] : vector<16x16xf32> to vector<16xf32>
    %86 = vector.shape_cast %85 : vector<16xf32> to vector<16x1xf32>
    %87 = vector.broadcast %86 : vector<16x1xf32> to vector<16x16xf32>
    %88 = arith.subf %84, %87 : vector<16x16xf32>
    %89 = math.exp %88 : vector<16x16xf32>
    %cst_36 = arith.constant dense<0.000000e+00> : vector<16xf32>
    %90 = vector.multi_reduction <add>, %89, %cst_36 [1] : vector<16x16xf32> to vector<16xf32>
    %91 = vector.shape_cast %90 : vector<16xf32> to vector<16x1xf32>
    %92 = vector.broadcast %91 : vector<16x1xf32> to vector<16x16xf32>
    %93 = arith.divf %89, %92 : vector<16x16xf32>
    %94 = arith.truncf %93 : vector<16x16xf32> to vector<16x16xbf16>
    %95 = vector.extract_strided_slice %5 {offsets = [0, 24], sizes = [16, 8], strides = [1, 1]} : vector<16x32xbf16> to vector<16x8xbf16>
    %cst_37 = arith.constant dense<0.000000e+00> : vector<16x8xf32>
    %96 = tpu.matmul %94, %95, %cst_37 {dimension_numbers = #tpu.dot_dimension_numbers<[1], [0], [0], [1], [0, 0, 1, 1], [], []>} : vector<16x16xbf16>, vector<16x8xbf16>, vector<16x8xf32> -> vector<16x8xf32>
    %97 = arith.truncf %96 : vector<16x8xf32> to vector<16x8xbf16>
    %c0_38 = arith.constant 0 : index
    %c0_39 = arith.constant 0 : index
    %c24 = arith.constant 24 : index
    %98 = vector.load %arg4[%c0_38, %c0_39, %c24] : memref<1x16x32xbf16, #tpu.memory_space<vmem>>, vector<1x16x8xbf16>
    %99 = vector.shape_cast %98 : vector<1x16x8xbf16> to vector<16x8xbf16>
    %100 = vector.shape_cast %97 : vector<16x8xbf16> to vector<1x16x8xbf16>
    tpu.vector_store %arg4[%c0_38, %c0_39, %c24], %100 {strides = array<i32>} : memref<1x16x32xbf16, #tpu.memory_space<vmem>>, vector<1x16x8xbf16>,
    return
  }
  func.func @transform_0(%arg0: i32) -> (i32, i32, i32) {
    %c0_i32 = arith.constant 0 : i32
    %c0_i32_0 = arith.constant 0 : i32
    %c0_i32_1 = arith.constant 0 : i32
    return %arg0, %c0_i32, %c0_i32_0 : i32, i32, i32
  }
  func.func @transform_1(%arg0: i32) -> (i32, i32, i32) {
    %c0_i32 = arith.constant 0 : i32
    %c0_i32_0 = arith.constant 0 : i32
    %c0_i32_1 = arith.constant 0 : i32
    return %arg0, %c0_i32, %c0_i32_0 : i32, i32, i32
  }
  func.func @transform_2(%arg0: i32) -> (i32, i32, i32) {
    %c0_i32 = arith.constant 0 : i32
    %c0_i32_0 = arith.constant 0 : i32
    %c0_i32_1 = arith.constant 0 : i32
    return %arg0, %c0_i32, %c0_i32_0 : i32, i32, i32
  }
  func.func @transform_3(%arg0: i32) -> (i32, i32, i32) {
    %c0_i32 = arith.constant 0 : i32
    %c0_i32_0 = arith.constant 0 : i32
    %c0_i32_1 = arith.constant 0 : i32
    return %arg0, %c0_i32, %c0_i32_0 : i32, i32, i32
  }
}

module attributes {stable_mosaic.version = 11 : i64} {
  func.func @_mha_kernel(%arg0: i32, %arg1: memref<1x16x32xbf16, #tpu.memory_space<vmem>>, %arg2: memref<1x8x32xbf16, #tpu.memory_space<vmem>>, %arg3: memref<1x8x32xbf16, #tpu.memory_space<vmem>>, %arg4: memref<1x16x32xbf16, #tpu.memory_space<vmem>>) attributes {dimension_semantics = [#tpu.dimension_semantics<parallel>], iteration_bounds = array<i64: 2>, scalar_prefetch = 0 : i64, scratch_operands = 0 : i64, tpu.core_type = #tpu.core_type<tc>, window_params = [{transform_indices = @transform_0, window_bounds = array<i64: 1, 16, 32>}, {transform_indices = @transform_1, window_bounds = array<i64: 1, 8, 32>}, {transform_indices = @transform_2, window_bounds = array<i64: 1, 8, 32>}, {transform_indices = @transform_3, window_bounds = array<i64: 1, 16, 32>}]} {
    %c0 = arith.constant 0 : index
    %c0_0 = arith.constant 0 : index
    %c0_1 = arith.constant 0 : index
    %0 = vector.load %arg1[%c0, %c0_0, %c0_1] : memref<1x16x32xbf16, #tpu.memory_space<vmem>>, vector<1x16x32xbf16>
    %1 = vector.shape_cast %0 : vector<1x16x32xbf16> to vector<16x32xbf16>
    %c0_2 = arith.constant 0 : index
    %c0_3 = arith.constant 0 : index
    %c0_4 = arith.constant 0 : index
    %2 = vector.load %arg2[%c0_2, %c0_3, %c0_4] : memref<1x8x32xbf16, #tpu.memory_space<vmem>>, vector<1x8x32xbf16>
    %3 = vector.shape_cast %2 : vector<1x8x32xbf16> to vector<8x32xbf16>
    %c0_5 = arith.constant 0 : index
    %c0_6 = arith.constant 0 : index
    %c0_7 = arith.constant 0 : index
    %4 = vector.load %arg3[%c0_5, %c0_6, %c0_7] : memref<1x8x32xbf16, #tpu.memory_space<vmem>>, vector<1x8x32xbf16>
    %5 = vector.shape_cast %4 : vector<1x8x32xbf16> to vector<8x32xbf16>
    %6 = vector.extract_strided_slice %1 {offsets = [0, 0], sizes = [16, 8], strides = [1, 1]} : vector<16x32xbf16> to vector<16x8xbf16>
    %7 = vector.extract_strided_slice %3 {offsets = [0, 0], sizes = [8, 8], strides = [1, 1]} : vector<8x32xbf16> to vector<8x8xbf16>
    %cst = arith.constant dense<0.000000e+00> : vector<16x8xf32>
    %8 = tpu.matmul %6, %7, %cst {dimension_numbers = #tpu.dot_dimension_numbers<[1], [1], [0], [0], [0, 0, 1, 0], [], []>} : vector<16x8xbf16>, vector<8x8xbf16>, vector<16x8xf32> -> vector<16x8xf32>
    %cst_8 = arith.constant 0.353553385 : f32
    %9 = vector.broadcast %cst_8 : f32 to vector<16x8xf32>
    %10 = arith.mulf %8, %9 : vector<16x8xf32>
    %cst_9 = arith.constant dense<0xFF800000> : vector<16xf32>
    %11 = vector.multi_reduction <maximumf>, %10, %cst_9 [1] : vector<16x8xf32> to vector<16xf32>
    %12 = vector.shape_cast %11 : vector<16xf32> to vector<16x1xf32>
    %13 = vector.broadcast %12 : vector<16x1xf32> to vector<16x8xf32>
    %14 = arith.subf %10, %13 : vector<16x8xf32>
    %15 = math.exp %14 : vector<16x8xf32>
    %cst_10 = arith.constant dense<0.000000e+00> : vector<16xf32>
    %16 = vector.multi_reduction <add>, %15, %cst_10 [1] : vector<16x8xf32> to vector<16xf32>
    %17 = vector.shape_cast %16 : vector<16xf32> to vector<16x1xf32>
    %18 = vector.broadcast %17 : vector<16x1xf32> to vector<16x8xf32>
    %19 = arith.divf %15, %18 : vector<16x8xf32>
    %20 = arith.truncf %19 : vector<16x8xf32> to vector<16x8xbf16>
    %21 = vector.extract_strided_slice %5 {offsets = [0, 0], sizes = [8, 8], strides = [1, 1]} : vector<8x32xbf16> to vector<8x8xbf16>
    %cst_11 = arith.constant dense<0.000000e+00> : vector<16x8xf32>
    %22 = tpu.matmul %20, %21, %cst_11 {dimension_numbers = #tpu.dot_dimension_numbers<[1], [0], [0], [1], [0, 0, 1, 1], [], []>} : vector<16x8xbf16>, vector<8x8xbf16>, vector<16x8xf32> -> vector<16x8xf32>
    %23 = arith.truncf %22 : vector<16x8xf32> to vector<16x8xbf16>
    %c0_12 = arith.constant 0 : index
    %c0_13 = arith.constant 0 : index
    %c0_14 = arith.constant 0 : index
    %24 = vector.load %arg4[%c0_12, %c0_13, %c0_14] : memref<1x16x32xbf16, #tpu.memory_space<vmem>>, vector<1x16x8xbf16>
    %25 = vector.shape_cast %24 : vector<1x16x8xbf16> to vector<16x8xbf16>
    %26 = vector.shape_cast %23 : vector<16x8xbf16> to vector<1x16x8xbf16>
    tpu.vector_store %arg4[%c0_12, %c0_13, %c0_14], %26 {strides = array<i32>} : memref<1x16x32xbf16, #tpu.memory_space<vmem>>, vector<1x16x8xbf16>,
    %27 = vector.extract_strided_slice %1 {offsets = [0, 8], sizes = [16, 8], strides = [1, 1]} : vector<16x32xbf16> to vector<16x8xbf16>
    %28 = vector.extract_strided_slice %3 {offsets = [0, 8], sizes = [8, 8], strides = [1, 1]} : vector<8x32xbf16> to vector<8x8xbf16>
    %cst_15 = arith.constant dense<0.000000e+00> : vector<16x8xf32>
    %29 = tpu.matmul %27, %28, %cst_15 {dimension_numbers = #tpu.dot_dimension_numbers<[1], [1], [0], [0], [0, 0, 1, 0], [], []>} : vector<16x8xbf16>, vector<8x8xbf16>, vector<16x8xf32> -> vector<16x8xf32>
    %cst_16 = arith.constant 0.353553385 : f32
    %30 = vector.broadcast %cst_16 : f32 to vector<16x8xf32>
    %31 = arith.mulf %29, %30 : vector<16x8xf32>
    %cst_17 = arith.constant dense<0xFF800000> : vector<16xf32>
    %32 = vector.multi_reduction <maximumf>, %31, %cst_17 [1] : vector<16x8xf32> to vector<16xf32>
    %33 = vector.shape_cast %32 : vector<16xf32> to vector<16x1xf32>
    %34 = vector.broadcast %33 : vector<16x1xf32> to vector<16x8xf32>
    %35 = arith.subf %31, %34 : vector<16x8xf32>
    %36 = math.exp %35 : vector<16x8xf32>
    %cst_18 = arith.constant dense<0.000000e+00> : vector<16xf32>
    %37 = vector.multi_reduction <add>, %36, %cst_18 [1] : vector<16x8xf32> to vector<16xf32>
    %38 = vector.shape_cast %37 : vector<16xf32> to vector<16x1xf32>
    %39 = vector.broadcast %38 : vector<16x1xf32> to vector<16x8xf32>
    %40 = arith.divf %36, %39 : vector<16x8xf32>
    %41 = arith.truncf %40 : vector<16x8xf32> to vector<16x8xbf16>
    %42 = vector.extract_strided_slice %5 {offsets = [0, 8], sizes = [8, 8], strides = [1, 1]} : vector<8x32xbf16> to vector<8x8xbf16>
    %cst_19 = arith.constant dense<0.000000e+00> : vector<16x8xf32>
    %43 = tpu.matmul %41, %42, %cst_19 {dimension_numbers = #tpu.dot_dimension_numbers<[1], [0], [0], [1], [0, 0, 1, 1], [], []>} : vector<16x8xbf16>, vector<8x8xbf16>, vector<16x8xf32> -> vector<16x8xf32>
    %44 = arith.truncf %43 : vector<16x8xf32> to vector<16x8xbf16>
    %c0_20 = arith.constant 0 : index
    %c0_21 = arith.constant 0 : index
    %c8 = arith.constant 8 : index
    %45 = vector.load %arg4[%c0_20, %c0_21, %c8] : memref<1x16x32xbf16, #tpu.memory_space<vmem>>, vector<1x16x8xbf16>
    %46 = vector.shape_cast %45 : vector<1x16x8xbf16> to vector<16x8xbf16>
    %47 = vector.shape_cast %44 : vector<16x8xbf16> to vector<1x16x8xbf16>
    tpu.vector_store %arg4[%c0_20, %c0_21, %c8], %47 {strides = array<i32>} : memref<1x16x32xbf16, #tpu.memory_space<vmem>>, vector<1x16x8xbf16>,
    %48 = vector.extract_strided_slice %1 {offsets = [0, 16], sizes = [16, 8], strides = [1, 1]} : vector<16x32xbf16> to vector<16x8xbf16>
    %49 = vector.extract_strided_slice %3 {offsets = [0, 16], sizes = [8, 8], strides = [1, 1]} : vector<8x32xbf16> to vector<8x8xbf16>
    %cst_22 = arith.constant dense<0.000000e+00> : vector<16x8xf32>
    %50 = tpu.matmul %48, %49, %cst_22 {dimension_numbers = #tpu.dot_dimension_numbers<[1], [1], [0], [0], [0, 0, 1, 0], [], []>} : vector<16x8xbf16>, vector<8x8xbf16>, vector<16x8xf32> -> vector<16x8xf32>
    %cst_23 = arith.constant 0.353553385 : f32
    %51 = vector.broadcast %cst_23 : f32 to vector<16x8xf32>
    %52 = arith.mulf %50, %51 : vector<16x8xf32>
    %cst_24 = arith.constant dense<0xFF800000> : vector<16xf32>
    %53 = vector.multi_reduction <maximumf>, %52, %cst_24 [1] : vector<16x8xf32> to vector<16xf32>
    %54 = vector.shape_cast %53 : vector<16xf32> to vector<16x1xf32>
    %55 = vector.broadcast %54 : vector<16x1xf32> to vector<16x8xf32>
    %56 = arith.subf %52, %55 : vector<16x8xf32>
    %57 = math.exp %56 : vector<16x8xf32>
    %cst_25 = arith.constant dense<0.000000e+00> : vector<16xf32>
    %58 = vector.multi_reduction <add>, %57, %cst_25 [1] : vector<16x8xf32> to vector<16xf32>
    %59 = vector.shape_cast %58 : vector<16xf32> to vector<16x1xf32>
    %60 = vector.broadcast %59 : vector<16x1xf32> to vector<16x8xf32>
    %61 = arith.divf %57, %60 : vector<16x8xf32>
    %62 = arith.truncf %61 : vector<16x8xf32> to vector<16x8xbf16>
    %63 = vector.extract_strided_slice %5 {offsets = [0, 16], sizes = [8, 8], strides = [1, 1]} : vector<8x32xbf16> to vector<8x8xbf16>
    %cst_26 = arith.constant dense<0.000000e+00> : vector<16x8xf32>
    %64 = tpu.matmul %62, %63, %cst_26 {dimension_numbers = #tpu.dot_dimension_numbers<[1], [0], [0], [1], [0, 0, 1, 1], [], []>} : vector<16x8xbf16>, vector<8x8xbf16>, vector<16x8xf32> -> vector<16x8xf32>
    %65 = arith.truncf %64 : vector<16x8xf32> to vector<16x8xbf16>
    %c0_27 = arith.constant 0 : index
    %c0_28 = arith.constant 0 : index
    %c16 = arith.constant 16 : index
    %66 = vector.load %arg4[%c0_27, %c0_28, %c16] : memref<1x16x32xbf16, #tpu.memory_space<vmem>>, vector<1x16x8xbf16>
    %67 = vector.shape_cast %66 : vector<1x16x8xbf16> to vector<16x8xbf16>
    %68 = vector.shape_cast %65 : vector<16x8xbf16> to vector<1x16x8xbf16>
    tpu.vector_store %arg4[%c0_27, %c0_28, %c16], %68 {strides = array<i32>} : memref<1x16x32xbf16, #tpu.memory_space<vmem>>, vector<1x16x8xbf16>,
    %69 = vector.extract_strided_slice %1 {offsets = [0, 24], sizes = [16, 8], strides = [1, 1]} : vector<16x32xbf16> to vector<16x8xbf16>
    %70 = vector.extract_strided_slice %3 {offsets = [0, 24], sizes = [8, 8], strides = [1, 1]} : vector<8x32xbf16> to vector<8x8xbf16>
    %cst_29 = arith.constant dense<0.000000e+00> : vector<16x8xf32>
    %71 = tpu.matmul %69, %70, %cst_29 {dimension_numbers = #tpu.dot_dimension_numbers<[1], [1], [0], [0], [0, 0, 1, 0], [], []>} : vector<16x8xbf16>, vector<8x8xbf16>, vector<16x8xf32> -> vector<16x8xf32>
    %cst_30 = arith.constant 0.353553385 : f32
    %72 = vector.broadcast %cst_30 : f32 to vector<16x8xf32>
    %73 = arith.mulf %71, %72 : vector<16x8xf32>
    %cst_31 = arith.constant dense<0xFF800000> : vector<16xf32>
    %74 = vector.multi_reduction <maximumf>, %73, %cst_31 [1] : vector<16x8xf32> to vector<16xf32>
    %75 = vector.shape_cast %74 : vector<16xf32> to vector<16x1xf32>
    %76 = vector.broadcast %75 : vector<16x1xf32> to vector<16x8xf32>
    %77 = arith.subf %73, %76 : vector<16x8xf32>
    %78 = math.exp %77 : vector<16x8xf32>
    %cst_32 = arith.constant dense<0.000000e+00> : vector<16xf32>
    %79 = vector.multi_reduction <add>, %78, %cst_32 [1] : vector<16x8xf32> to vector<16xf32>
    %80 = vector.shape_cast %79 : vector<16xf32> to vector<16x1xf32>
    %81 = vector.broadcast %80 : vector<16x1xf32> to vector<16x8xf32>
    %82 = arith.divf %78, %81 : vector<16x8xf32>
    %83 = arith.truncf %82 : vector<16x8xf32> to vector<16x8xbf16>
    %84 = vector.extract_strided_slice %5 {offsets = [0, 24], sizes = [8, 8], strides = [1, 1]} : vector<8x32xbf16> to vector<8x8xbf16>
    %cst_33 = arith.constant dense<0.000000e+00> : vector<16x8xf32>
    %85 = tpu.matmul %83, %84, %cst_33 {dimension_numbers = #tpu.dot_dimension_numbers<[1], [0], [0], [1], [0, 0, 1, 1], [], []>} : vector<16x8xbf16>, vector<8x8xbf16>, vector<16x8xf32> -> vector<16x8xf32>
    %86 = arith.truncf %85 : vector<16x8xf32> to vector<16x8xbf16>
    %c0_34 = arith.constant 0 : index
    %c0_35 = arith.constant 0 : index
    %c24 = arith.constant 24 : index
    %87 = vector.load %arg4[%c0_34, %c0_35, %c24] : memref<1x16x32xbf16, #tpu.memory_space<vmem>>, vector<1x16x8xbf16>
    %88 = vector.shape_cast %87 : vector<1x16x8xbf16> to vector<16x8xbf16>
    %89 = vector.shape_cast %86 : vector<16x8xbf16> to vector<1x16x8xbf16>
    tpu.vector_store %arg4[%c0_34, %c0_35, %c24], %89 {strides = array<i32>} : memref<1x16x32xbf16, #tpu.memory_space<vmem>>, vector<1x16x8xbf16>,
    return
  }
  func.func @transform_0(%arg0: i32) -> (i32, i32, i32) {
    %c0_i32 = arith.constant 0 : i32
    %c0_i32_0 = arith.constant 0 : i32
    %c0_i32_1 = arith.constant 0 : i32
    return %arg0, %c0_i32, %c0_i32_0 : i32, i32, i32
  }
  func.func @transform_1(%arg0: i32) -> (i32, i32, i32) {
    %c0_i32 = arith.constant 0 : i32
    %c0_i32_0 = arith.constant 0 : i32
    %c0_i32_1 = arith.constant 0 : i32
    return %arg0, %c0_i32, %c0_i32_0 : i32, i32, i32
  }
  func.func @transform_2(%arg0: i32) -> (i32, i32, i32) {
    %c0_i32 = arith.constant 0 : i32
    %c0_i32_0 = arith.constant 0 : i32
    %c0_i32_1 = arith.constant 0 : i32
    return %arg0, %c0_i32, %c0_i32_0 : i32, i32, i32
  }
  func.func @transform_3(%arg0: i32) -> (i32, i32, i32) {
    %c0_i32 = arith.constant 0 : i32
    %c0_i32_0 = arith.constant 0 : i32
    %c0_i32_1 = arith.constant 0 : i32
    return %arg0, %c0_i32, %c0_i32_0 : i32, i32, i32
  }
}

module attributes {stable_mosaic.version = 11 : i64} {
  func.func @_ln_kernel(%arg0: i32, %arg1: memref<32x32xf32, #tpu.memory_space<vmem>>, %arg2: memref<1x32xf32, #tpu.memory_space<vmem>>, %arg3: memref<1x32xf32, #tpu.memory_space<vmem>>, %arg4: memref<32x32xf32, #tpu.memory_space<vmem>>) attributes {dimension_semantics = [#tpu.dimension_semantics<parallel>], iteration_bounds = array<i64: 1>, scalar_prefetch = 0 : i64, scratch_operands = 0 : i64, tpu.core_type = #tpu.core_type<tc>, window_params = [{transform_indices = @transform_0, window_bounds = array<i64: 32, 32>}, {pipeline_mode = #tpu.pipeline_mode<synchronous>, transform_indices = @transform_1, window_bounds = array<i64: 1, 32>}, {pipeline_mode = #tpu.pipeline_mode<synchronous>, transform_indices = @transform_2, window_bounds = array<i64: 1, 32>}, {transform_indices = @transform_3, window_bounds = array<i64: 32, 32>}]} {
    %c0 = arith.constant 0 : index
    %c0_0 = arith.constant 0 : index
    %0 = vector.load %arg1[%c0, %c0_0] : memref<32x32xf32, #tpu.memory_space<vmem>>, vector<32x32xf32>
    %cst = arith.constant dense<0.000000e+00> : vector<32xf32>
    %1 = vector.multi_reduction <add>, %0, %cst [1] : vector<32x32xf32> to vector<32xf32>
    %2 = vector.shape_cast %1 : vector<32xf32> to vector<32x1xf32>
    %cst_1 = arith.constant 3.200000e+01 : f32
    %3 = vector.broadcast %cst_1 : f32 to vector<32x1xf32>
    %4 = arith.divf %2, %3 : vector<32x1xf32>
    %5 = vector.broadcast %4 : vector<32x1xf32> to vector<32x32xf32>
    %6 = arith.subf %0, %5 : vector<32x32xf32>
    %7 = arith.mulf %6, %6 : vector<32x32xf32>
    %cst_2 = arith.constant dense<0.000000e+00> : vector<32xf32>
    %8 = vector.multi_reduction <add>, %7, %cst_2 [1] : vector<32x32xf32> to vector<32xf32>
    %9 = vector.shape_cast %8 : vector<32xf32> to vector<32x1xf32>
    %cst_3 = arith.constant 3.200000e+01 : f32
    %10 = vector.broadcast %cst_3 : f32 to vector<32x1xf32>
    %11 = arith.divf %9, %10 : vector<32x1xf32>
    %12 = vector.broadcast %4 : vector<32x1xf32> to vector<32x32xf32>
    %13 = arith.subf %0, %12 : vector<32x32xf32>
    %cst_4 = arith.constant 9.99999974E-6 : f32
    %14 = vector.broadcast %cst_4 : f32 to vector<32x1xf32>
    %15 = arith.addf %11, %14 : vector<32x1xf32>
    %16 = math.rsqrt %15 : vector<32x1xf32>
    %17 = vector.broadcast %16 : vector<32x1xf32> to vector<32x32xf32>
    %18 = arith.mulf %13, %17 : vector<32x32xf32>
    %c0_5 = arith.constant 0 : index
    %c0_6 = arith.constant 0 : index
    %19 = vector.load %arg2[%c0_5, %c0_6] : memref<1x32xf32, #tpu.memory_space<vmem>>, vector<1x32xf32>
    %20 = vector.broadcast %19 : vector<1x32xf32> to vector<32x32xf32>
    %21 = arith.mulf %18, %20 : vector<32x32xf32>
    %c0_7 = arith.constant 0 : index
    %c0_8 = arith.constant 0 : index
    %22 = vector.load %arg3[%c0_7, %c0_8] : memref<1x32xf32, #tpu.memory_space<vmem>>, vector<1x32xf32>
    %23 = vector.broadcast %22 : vector<1x32xf32> to vector<32x32xf32>
    %24 = arith.addf %21, %23 : vector<32x32xf32>
    %c0_9 = arith.constant 0 : index
    %c0_10 = arith.constant 0 : index
    %25 = vector.load %arg4[%c0_9, %c0_10] : memref<32x32xf32, #tpu.memory_space<vmem>>, vector<32x32xf32>
    tpu.vector_store %arg4[%c0_9, %c0_10], %24 {strides = array<i32>} : memref<32x32xf32, #tpu.memory_space<vmem>>, vector<32x32xf32>,
    return
  }
  func.func @transform_0(%arg0: i32) -> (i32, i32) {
    %c0_i32 = arith.constant 0 : i32
    %c0_i32_0 = arith.constant 0 : i32
    return %arg0, %c0_i32 : i32, i32
  }
  func.func @transform_1(%arg0: i32) -> (i32, i32) {
    %c0_i32 = arith.constant 0 : i32
    %c0_i32_0 = arith.constant 0 : i32
    %c0_i32_1 = arith.constant 0 : i32
    return %c0_i32, %c0_i32_0 : i32, i32
  }
  func.func @transform_2(%arg0: i32) -> (i32, i32) {
    %c0_i32 = arith.constant 0 : i32
    %c0_i32_0 = arith.constant 0 : i32
    %c0_i32_1 = arith.constant 0 : i32
    return %c0_i32, %c0_i32_0 : i32, i32
  }
  func.func @transform_3(%arg0: i32) -> (i32, i32) {
    %c0_i32 = arith.constant 0 : i32
    %c0_i32_0 = arith.constant 0 : i32
    return %arg0, %c0_i32 : i32, i32
  }
}

module attributes {stable_mosaic.version = 11 : i64} {
  func.func @_linear_kernel(%arg0: i32, %arg1: memref<32x32xbf16, #tpu.memory_space<vmem>>, %arg2: memref<32x4xbf16, #tpu.memory_space<vmem>>, %arg3: memref<1x4xf32, #tpu.memory_space<vmem>>, %arg4: memref<32x4xf32, #tpu.memory_space<vmem>>) attributes {dimension_semantics = [#tpu.dimension_semantics<parallel>], iteration_bounds = array<i64: 1>, scalar_prefetch = 0 : i64, scratch_operands = 0 : i64, tpu.core_type = #tpu.core_type<tc>, window_params = [{transform_indices = @transform_0, window_bounds = array<i64: 32, 32>}, {pipeline_mode = #tpu.pipeline_mode<synchronous>, transform_indices = @transform_1, window_bounds = array<i64: 32, 4>}, {pipeline_mode = #tpu.pipeline_mode<synchronous>, transform_indices = @transform_2, window_bounds = array<i64: 1, 4>}, {transform_indices = @transform_3, window_bounds = array<i64: 32, 4>}]} {
    %c0 = arith.constant 0 : index
    %c0_0 = arith.constant 0 : index
    %0 = vector.load %arg1[%c0, %c0_0] : memref<32x32xbf16, #tpu.memory_space<vmem>>, vector<32x32xbf16>
    %c0_1 = arith.constant 0 : index
    %c0_2 = arith.constant 0 : index
    %1 = vector.load %arg2[%c0_1, %c0_2] : memref<32x4xbf16, #tpu.memory_space<vmem>>, vector<32x4xbf16>
    %cst = arith.constant dense<0.000000e+00> : vector<32x4xf32>
    %2 = tpu.matmul %0, %1, %cst {dimension_numbers = #tpu.dot_dimension_numbers<[1], [0], [0], [1], [0, 0, 1, 1], [], []>} : vector<32x32xbf16>, vector<32x4xbf16>, vector<32x4xf32> -> vector<32x4xf32>
    %c0_3 = arith.constant 0 : index
    %c0_4 = arith.constant 0 : index
    %3 = vector.load %arg3[%c0_3, %c0_4] : memref<1x4xf32, #tpu.memory_space<vmem>>, vector<1x4xf32>
    %4 = vector.broadcast %3 : vector<1x4xf32> to vector<32x4xf32>
    %5 = arith.addf %2, %4 : vector<32x4xf32>
    %c0_5 = arith.constant 0 : index
    %c0_6 = arith.constant 0 : index
    %6 = vector.load %arg4[%c0_5, %c0_6] : memref<32x4xf32, #tpu.memory_space<vmem>>, vector<32x4xf32>
    tpu.vector_store %arg4[%c0_5, %c0_6], %5 {strides = array<i32>} : memref<32x4xf32, #tpu.memory_space<vmem>>, vector<32x4xf32>,
    return
  }
  func.func @transform_0(%arg0: i32) -> (i32, i32) {
    %c0_i32 = arith.constant 0 : i32
    %c0_i32_0 = arith.constant 0 : i32
    return %arg0, %c0_i32 : i32, i32
  }
  func.func @transform_1(%arg0: i32) -> (i32, i32) {
    %c0_i32 = arith.constant 0 : i32
    %c0_i32_0 = arith.constant 0 : i32
    %c0_i32_1 = arith.constant 0 : i32
    return %c0_i32, %c0_i32_0 : i32, i32
  }
  func.func @transform_2(%arg0: i32) -> (i32, i32) {
    %c0_i32 = arith.constant 0 : i32
    %c0_i32_0 = arith.constant 0 : i32
    %c0_i32_1 = arith.constant 0 : i32
    return %c0_i32, %c0_i32_0 : i32, i32
  }
  func.func @transform_3(%arg0: i32) -> (i32, i32) {
    %c0_i32 = arith.constant 0 : i32
    %c0_i32_0 = arith.constant 0 : i32
    return %arg0, %c0_i32 : i32, i32
  }
}

</mosaic_0001>

<bundles_post_ra>
// kernel: informer_forward.23
= control target key start
LH: loop header
LB: loop body
LE: loop exit
PB: predicated region body
PF: predicated region fallthrough
CT: control target
= control target key end

     0   :  { %vm52_vm0 = vcmask 261120   ;;  %vm124_vm1 = vcmask 781312   ;;  %s211_s1 = inlined_call_operand.vmem [shape: bf16[32,96], index: 1, kind: input, shape index: {}]   ;;  %s212_s0 = inlined_call_operand.vmem [shape: bf16[32,32], index: 0, kind: input, shape index: {}]   ;;  %s213_s2 = inlined_call_operand.vmem [shape: f32[1,96], index: 2, kind: input, shape index: {}]   ;;  %s214_s3 = inlined_call_operand.vmem [shape: bf16[32,96], index: 3, kind: output, shape index: {}]  }
   0x1   :  { %v160_v0 = vld [vmem:[%s211_s1 + $0x8] sm:$0xff]   ;;  %v161_v1 = vld [vmem:[%s211_s1] sm:$0xff]  }
   0x2   :  { %152 = vmatprep.subr.bf16.mxu0 %v160_v0  ;;  %v162_v2 = vld [vmem:[%s212_s0] sm:$0xff]   ;;  %v163_v3 = vld [vmem:[%s212_s0 + $0x8] sm:$0xff]  }
   0x3   :  { %153 = vmatpush3.bf16.msra.mxu0 %v160_v0  ;;  %156 = vmatprep.mubr.msk.bf16.mxu0 %vm52_vm0, %v162_v2  ;;  %v133_v4 = vld [vmem:[%s213_s2] ss:$0 sm:$0xff] }
   0x4   :  { %154 = vmatprep.subr.bf16.mxu0 %v161_v1 }
   0x7   :  { %155 = vmatpush3.bf16.msra.mxu0 %v161_v1 }
   0xa   :  { %157 = vmatmul.mubr.msk.bf16.vlgmr.msra.gmra.mxu0 %vm52_vm0, %v163_v3 }
  0xca   :  { %v158_v5 = vpop.f32.mrf.mxu0 }
  0xcb   :  { %v102_v6 = vadd.f32 %v158_v5, %v133_v4 }
  0xcc   :  { %v93_v7 = vpop.f32.mrf.mxu0 }
  0xcd   :  { %v146_v8 = vpack.c.bf16 %v102_v6, %v102_v6  ;;  %v94_v9 = vadd.f32 %v133_v4, %v93_v7 }
  0xce   :  { %v159_v10 = vpop.f32.mrf.mxu0 }
  0xcf   :  { %127 = vst.msk [vmem:[%s214_s3 + $0x8] sm:$0xf] %vm124_vm1, %v146_v8  ;;  %v144_v11 = vpack.c.bf16 %v94_v9, %v94_v9  ;;  %v105_v12 = vadd.f32 %v159_v10, %v133_v4 }
  0xd0   :  { %v96_v13 = vpop.f32.mrf.mxu0 }
  0xd1   :  { %125 = vst.msk [vmem:[%s214_s3] sm:$0xf] %vm124_vm1, %v144_v11  ;;  %v147_v14 = vpack.c.bf16 %v105_v12, %v105_v12  ;;  %v97_v15 = vadd.f32 %v133_v4, %v96_v13 }
  0xd3   :  { %128 = vst.msk [vmem:[%s214_s3 + $0xc] sm:$0xf] %vm124_vm1, %v147_v14  ;;  %v145_v16 = vpack.c.bf16 %v97_v15, %v97_v15 }
  0xd5   :  { %126 = vst.msk [vmem:[%s214_s3 + $0x4] sm:$0xf] %vm124_vm1, %v145_v16 }

// kernel: informer_forward.22
= control target key start
LH: loop header
LB: loop body
LE: loop exit
PB: predicated region body
PF: predicated region fallthrough
CT: control target
= control target key end

     0   :  { %s694_s21 = smov 0   ;;  %s748_s0 = inlined_call_operand.vmem [shape: f32[2,16,4], index: 0, kind: input, shape index: {}]   ;;  %s749_s1 = inlined_call_operand.vmem [shape: f32[4,32], index: 1, kind: input, shape index: {}]   ;;  %s750_s2 = inlined_call_operand.vmem [shape: f32[4,32], index: 2, kind: input, shape index: {}]   ;;  %s751_s3 = inlined_call_operand.vmem [shape: f32[4,32], index: 3, kind: input, shape index: {}]   ;;  %s752_s4 = inlined_call_operand.vmem [shape: f32[1,32], index: 4, kind: input, shape index: {}]   ;;  %s753_s5 = inlined_call_operand.vmem [shape: f32[16,32], index: 5, kind: input, shape index: {}]   ;;  %s754_s6 = inlined_call_operand.vmem [shape: f32[2,16,32], index: 6, kind: output, shape index: {}]  }
   0x1 LB: > { %s596_s22 = sadd.s32 4294967295, %s657_s21   ;;  %p600_p0 = scmp.ge.s32.totalorder %s657_s21, 1  ;;  %s657_s21 = sphi %s694_s21, %s16_s21  }
   0x2   : > { %p212_p1 = scmp.lt.s32.totalorder %s657_s21, 3 }
   0x4   : > { %p213_p2 = pnand %p600_p0, %p212_p1 }
   0x5   : > { %p242_p3 = scmp.lt.s32.totalorder (!%p213_p2), %s596_s22, 1 }
   0x6   : > { %216 = sbr.rel (%p213_p2) target bundleno = 224 (0xe0), region = 44 }
   0xb   : > { %v267_v0 = vld [vmem:[%s750_s2] sm:$0xf]  ;;  %vm275_vm0 = vcmask 1043456   ;;  %v256_v1 = vlaneseq  ;;  %s756_s22 = smov (!%p242_p3, %s596_s22), 1  ;;  %vm268_vm1 = vcmask 31744   ;;  %v535_v25 = vld [vmem:[%s753_s5 + $0x8] sm:$0xff] }
   0xc   : > { %628 = vmatprep.subr.msk.mxu0 %vm275_vm0, %v267_v0  ;;  %v438_v2 = vld [vmem:[%s751_s3] sm:$0xf]  ;;  %s617_s29 = sshll.u32 %s756_s22, 4  ;;  %vm538_vm4 = vcmask 261120  }
   0xd   : > { %v266_v3 = vld [vmem:[%s749_s1] sm:$0xf]  ;;  %629 = vmatpush3.msk.msra.mxu0 %vm275_vm0, %v267_v0  ;;  %v257_v4 = vshrl.u32 %v256_v1, 7  ;;  %s246_s8 = scalar_lea.vmem %s748_s0, %s617_s29  ;;  %s251_s15 = scalar_lea.vmem %s754_s6, %s617_s29 }
   0xe   : > { %633 = vmatprep.subr.msk.mxu1 %vm275_vm0, %v266_v3  ;;  %638 = vmatprep.subr.msk.mxu0 %vm275_vm0, %v438_v2  ;;  %v252_v5 = vld [vmem:[%s246_s8] sm:$0xff]  ;;  %v253_v6 = vld [vmem:[%s246_s8 + $0x8] sm:$0xff] }
   0xf   : > { %634 = vmatpush3.msk.msra.mxu1 %vm275_vm0, %v266_v3  ;;  %vm258_vm2 = vcmp.lt.s32.totalorder %v257_v4, 1  ;;  %vm263_vm3 = vcmp.lt.s32.totalorder %v257_v4, 7  ;;  %v254_v7 = vrot.slane %v252_v5, 7  ;;  %v261_v8 = vrot.slane %v252_v5, 1  ;;  %630 = vmatprep.mubr.msk.f32.mxu0 %vm268_vm1, %v252_v5  ;;  %v614_v20 = vld [vmem:[%s752_s4] ss:$0 sm:$0xff] }
  0x10   : > { %v262_v9 = vrot.slane %v253_v6, 1  ;;  %v255_v10 = vrot.slane %v253_v6, 7  ;;  %631 = vmatmul.mubr.msk.f32.vlgmr.msra.gmra.mxu0 %vm268_vm1, %v253_v6  ;;  %v534_v28 = vld [vmem:[%s753_s5] sm:$0xff] }
  0x11   : > { %639 = vmatpush3.msk.msra.mxu0 %vm275_vm0, %v438_v2 }
  0x12   : > { %v260_v11 = vsel %vm258_vm2, %v255_v10, %v254_v7  ;;  %v259_v12 = vsel %vm258_vm2, %v254_v7, %v255_v10  ;;  %v264_v13 = vsel %vm263_vm3, %v261_v8, %v262_v9  ;;  %v265_v14 = vsel %vm263_vm3, %v262_v9, %v261_v8 }
  0x13   : > { %635 = vmatprep.mubr.msk.f32.mxu1 %vm268_vm1, %v260_v11  ;;  %640 = vmatprep.mubr.msk.f32.mxu0 %vm268_vm1, %v264_v13 }
  0x14   : > { %636 = vmatmul.mubr.msk.f32.vlgmr.msra.gmra.mxu1 %vm268_vm1, %v259_v12  ;;  %641 = vmatmul.mubr.msk.f32.vlgmr.msra.gmra.mxu0 %vm268_vm1, %v265_v14 }
  0xd0   : > { %v632_v15 = vpop.f32.mrf.mxu0 }
  0xd2   : > { %v345_v16 = vpop.f32.mrf.mxu0 }
  0xd4   : > { %v637_v17 = vpop.f32.mrf.mxu1  ;;  %v642_v19 = vpop.f32.mrf.mxu0 }
  0xd5   : > { %v435_v18 = vadd.f32 %v637_v17, %v632_v15 }
  0xd6   : > { %v429_v21 = vpop.f32.mrf.mxu1  ;;  %v514_v24 = vpop.f32.mrf.mxu0 }
  0xd7   : > { %v524_v22 = vadd.f32 %v642_v19, %v435_v18  ;;  %v430_v23 = vadd.f32 %v429_v21, %v345_v16 }
  0xd9   : > { %v533_v26 = vadd.f32 %v614_v20, %v524_v22  ;;  %v523_v27 = vadd.f32 %v514_v24, %v430_v23 }
  0xdb   : > { %v537_v29 = vadd.f32 %v535_v25, %v533_v26  ;;  %v532_v30 = vadd.f32 %v614_v20, %v523_v27 }
  0xdd   : > { %540 = vst.msk [vmem:[%s251_s15 + $0x8] sm:$0xff] %vm538_vm4, %v537_v29  ;;  %v536_v31 = vadd.f32 %v534_v28, %v532_v30 }
  0xdf   : > { %539 = vst.msk [vmem:[%s251_s15] sm:$0xff] %vm538_vm4, %v536_v31 }
  0xe0 PF: > { %s16_s21 = sadd.s32 1, %s657_s21  }
  0xe1   : > { %p13_p4 = scmp.ge.s32.totalorder %s16_s21, 4  }
  0xe3   :  { %15 = sbr.rel (!%p13_p4) target bundleno = 1 (0x1), region = 74 }

// kernel: informer_forward.25
= control target key start
LH: loop header
LB: loop body
LE: loop exit
PB: predicated region body
PF: predicated region fallthrough
CT: control target
= control target key end

     0   :  { %vm61_vm0 = vcmask 261120   ;;  %s335_s1 = inlined_call_operand.vmem [shape: bf16[32,32], index: 1, kind: input, shape index: {}]   ;;  %s336_s0 = inlined_call_operand.vmem [shape: bf16[32,32], index: 0, kind: input, shape index: {}]   ;;  %s337_s2 = inlined_call_operand.vmem [shape: f32[1,32], index: 2, kind: input, shape index: {}]   ;;  %s338_s3 = inlined_call_operand.vmem [shape: f32[32,32], index: 3, kind: input, shape index: {}]   ;;  %s339_s4 = inlined_call_operand.vmem [shape: f32[1,32], index: 4, kind: input, shape index: {}]   ;;  %s340_s5 = inlined_call_operand.vmem [shape: f32[1,32], index: 5, kind: input, shape index: {}]   ;;  %s341_s6 = inlined_call_operand.vmem [shape: f32[32,32], index: 6, kind: output, shape index: {}]  }
   0x1   :  { %v229_v0 = vld [vmem:[%s335_s1 + $0x8] sm:$0xff]   ;;  %v230_v1 = vld [vmem:[%s335_s1] sm:$0xff]   ;;  %v119_v6 = vld [vmem:[%s338_s3 + $0x10] sm:$0xff] }
   0x2   :  { %221 = vmatprep.subr.bf16.mxu0 %v229_v0  ;;  %v231_v2 = vld [vmem:[%s336_s0] sm:$0xff]   ;;  %v232_v3 = vld [vmem:[%s336_s0 + $0x8] sm:$0xff]   ;;  %v120_v13 = vld [vmem:[%s338_s3 + $0x18] sm:$0xff] }
   0x3   :  { %222 = vmatpush3.bf16.msra.mxu0 %v229_v0  ;;  %225 = vmatprep.mubr.msk.bf16.mxu0 %vm61_vm0, %v231_v2  ;;  %v208_v4 = vld [vmem:[%s337_s2] ss:$0 sm:$0xff]  ;;  %v118_v18 = vld [vmem:[%s338_s3 + $0x8] sm:$0xff] }
   0x4   :  { %223 = vmatprep.subr.bf16.mxu0 %v230_v1  ;;  %v117_v9 = vld [vmem:[%s338_s3] sm:$0xff] }
   0x5   :  { %v215_v58 = vld [vmem:[%s339_s4] ss:$0 sm:$0xff] }
   0x6   :  { %v216_v60 = vld [vmem:[%s340_s5] ss:$0 sm:$0xff] }
   0x7   :  { %224 = vmatpush3.bf16.msra.mxu0 %v230_v1 }
   0xa   :  { %226 = vmatmul.mubr.msk.bf16.vlgmr.msra.gmra.mxu0 %vm61_vm0, %v232_v3 }
  0xca   :  { %v227_v5 = vpop.f32.mrf.mxu0 }
  0xcb   :  { %v111_v7 = vadd.f32 %v227_v5, %v208_v4 }
  0xcc   :  { %v102_v8 = vpop.f32.mrf.mxu0 }
  0xcd   :  { %v103_v10 = vadd.f32 %v208_v4, %v102_v8  ;;  %v123_v11 = vadd.f32 %v119_v6, %v111_v7 }
  0xce   :  { %v228_v12 = vpop.f32.mrf.mxu0 }
  0xcf   :  { %v114_v14 = vadd.f32 %v228_v12, %v208_v4  ;;  %v131_v15 = vsel %vm61_vm0, %v123_v11, 0.0  ;;  %v121_v16 = vadd.f32 %v117_v9, %v103_v10 }
  0xd0   :  { %132 = vadd.xlane.f32.xlu1 %v131_v15  ;;  %v105_v17 = vpop.f32.mrf.mxu0 }
  0xd1   :  { %v106_v19 = vadd.f32 %v208_v4, %v105_v17  ;;  %v125_v20 = vsel %vm61_vm0, %v121_v16, 0.0  ;;  %v124_v21 = vadd.f32 %v120_v13, %v114_v14 }
  0xd2   :  { %126 = vadd.xlane.f32.xlu0 %v125_v20 }
  0xd3   :  { %v134_v22 = vsel %vm61_vm0, %v124_v21, 0.0  ;;  %v122_v23 = vadd.f32 %v118_v18, %v106_v19 }
  0xd4   :  { %135 = vadd.xlane.f32.xlu1 %v134_v22 }
  0xd5   :  { %v128_v24 = vsel %vm61_vm0, %v122_v23, 0.0 }
  0xd6   :  { %129 = vadd.xlane.f32.xlu0 %v128_v24 }
 0x159   :  { %v133_v25 = vpop.xlane.xlu1 %132 }
 0x15a   :  { %v140_v26 = vmul.f32 0.03125, %v133_v25 }
 0x15b   :  { %v127_v27 = vpop.xlane.xlu0 %126 }
 0x15c   :  { %v138_v28 = vmul.f32 0.03125, %v127_v27  ;;  %v144_v30 = vsub.f32 %v123_v11, %v140_v26 }
 0x15d   :  { %v136_v29 = vpop.xlane.xlu1 %135 }
 0x15e   :  { %v142_v31 = vsub.f32 %v121_v16, %v138_v28  ;;  %v141_v32 = vmul.f32 0.03125, %v136_v29  ;;  %v148_v39 = vmul.f32 %v144_v30, %v144_v30 }
 0x15f   :  { %v130_v33 = vpop.xlane.xlu0 %129 }
 0x160   :  { %v139_v34 = vmul.f32 0.03125, %v130_v33  ;;  %v146_v35 = vmul.f32 %v142_v31, %v142_v31  ;;  %v145_v36 = vsub.f32 %v124_v21, %v141_v32  ;;  %v156_v41 = vsel %vm61_vm0, %v148_v39, 0.0 }
 0x162   :  { %v143_v37 = vsub.f32 %v122_v23, %v139_v34  ;;  %v150_v38 = vsel %vm61_vm0, %v146_v35, 0.0  ;;  %v149_v43 = vmul.f32 %v145_v36, %v145_v36 }
 0x163   :  { %151 = vadd.xlane.f32.xlu0 %v150_v38 }
 0x164   :  { %v147_v40 = vmul.f32 %v143_v37, %v143_v37  ;;  %v159_v44 = vsel %vm61_vm0, %v149_v43, 0.0 }
 0x166   :  { %v153_v42 = vsel %vm61_vm0, %v147_v40, 0.0 }
 0x167   :  { %157 = vadd.xlane.f32.xlu0 %v156_v41  ;;  %154 = vadd.xlane.f32.xlu1 %v153_v42 }
 0x16b   :  { %160 = vadd.xlane.f32.xlu1 %v159_v44 }
 0x1ec   :  { %v152_v45 = vpop.xlane.xlu0 %151 }
 0x1ed   :  { %v162_v46 = vmul.f32 0.03125, %v152_v45 }
 0x1ef   :  { %v166_v47 = vadd.f32 1e-05, %v162_v46 }
 0x1f0   :  { %v155_v48 = vpop.xlane.xlu1 %154  ;;  %v158_v49 = vpop.xlane.xlu0 %157 }
 0x1f1   :  { %233 = vrsqrt.f32 %v166_v47  ;;  %v163_v50 = vmul.f32 0.03125, %v155_v48  ;;  %v164_v51 = vmul.f32 0.03125, %v158_v49 }
 0x1f3   :  { %v167_v52 = vadd.f32 1e-05, %v163_v50  ;;  %v168_v53 = vadd.f32 1e-05, %v164_v51 }
 0x1f4   :  { %v161_v54 = vpop.xlane.xlu1 %160 }
 0x1f5   :  { %235 = vrsqrt.f32 %v167_v52  ;;  %v165_v55 = vmul.f32 0.03125, %v161_v54 }
 0x1f6   :  { %237 = vrsqrt.f32 %v168_v53 }
 0x1f7   :  { %v169_v56 = vadd.f32 1e-05, %v165_v55 }
 0x1f9   :  { %239 = vrsqrt.f32 %v169_v56 }
 0x1fe   :  { %v234_v57 = vpop.eup %233 }
 0x1ff   :  { %v174_v59 = vmul.f32 %v234_v57, %v142_v31 }
 0x201   :  { %v185_v61 = vmul.f32 %v215_v58, %v174_v59 }
 0x202   :  { %v236_v62 = vpop.eup %235 }
 0x203   :  { %v238_v63 = vpop.eup %237  ;;  %v196_v0 = vadd.f32 %v216_v60, %v185_v61  ;;  %v175_v1 = vmul.f32 %v236_v62, %v143_v37 }
 0x204   :  { %v176_v2 = vmul.f32 %v238_v63, %v144_v30 }
 0x205   :  { %200 = vst.msk [vmem:[%s341_s6] sm:$0xff] %vm61_vm0, %v196_v0  ;;  %v186_v3 = vmul.f32 %v215_v58, %v175_v1 }
 0x206   :  { %v240_v4 = vpop.eup %239  ;;  %v187_v5 = vmul.f32 %v215_v58, %v176_v2 }
 0x207   :  { %v197_v6 = vadd.f32 %v216_v60, %v186_v3  ;;  %v177_v7 = vmul.f32 %v240_v4, %v145_v36 }
 0x208   :  { %v198_v8 = vadd.f32 %v216_v60, %v187_v5 }
 0x209   :  { %201 = vst.msk [vmem:[%s341_s6 + $0x8] sm:$0xff] %vm61_vm0, %v197_v6  ;;  %v188_v9 = vmul.f32 %v215_v58, %v177_v7 }
 0x20a   :  { %202 = vst.msk [vmem:[%s341_s6 + $0x10] sm:$0xff] %vm61_vm0, %v198_v8 }
 0x20b   :  { %v199_v10 = vadd.f32 %v216_v60, %v188_v9 }
 0x20d   :  { %203 = vst.msk [vmem:[%s341_s6 + $0x18] sm:$0xff] %vm61_vm0, %v199_v10 }

// kernel: informer_forward.24
= control target key start
LH: loop header
LB: loop body
LE: loop exit
PB: predicated region body
PF: predicated region fallthrough
CT: control target
= control target key end

     0   :  { %s1053_s12 = smov 0   ;;  %s1159_s0 = inlined_call_operand.vmem [shape: bf16[2,16,32], index: 0, kind: input, shape index: {}]   ;;  %s1160_s1 = inlined_call_operand.vmem [shape: bf16[2,16,32], index: 1, kind: input, shape index: {}]   ;;  %s1161_s2 = inlined_call_operand.vmem [shape: bf16[2,16,32], index: 2, kind: input, shape index: {}]   ;;  %s1162_s3 = inlined_call_operand.vmem [shape: bf16[2,16,32], index: 3, kind: output, shape index: {}]  }
   0x1 LB: > { %s856_s13 = sadd.s32 4294967295, %s1023_s12   ;;  %p860_p0 = scmp.ge.s32.totalorder %s1023_s12, 1  ;;  %s1023_s12 = sphi %s1053_s12, %s13_s12  }
   0x2   : > { %p157_p1 = scmp.lt.s32.totalorder %s1023_s12, 3 }
   0x4   : > { %p158_p2 = pnand %p860_p0, %p157_p1 }
   0x5   : > { %p191_p3 = scmp.lt.s32.totalorder (!%p158_p2), %s856_s13, 1  ;;  %s1027_s21 = smov (!%p158_p2), 120  }
   0x6   : > { %161 = sbr.rel (%p158_p2) target bundleno = 1433 (0x599), region = 32  ;;  %s1028_s22 = smov (!%p158_p2), 104  }
   0x7   : > { %s1029_s26 = smov (!%p158_p2), 112   ;;  %s1030_s30 = smov (!%p158_p2), 8  }
   0x8   : > { %s1031_s4 = smov (!%p158_p2), 16   ;;  %s1032_s5 = smov (!%p158_p2), 24  }
   0xb   : > { %v1025_v0 = vmov 0.0   ;;  %vm1026_vm0 = vmmov 0   ;;  %s1164_s13 = smov (!%p191_p3, %s856_s13), 1  ;;  %vm228_vm1 = vcmask 64512   ;;  %vm278_vm2 = vcmask 130048  }
   0xc   : > { %918 = vmatprep.subr.bf16.mxu0 %v1025_v0  ;;  %920 = vmatprep.mubr.msk.bf16.mxu0 %vm1026_vm0, %v1025_v0  ;;  %s1067_s14 = sshll.u32 %s1164_s13, 3  ;;  %vm360_vm3 = vcmask 60416   ;;  %vm498_vm4 = vcmask 126016   ;;  %vm636_vm5 = vcmask 191616   ;;  %vm774_vm6 = vcmask 257216  }
   0xd   : > { %924 = vmatprep.subr.bf16.mxu1 %v1025_v0  ;;  %926 = vmatprep.mubr.msk.bf16.mxu1 %vm1026_vm0, %v1025_v0  ;;  %s200_s17 = scalar_lea.vmem %s1160_s1, %s1067_s14  ;;  %s195_s20 = scalar_lea.vmem %s1159_s0, %s1067_s14 }
   0xe   : > { %v982_v1 = vld [vmem:[%s200_s17] sm:$0xff]   ;;  %s205_s25 = scalar_lea.vmem %s1161_s2, %s1067_s14  ;;  %s1119_s29 = scalar_lea.vmem %s1162_s3, %s1067_s14 }
   0xf   : > { %v233_v2 = vsel %vm228_vm1, %v982_v1, 0  ;;  %v983_v3 = vld [vmem:[%s195_s20] sm:$0xff]  }
  0x10   : > { %919 = vmatpush3.bf16.xpose.msra.mxu0 %v233_v2  ;;  %v1092_v22 = vld [vmem:[%s205_s25] sm:$0xff]  }
  0x11   : > { %936 = vmatprep.subr.bf16.mxu0 %v1025_v0  ;;  %925 = vmatpush3.bf16.msra.mxu1 %v1092_v22 }
  0x12   : > { %930 = vmatprep.subr.bf16.mxu1 %v1025_v0 }
  0x17   : > { %921 = vmatmul.mubr.msk.bf16.vlgmr.msra.gmra.mxu0 %vm228_vm1, %v983_v3 }
  0x18   : > { %938 = vmatprep.mubr.msk.bf16.mxu0 %vm1026_vm0, %v1025_v0 }
  0xd7   : > { %v269_v4 = vpop.f32.mrf.mxu0 }
  0xd8   : > { %v276_v5 = vmul.f32 0.35355338, %v269_v4 }
  0xd9   : > { %v922_v6 = vpop.f32.mrf.mxu0 }
  0xda   : > { %v279_v7 = vsel %vm278_vm2, %v276_v5, -inf }
  0xdb   : > { %280 = vmax.xlane.f32.xlu0 %v279_v7  ;;  %v272_v8 = vpop.f32.mrf.mxu0 }
  0xdc   : > { %v277_v9 = vmul.f32 0.35355338, %v272_v8 }
  0xdd   : > { %v923_v10 = vpop.f32.mrf.mxu0 }
  0xde   : > { %v282_v11 = vsel %vm278_vm2, %v277_v9, -inf }
  0xdf   : > { %283 = vmax.xlane.f32.xlu0 %v282_v11 }
  0xf5   : > { %365 = vrot.lane.b32.xlu0 %v982_v1, %s1027_s21 }
  0xf9   : > { %641 = vrot.lane.b32.xlu0 %v982_v1, %s1028_s22 }
 0x164   : > { %v281_v12 = vpop.xlane.xlu0 %280 }
 0x165   : > { %v285_v13 = vsub.f32 %v276_v5, %v281_v12 }
 0x167   : > { %v287_v14 = vmul.f32 1.442695, %v285_v13 }
 0x168   : > { %v284_v15 = vpop.xlane.xlu0 %283 }
 0x169   : > { %985 = vpow2.f32 %v287_v14  ;;  %v286_v16 = vsub.f32 %v277_v9, %v284_v15 }
 0x16b   : > { %v289_v17 = vmul.f32 1.442695, %v286_v16 }
 0x16c   : > { %v366_v27 = vpop.permute.xlu0 %365 }
 0x16d   : > { %987 = vpow2.f32 %v289_v17  ;;  %v371_v31 = vsel %vm228_vm1, %v366_v27, 0 }
 0x170   : > { %v642_v35 = vpop.permute.xlu0 %641 }
 0x171   : > { %v647_v37 = vsel %vm228_vm1, %v642_v35, 0 }
 0x176   : > { %v986_v18 = vpop.eup %985 }
 0x177   : > { %v291_v19 = vsel %vm278_vm2, %v986_v18, 0.0 }
 0x178   : > { %292 = vadd.xlane.f32.xlu1 %v291_v19 }
 0x17a   : > { %v988_v20 = vpop.eup %987 }
 0x17b   : > { %v294_v21 = vsel %vm278_vm2, %v988_v20, 0.0 }
 0x17c   : > { %295 = vadd.xlane.f32.xlu1 %v294_v21 }
 0x18d   : > { %363 = vrot.lane.b32.xlu1 %v983_v3, %s1027_s21 }
 0x191   : > { %503 = vrot.lane.b32.xlu1 %v982_v1, %s1029_s26 }
 0x195   : > { %501 = vrot.lane.b32.xlu1 %v983_v3, %s1029_s26 }
 0x199   : > { %639 = vrot.lane.b32.xlu1 %v983_v3, %s1028_s22 }
 0x201   : > { %v293_v23 = vpop.xlane.xlu1 %292 }
 0x202   : > { %989 = vrcp.f32 %v293_v23 }
 0x205   : > { %v296_v24 = vpop.xlane.xlu1 %295 }
 0x206   : > { %991 = vrcp.f32 %v296_v24 }
 0x209   : > { %v364_v30 = vpop.permute.xlu1 %363 }
 0x20d   : > { %v504_v33 = vpop.permute.xlu1 %503 }
 0x20e   : > { %v509_v34 = vsel %vm228_vm1, %v504_v33, 0 }
 0x20f   : > { %v990_v25 = vpop.eup %989 }
 0x210   : > { %v298_v28 = vmul.f32 %v990_v25, %v986_v18 }
 0x211   : > { %v502_v36 = vpop.permute.xlu1 %501 }
 0x213   : > { %v992_v26 = vpop.eup %991 }
 0x214   : > { %v300_v29 = vmul.f32 %v992_v26, %v988_v20 }
 0x215   : > { %v640_v38 = vpop.permute.xlu1 %639 }
 0x216   : > { %v301_v32 = vpack.c.bf16 %v300_v29, %v298_v28 }
 0x218   : > { %927 = vmatmul.mubr.msk.bf16.vlgmr.msra.gmra.mxu1 %vm278_vm2, %v301_v32 }
 0x219   : > { %931 = vmatpush3.bf16.xpose.msra.mxu1 %v371_v31  ;;  %932 = vmatprep.mubr.msk.bf16.mxu1 %vm1026_vm0, %v1025_v0 }
 0x21a   : > { %942 = vmatprep.subr.bf16.mxu1 %v1025_v0 }
 0x220   : > { %933 = vmatmul.mubr.msk.bf16.vlgmr.msra.gmra.mxu1 %vm228_vm1, %v364_v30 }
 0x221   : > { %943 = vmatpush3.bf16.xpose.msra.mxu1 %v509_v34  ;;  %944 = vmatprep.mubr.msk.bf16.mxu1 %vm1026_vm0, %v1025_v0 }
 0x222   : > { %954 = vmatprep.subr.bf16.mxu1 %v1025_v0 }
 0x228   : > { %945 = vmatmul.mubr.msk.bf16.vlgmr.msra.gmra.mxu1 %vm228_vm1, %v502_v36 }
 0x229   : > { %955 = vmatpush3.bf16.xpose.msra.mxu1 %v647_v37  ;;  %956 = vmatprep.mubr.msk.bf16.mxu1 %vm1026_vm0, %v1025_v0 }
 0x230   : > { %957 = vmatmul.mubr.msk.bf16.vlgmr.msra.gmra.mxu1 %vm228_vm1, %v640_v38 }
 0x2d8   : > { %v345_v39 = vpop.f32.mrf.mxu1 }
 0x2d9   : > { %v894_v40 = vpack.c.bf16 %v345_v39, %v345_v39 }
 0x2da   : > { %v928_v41 = vpop.f32.mrf.mxu1 }
 0x2db   : > { %361 = vst.msk [vmem:[%s1119_s29] sm:$0xf] %vm360_vm3, %v894_v40 }
 0x2dc   : > { %v348_v42 = vpop.f32.mrf.mxu1 }
 0x2dd   : > { %v895_v43 = vpack.c.bf16 %v348_v42, %v348_v42 }
 0x2de   : > { %v929_v44 = vpop.f32.mrf.mxu1 }
 0x2df   : > { %362 = vst.msk [vmem:[%s1119_s29 + $0x4] sm:$0xf] %vm360_vm3, %v895_v43 }
 0x2e0   : > { %v407_v45 = vpop.f32.mrf.mxu1 }
 0x2e1   : > { %v414_v46 = vmul.f32 0.35355338, %v407_v45 }
 0x2e2   : > { %v934_v47 = vpop.f32.mrf.mxu1 }
 0x2e3   : > { %v416_v48 = vsel %vm278_vm2, %v414_v46, -inf }
 0x2e4   : > { %417 = vmax.xlane.f32.xlu0 %v416_v48  ;;  %v410_v49 = vpop.f32.mrf.mxu1 }
 0x2e5   : > { %v415_v50 = vmul.f32 0.35355338, %v410_v49 }
 0x2e6   : > { %v935_v51 = vpop.f32.mrf.mxu1 }
 0x2e7   : > { %v419_v52 = vsel %vm278_vm2, %v415_v50, -inf }
 0x2e8   : > { %420 = vmax.xlane.f32.xlu1 %v419_v52  ;;  %v545_v53 = vpop.f32.mrf.mxu1 }
 0x2e9   : > { %v552_v54 = vmul.f32 0.35355338, %v545_v53 }
 0x2ea   : > { %v946_v55 = vpop.f32.mrf.mxu1 }
 0x2eb   : > { %v554_v56 = vsel %vm278_vm2, %v552_v54, -inf }
 0x2ec   : > { %555 = vmax.xlane.f32.xlu0 %v554_v56  ;;  %v548_v57 = vpop.f32.mrf.mxu1 }
 0x2ed   : > { %v553_v58 = vmul.f32 0.35355338, %v548_v57 }
 0x2ee   : > { %v947_v59 = vpop.f32.mrf.mxu1 }
 0x2ef   : > { %v557_v60 = vsel %vm278_vm2, %v553_v58, -inf }
 0x2f0   : > { %558 = vmax.xlane.f32.xlu0 %v557_v60  ;;  %v683_v61 = vpop.f32.mrf.mxu1 }
 0x2f1   : > { %v690_v62 = vmul.f32 0.35355338, %v683_v61 }
 0x2f2   : > { %v958_v63 = vpop.f32.mrf.mxu1 }
 0x2f3   : > { %v692_v1 = vsel %vm278_vm2, %v690_v62, -inf }
 0x2f4   : > { %693 = vmax.xlane.f32.xlu0 %v692_v1  ;;  %v686_v2 = vpop.f32.mrf.mxu1 }
 0x2f5   : > { %v691_v3 = vmul.f32 0.35355338, %v686_v2 }
 0x2f6   : > { %v959_v4 = vpop.f32.mrf.mxu1 }
 0x2f7   : > { %v695_v5 = vsel %vm278_vm2, %v691_v3, -inf }
 0x2f8   : > { %696 = vmax.xlane.f32.xlu1 %v695_v5 }
 0x36d   : > { %v418_v6 = vpop.xlane.xlu0 %417 }
 0x36e   : > { %v422_v7 = vsub.f32 %v414_v46, %v418_v6 }
 0x370   : > { %v424_v8 = vmul.f32 1.442695, %v422_v7 }
 0x371   : > { %v421_v9 = vpop.xlane.xlu1 %420 }
 0x372   : > { %993 = vpow2.f32 %v424_v8  ;;  %v423_v10 = vsub.f32 %v415_v50, %v421_v9 }
 0x374   : > { %v426_v11 = vmul.f32 1.442695, %v423_v10 }
 0x375   : > { %v556_v12 = vpop.xlane.xlu0 %555 }
 0x376   : > { %995 = vpow2.f32 %v426_v11  ;;  %v560_v13 = vsub.f32 %v552_v54, %v556_v12 }
 0x378   : > { %v562_v14 = vmul.f32 1.442695, %v560_v13 }
 0x379   : > { %v559_v15 = vpop.xlane.xlu0 %558 }
 0x37a   : > { %997 = vpow2.f32 %v562_v14  ;;  %v561_v16 = vsub.f32 %v553_v58, %v559_v15 }
 0x37c   : > { %v564_v17 = vmul.f32 1.442695, %v561_v16 }
 0x37d   : > { %v694_v18 = vpop.xlane.xlu0 %693 }
 0x37e   : > { %999 = vpow2.f32 %v564_v17  ;;  %v698_v19 = vsub.f32 %v690_v62, %v694_v18 }
 0x37f   : > { %v994_v20 = vpop.eup %993 }
 0x380   : > { %v700_v21 = vmul.f32 1.442695, %v698_v19  ;;  %v428_v23 = vsel %vm278_vm2, %v994_v20, 0.0 }
 0x381   : > { %429 = vadd.xlane.f32.xlu0 %v428_v23  ;;  %v697_v32 = vpop.xlane.xlu1 %696 }
 0x382   : > { %1001 = vpow2.f32 %v700_v21  ;;  %v699_v33 = vsub.f32 %v691_v3, %v697_v32 }
 0x383   : > { %v996_v24 = vpop.eup %995 }
 0x384   : > { %v431_v25 = vsel %vm278_vm2, %v996_v24, 0.0  ;;  %v702_v34 = vmul.f32 1.442695, %v699_v33 }
 0x385   : > { %432 = vadd.xlane.f32.xlu1 %v431_v25 }
 0x386   : > { %1003 = vpow2.f32 %v702_v34 }
 0x387   : > { %v998_v26 = vpop.eup %997 }
 0x388   : > { %v566_v27 = vsel %vm278_vm2, %v998_v26, 0.0 }
 0x389   : > { %567 = vadd.xlane.f32.xlu0 %v566_v27 }
 0x38b   : > { %v1000_v28 = vpop.eup %999 }
 0x38c   : > { %v569_v29 = vsel %vm278_vm2, %v1000_v28, 0.0 }
 0x38d   : > { %570 = vadd.xlane.f32.xlu1 %v569_v29 }
 0x38f   : > { %v1002_v30 = vpop.eup %1001 }
 0x390   : > { %v704_v31 = vsel %vm278_vm2, %v1002_v30, 0.0 }
 0x391   : > { %705 = vadd.xlane.f32.xlu0 %v704_v31 }
 0x393   : > { %v1004_v35 = vpop.eup %1003 }
 0x394   : > { %v707_v36 = vsel %vm278_vm2, %v1004_v35, 0.0 }
 0x39e   : > { %577 = vrot.lane.b32.xlu1 %v1092_v22, %s1029_s26 }
 0x3a7   : > { %439 = vrot.lane.b32.xlu0 %v1092_v22, %s1027_s21 }
 0x3c2   : > { %708 = vadd.xlane.f32.xlu1 %v707_v36 }
 0x3d3   : > { %715 = vrot.lane.b32.xlu1 %v1092_v22, %s1028_s22 }
 0x40a   : > { %v430_v37 = vpop.xlane.xlu0 %429 }
 0x40b   : > { %1005 = vrcp.f32 %v430_v37 }
 0x40e   : > { %v433_v38 = vpop.xlane.xlu1 %432 }
 0x40f   : > { %1007 = vrcp.f32 %v433_v38 }
 0x412   : > { %v568_v39 = vpop.xlane.xlu0 %567 }
 0x413   : > { %1009 = vrcp.f32 %v568_v39 }
 0x416   : > { %v571_v40 = vpop.xlane.xlu1 %570 }
 0x417   : > { %1011 = vrcp.f32 %v571_v40 }
 0x418   : > { %v1006_v41 = vpop.eup %1005 }
 0x419   : > { %v435_v44 = vmul.f32 %v1006_v41, %v994_v20 }
 0x41a   : > { %v706_v42 = vpop.xlane.xlu0 %705  ;;  %v578_v22 = vpop.permute.xlu1 %577 }
 0x41b   : > { %1013 = vrcp.f32 %v706_v42 }
 0x41c   : > { %v1008_v43 = vpop.eup %1007 }
 0x41d   : > { %v437_v45 = vmul.f32 %v1008_v43, %v996_v24 }
 0x41e   : > { %v440_v46 = vpop.permute.xlu0 %439 }
 0x41f   : > { %937 = vmatpush3.bf16.msra.mxu0 %v440_v46  ;;  %v438_v47 = vpack.c.bf16 %v437_v45, %v435_v44 }
 0x420   : > { %948 = vmatprep.subr.bf16.mxu0 %v1025_v0  ;;  %v1010_v48 = vpop.eup %1009 }
 0x421   : > { %v573_v50 = vmul.f32 %v1010_v48, %v998_v26 }
 0x422   : > { %939 = vmatmul.mubr.msk.bf16.vlgmr.msra.gmra.mxu0 %vm278_vm2, %v438_v47 }
 0x423   : > { %949 = vmatpush3.bf16.msra.mxu0 %v578_v22  ;;  %950 = vmatprep.mubr.msk.bf16.mxu0 %vm1026_vm0, %v1025_v0 }
 0x424   : > { %v1012_v49 = vpop.eup %1011  ;;  %960 = vmatprep.subr.bf16.mxu0 %v1025_v0 }
 0x425   : > { %v575_v51 = vmul.f32 %v1012_v49, %v1000_v28 }
 0x427   : > { %v576_v52 = vpack.c.bf16 %v575_v51, %v573_v50 }
 0x428   : > { %v1014_v55 = vpop.eup %1013 }
 0x429   : > { %v711_v57 = vmul.f32 %v1014_v55, %v1002_v30 }
 0x42a   : > { %951 = vmatmul.mubr.msk.bf16.vlgmr.msra.gmra.mxu0 %vm278_vm2, %v576_v52 }
 0x42b   : > { %962 = vmatprep.mubr.msk.bf16.mxu0 %vm1026_vm0, %v1025_v0 }
 0x44b   : > { %v709_v53 = vpop.xlane.xlu1 %708 }
 0x44c   : > { %1015 = vrcp.f32 %v709_v53 }
 0x44f   : > { %v716_v54 = vpop.permute.xlu1 %715 }
 0x450   : > { %961 = vmatpush3.bf16.msra.mxu0 %v716_v54 }
 0x459   : > { %v1016_v56 = vpop.eup %1015 }
 0x45a   : > { %v713_v58 = vmul.f32 %v1016_v56, %v1004_v35 }
 0x45c   : > { %v714_v59 = vpack.c.bf16 %v713_v58, %v711_v57 }
 0x45e   : > { %963 = vmatmul.mubr.msk.bf16.vlgmr.msra.gmra.mxu0 %vm278_vm2, %v714_v59 }
 0x4e2   : > { %v479_v60 = vpop.f32.mrf.mxu0 }
 0x4e3   : > { %v896_v61 = vpack.c.bf16 %v479_v60, %v479_v60 }
 0x4e4   : > { %v940_v62 = vpop.f32.mrf.mxu0 }
 0x4e5   : > { %492 = vrot.lane.b32.xlu1 %v896_v61, %s1030_s30 }
 0x4e6   : > { %v482_v63 = vpop.f32.mrf.mxu0 }
 0x4e7   : > { %v897_v1 = vpack.c.bf16 %v482_v63, %v482_v63 }
 0x4e8   : > { %v941_v0 = vpop.f32.mrf.mxu0 }
 0x4e9   : > { %494 = vrot.lane.b32.xlu0 %v897_v1, %s1030_s30 }
 0x4ea   : > { %v617_v2 = vpop.f32.mrf.mxu0 }
 0x4eb   : > { %v898_v3 = vpack.c.bf16 %v617_v2, %v617_v2 }
 0x4ec   : > { %v952_v4 = vpop.f32.mrf.mxu0 }
 0x4ed   : > { %630 = vrot.lane.b32.xlu1 %v898_v3, %s1031_s4 }
 0x4ee   : > { %v620_v5 = vpop.f32.mrf.mxu0 }
 0x4ef   : > { %v899_v6 = vpack.c.bf16 %v620_v5, %v620_v5 }
 0x4f0   : > { %v953_v7 = vpop.f32.mrf.mxu0 }
 0x4f1   : > { %632 = vrot.lane.b32.xlu0 %v899_v6, %s1031_s4 }
 0x51e   : > { %v755_v8 = vpop.f32.mrf.mxu0 }
 0x51f   : > { %v900_v9 = vpack.c.bf16 %v755_v8, %v755_v8 }
 0x520   : > { %v964_v10 = vpop.f32.mrf.mxu0 }
 0x521   : > { %768 = vrot.lane.b32.xlu1 %v900_v9, %s1032_s5 }
 0x522   : > { %v758_v11 = vpop.f32.mrf.mxu0 }
 0x523   : > { %v901_v12 = vpack.c.bf16 %v758_v11, %v758_v11 }
 0x524   : > { %v965_v13 = vpop.f32.mrf.mxu0 }
 0x525   : > { %770 = vrot.lane.b32.xlu0 %v901_v12, %s1032_s5 }
 0x557   : > { %v493_v14 = vpop.permute.xlu1 %492 }
 0x558   : > { %499 = vst.msk [vmem:[%s1119_s29] sm:$0xf] %vm498_vm4, %v493_v14 }
 0x55b   : > { %v495_v15 = vpop.permute.xlu0 %494 }
 0x55c   : > { %500 = vst.msk [vmem:[%s1119_s29 + $0x4] sm:$0xf] %vm498_vm4, %v495_v15 }
 0x55f   : > { %v631_v16 = vpop.permute.xlu1 %630 }
 0x560   : > { %637 = vst.msk [vmem:[%s1119_s29] sm:$0xf] %vm636_vm5, %v631_v16 }
 0x563   : > { %v633_v17 = vpop.permute.xlu0 %632 }
 0x564   : > { %638 = vst.msk [vmem:[%s1119_s29 + $0x4] sm:$0xf] %vm636_vm5, %v633_v17 }
 0x593   : > { %v769_v18 = vpop.permute.xlu1 %768 }
 0x594   : > { %775 = vst.msk [vmem:[%s1119_s29] sm:$0xf] %vm774_vm6, %v769_v18 }
 0x597   : > { %v771_v19 = vpop.permute.xlu0 %770 }
 0x598   : > { %776 = vst.msk [vmem:[%s1119_s29 + $0x4] sm:$0xf] %vm774_vm6, %v771_v19 }
 0x599 PF: > { %s13_s12 = sadd.s32 1, %s1023_s12  }
 0x59a   : > { %p10_p4 = scmp.ge.s32.totalorder %s13_s12, 4  }
 0x59c   :  { %12 = sbr.rel (!%p10_p4) target bundleno = 1 (0x1), region = 68 }

// kernel: informer_forward.26
= control target key start
LH: loop header
LB: loop body
LE: loop exit
PB: predicated region body
PF: predicated region fallthrough
CT: control target
= control target key end

     0   :  { %vm56_vm0 = vcmask 261120   ;;  %s471_s1 = inlined_call_operand.vmem [shape: bf16[32,32], index: 1, kind: input, shape index: {}]   ;;  %s472_s0 = inlined_call_operand.vmem [shape: f32[32,32], index: 0, kind: input, shape index: {}]   ;;  %s473_s3 = inlined_call_operand.vmem [shape: bf16[32,32], index: 3, kind: input, shape index: {}]   ;;  %s474_s2 = inlined_call_operand.vmem [shape: f32[1,32], index: 2, kind: input, shape index: {}]   ;;  %s475_s4 = inlined_call_operand.vmem [shape: f32[1,32], index: 4, kind: input, shape index: {}]   ;;  %s476_s5 = inlined_call_operand.vmem [shape: f32[1,32], index: 5, kind: input, shape index: {}]   ;;  %s477_s6 = inlined_call_operand.vmem [shape: f32[1,32], index: 6, kind: input, shape index: {}]   ;;  %s478_s7 = inlined_call_operand.vmem [shape: f32[32,32], index: 7, kind: output, shape index: {}]  }
   0x1   :  { %v335_v0 = vld [vmem:[%s471_s1 + $0x8] sm:$0xff]   ;;  %v336_v1 = vld [vmem:[%s471_s1] sm:$0xff]   ;;  %v29_v5 = vld [vmem:[%s472_s0 + $0x10] sm:$0xff] }
   0x2   :  { %319 = vmatprep.subr.bf16.mxu0 %v335_v0  ;;  %v404_v2 = vld [vmem:[%s472_s0] sm:$0xff]  ;;  %v409_v3 = vld [vmem:[%s472_s0 + $0x8] sm:$0xff]  ;;  %v419_v6 = vld [vmem:[%s472_s0 + $0x18] sm:$0xff] }
   0x3   :  { %320 = vmatpush3.bf16.msra.mxu0 %v335_v0  ;;  %v31_v4 = vpack.c.bf16 %v409_v3, %v404_v2  ;;  %v32_v7 = vpack.c.bf16 %v419_v6, %v29_v5  ;;  %v337_v8 = vld [vmem:[%s473_s3 + $0x8] sm:$0xff]   ;;  %v338_v9 = vld [vmem:[%s473_s3] sm:$0xff]  }
   0x4   :  { %321 = vmatprep.subr.bf16.mxu0 %v336_v1  ;;  %327 = vmatprep.subr.bf16.mxu1 %v337_v8  ;;  %v299_v10 = vld [vmem:[%s474_s2] ss:$0 sm:$0xff] }
   0x5   :  { %323 = vmatprep.mubr.msk.bf16.mxu0 %vm56_vm0, %v31_v4  ;;  %328 = vmatpush3.bf16.msra.mxu1 %v337_v8  ;;  %v304_v41 = vld [vmem:[%s475_s4] ss:$0 sm:$0xff] }
   0x6   :  { %329 = vmatprep.subr.bf16.mxu1 %v338_v9 }
   0x7   :  { %322 = vmatpush3.bf16.msra.mxu0 %v336_v1 }
   0x9   :  { %330 = vmatpush3.bf16.msra.mxu1 %v338_v9 }
   0xa   :  { %324 = vmatmul.mubr.msk.bf16.vlgmr.msra.gmra.mxu0 %vm56_vm0, %v32_v7 }
  0xca   :  { %v325_v11 = vpop.f32.mrf.mxu0 }
  0xcb   :  { %v106_v12 = vadd.f32 %v325_v11, %v299_v10 }
  0xcc   :  { %v97_v13 = vpop.f32.mrf.mxu0 }
  0xcd   :  { %v98_v14 = vadd.f32 %v299_v10, %v97_v13  ;;  %v118_v15 = vmul.f32 0.70710677, %v106_v12  ;;  %v114_v34 = vmul.f32 0.5, %v106_v12 }
  0xce   :  { %v326_v16 = vpop.f32.mrf.mxu0 }
  0xcf   :  { %v116_v17 = vmul.f32 0.70710677, %v98_v14  ;;  %v109_v18 = vadd.f32 %v326_v16, %v299_v10  ;;  %v112_v31 = vmul.f32 0.5, %v98_v14 }
  0xd0   :  { %v100_v19 = vpop.f32.mrf.mxu0 }
  0xd1   :  { %339 = verf.f32 %v116_v17  ;;  %v119_v20 = vmul.f32 0.70710677, %v109_v18  ;;  %v101_v21 = vadd.f32 %v299_v10, %v100_v19  ;;  %v115_v30 = vmul.f32 0.5, %v109_v18 }
  0xd2   :  { %341 = verf.f32 %v118_v15 }
  0xd3   :  { %343 = verf.f32 %v119_v20  ;;  %v117_v22 = vmul.f32 0.70710677, %v101_v21  ;;  %v113_v32 = vmul.f32 0.5, %v101_v21 }
  0xd5   :  { %345 = verf.f32 %v117_v22 }
  0xde   :  { %v340_v23 = vpop.eup %339 }
  0xdf   :  { %v342_v24 = vpop.eup %341  ;;  %v124_v27 = vadd.f32 1.0, %v340_v23 }
  0xe0   :  { %v344_v25 = vpop.eup %343  ;;  %v126_v29 = vadd.f32 1.0, %v342_v24 }
  0xe1   :  { %v127_v26 = vadd.f32 1.0, %v344_v25  ;;  %v128_v36 = vmul.f32 %v124_v27, %v112_v31  ;;  %v309_v27 = vld [vmem:[%s476_s5] ss:$0 sm:$0xff] }
  0xe2   :  { %v346_v28 = vpop.eup %345  ;;  %v130_v38 = vmul.f32 %v126_v29, %v114_v34  ;;  %v310_v29 = vld [vmem:[%s477_s6] ss:$0 sm:$0xff] }
  0xe3   :  { %v125_v33 = vadd.f32 1.0, %v346_v28  ;;  %v131_v35 = vmul.f32 %v127_v26, %v115_v30 }
  0xe5   :  { %v129_v37 = vmul.f32 %v125_v33, %v113_v32  ;;  %v133_v40 = vpack.c.bf16 %v131_v35, %v130_v38 }
  0xe7   :  { %v132_v39 = vpack.c.bf16 %v129_v37, %v128_v36 }
  0xe9   :  { %331 = vmatprep.mubr.msk.bf16.mxu1 %vm56_vm0, %v132_v39 }
  0xea   :  { %332 = vmatmul.mubr.msk.bf16.vlgmr.msra.gmra.mxu1 %vm56_vm0, %v133_v40 }
 0x1aa   :  { %v333_v42 = vpop.f32.mrf.mxu1 }
 0x1ab   :  { %v206_v43 = vadd.f32 %v333_v42, %v304_v41 }
 0x1ac   :  { %v197_v44 = vpop.f32.mrf.mxu1 }
 0x1ad   :  { %v198_v45 = vadd.f32 %v304_v41, %v197_v44  ;;  %v214_v46 = vadd.f32 %v206_v43, %v29_v5 }
 0x1ae   :  { %v334_v47 = vpop.f32.mrf.mxu1 }
 0x1af   :  { %v209_v48 = vadd.f32 %v334_v47, %v304_v41  ;;  %v222_v49 = vsel %vm56_vm0, %v214_v46, 0.0  ;;  %v212_v50 = vadd.f32 %v198_v45, %v404_v2 }
 0x1b0   :  { %223 = vadd.xlane.f32.xlu1 %v222_v49  ;;  %v200_v51 = vpop.f32.mrf.mxu1 }
 0x1b1   :  { %v201_v52 = vadd.f32 %v304_v41, %v200_v51  ;;  %v216_v53 = vsel %vm56_vm0, %v212_v50, 0.0  ;;  %v215_v54 = vadd.f32 %v209_v48, %v419_v6 }
 0x1b2   :  { %217 = vadd.xlane.f32.xlu0 %v216_v53 }
 0x1b3   :  { %v225_v55 = vsel %vm56_vm0, %v215_v54, 0.0  ;;  %v213_v56 = vadd.f32 %v201_v52, %v409_v3 }
 0x1b4   :  { %226 = vadd.xlane.f32.xlu1 %v225_v55 }
 0x1b5   :  { %v219_v57 = vsel %vm56_vm0, %v213_v56, 0.0 }
 0x1b6   :  { %220 = vadd.xlane.f32.xlu0 %v219_v57 }
 0x239   :  { %v224_v58 = vpop.xlane.xlu1 %223 }
 0x23a   :  { %v231_v59 = vmul.f32 0.03125, %v224_v58 }
 0x23b   :  { %v218_v60 = vpop.xlane.xlu0 %217 }
 0x23c   :  { %v229_v61 = vmul.f32 0.03125, %v218_v60  ;;  %v235_v63 = vsub.f32 %v214_v46, %v231_v59 }
 0x23d   :  { %v227_v62 = vpop.xlane.xlu1 %226 }
 0x23e   :  { %v233_v0 = vsub.f32 %v212_v50, %v229_v61  ;;  %v232_v1 = vmul.f32 0.03125, %v227_v62  ;;  %v239_v3 = vmul.f32 %v235_v63, %v235_v63 }
 0x23f   :  { %v221_v2 = vpop.xlane.xlu0 %220 }
 0x240   :  { %v230_v4 = vmul.f32 0.03125, %v221_v2  ;;  %v237_v5 = vmul.f32 %v233_v0, %v233_v0  ;;  %v236_v6 = vsub.f32 %v215_v54, %v232_v1  ;;  %v247_v10 = vsel %vm56_vm0, %v239_v3, 0.0 }
 0x242   :  { %v234_v7 = vsub.f32 %v213_v56, %v230_v4  ;;  %v241_v8 = vsel %vm56_vm0, %v237_v5, 0.0  ;;  %v240_v12 = vmul.f32 %v236_v6, %v236_v6 }
 0x243   :  { %242 = vadd.xlane.f32.xlu0 %v241_v8 }
 0x244   :  { %v238_v9 = vmul.f32 %v234_v7, %v234_v7  ;;  %v250_v13 = vsel %vm56_vm0, %v240_v12, 0.0 }
 0x246   :  { %v244_v11 = vsel %vm56_vm0, %v238_v9, 0.0 }
 0x247   :  { %248 = vadd.xlane.f32.xlu0 %v247_v10  ;;  %245 = vadd.xlane.f32.xlu1 %v244_v11 }
 0x24b   :  { %251 = vadd.xlane.f32.xlu1 %v250_v13 }
 0x2cc   :  { %v243_v14 = vpop.xlane.xlu0 %242 }
 0x2cd   :  { %v253_v15 = vmul.f32 0.03125, %v243_v14 }
 0x2cf   :  { %v257_v16 = vadd.f32 1e-05, %v253_v15 }
 0x2d0   :  { %v246_v17 = vpop.xlane.xlu1 %245  ;;  %v249_v18 = vpop.xlane.xlu0 %248 }
 0x2d1   :  { %347 = vrsqrt.f32 %v257_v16  ;;  %v254_v19 = vmul.f32 0.03125, %v246_v17  ;;  %v255_v20 = vmul.f32 0.03125, %v249_v18 }
 0x2d3   :  { %v258_v21 = vadd.f32 1e-05, %v254_v19  ;;  %v259_v22 = vadd.f32 1e-05, %v255_v20 }
 0x2d4   :  { %v252_v23 = vpop.xlane.xlu1 %251 }
 0x2d5   :  { %349 = vrsqrt.f32 %v258_v21  ;;  %v256_v24 = vmul.f32 0.03125, %v252_v23 }
 0x2d6   :  { %351 = vrsqrt.f32 %v259_v22 }
 0x2d7   :  { %v260_v25 = vadd.f32 1e-05, %v256_v24 }
 0x2d9   :  { %353 = vrsqrt.f32 %v260_v25 }
 0x2de   :  { %v348_v26 = vpop.eup %347 }
 0x2df   :  { %v265_v28 = vmul.f32 %v348_v26, %v233_v0 }
 0x2e1   :  { %v276_v30 = vmul.f32 %v309_v27, %v265_v28 }
 0x2e2   :  { %v350_v31 = vpop.eup %349 }
 0x2e3   :  { %v352_v32 = vpop.eup %351  ;;  %v287_v33 = vadd.f32 %v310_v29, %v276_v30  ;;  %v266_v34 = vmul.f32 %v350_v31, %v234_v7 }
 0x2e4   :  { %v267_v35 = vmul.f32 %v352_v32, %v235_v63 }
 0x2e5   :  { %291 = vst.msk [vmem:[%s478_s7] sm:$0xff] %vm56_vm0, %v287_v33  ;;  %v277_v36 = vmul.f32 %v309_v27, %v266_v34 }
 0x2e6   :  { %v354_v37 = vpop.eup %353  ;;  %v278_v38 = vmul.f32 %v309_v27, %v267_v35 }
 0x2e7   :  { %v288_v39 = vadd.f32 %v310_v29, %v277_v36  ;;  %v268_v40 = vmul.f32 %v354_v37, %v236_v6 }
 0x2e8   :  { %v289_v41 = vadd.f32 %v310_v29, %v278_v38 }
 0x2e9   :  { %292 = vst.msk [vmem:[%s478_s7 + $0x8] sm:$0xff] %vm56_vm0, %v288_v39  ;;  %v279_v42 = vmul.f32 %v309_v27, %v268_v40 }
 0x2ea   :  { %293 = vst.msk [vmem:[%s478_s7 + $0x10] sm:$0xff] %vm56_vm0, %v289_v41 }
 0x2eb   :  { %v290_v43 = vadd.f32 %v310_v29, %v279_v42 }
 0x2ed   :  { %294 = vst.msk [vmem:[%s478_s7 + $0x18] sm:$0xff] %vm56_vm0, %v290_v43 }

// kernel: informer_forward.27
= control target key start
LH: loop header
LB: loop body
LE: loop exit
PB: predicated region body
PF: predicated region fallthrough
CT: control target
= control target key end

     0   :  { %s680_s18 = smov 0   ;;  %s753_s0 = inlined_call_operand.vmem [shape: f32[2,16,32], index: 0, kind: input, shape index: {}]   ;;  %s754_s1 = inlined_call_operand.vmem [shape: f32[32,32], index: 1, kind: input, shape index: {}]   ;;  %s755_s2 = inlined_call_operand.vmem [shape: f32[32,32], index: 2, kind: input, shape index: {}]   ;;  %s756_s3 = inlined_call_operand.vmem [shape: f32[32,32], index: 3, kind: input, shape index: {}]   ;;  %s757_s4 = inlined_call_operand.vmem [shape: f32[1,32], index: 4, kind: input, shape index: {}]   ;;  %s758_s5 = inlined_call_operand.vmem [shape: f32[2,16,32], index: 5, kind: output, shape index: {}]  }
   0x1 LB: > { %s563_s19 = sadd.s32 4294967295, %s648_s18   ;;  %p567_p0 = scmp.ge.s32.totalorder %s648_s18, 1  ;;  %s648_s18 = sphi %s680_s18, %s15_s18  }
   0x2   : > { %p187_p1 = scmp.lt.s32.totalorder %s648_s18, 3 }
   0x4   : > { %p188_p2 = pnand %p567_p0, %p187_p1 }
   0x5   : > { %p215_p3 = scmp.lt.s32.totalorder (!%p188_p2), %s563_s19, 1 }
   0x6   : > { %191 = sbr.rel (%p188_p2) target bundleno = 229 (0xe5), region = 40 }
   0xb   : > { %v246_v0 = vld [vmem:[%s755_s2 + $0x18] sm:$0xff]  ;;  %v245_v1 = vld [vmem:[%s755_s2 + $0x10] sm:$0xff]  ;;  %v229_v3 = vlaneseq  ;;  %v244_v5 = vld [vmem:[%s755_s2 + $0x8] sm:$0xff]  ;;  %s760_s19 = smov (!%p215_p3, %s563_s19), 1  ;;  %vm247_vm0 = vcmask 261120  }
   0xc   : > { %v242_v2 = vld [vmem:[%s754_s1 + $0x18] sm:$0xff]  ;;  %601 = vmatprep.subr.mxu0 %v246_v0  ;;  %v241_v4 = vld [vmem:[%s754_s1 + $0x10] sm:$0xff]  ;;  %v240_v6 = vld [vmem:[%s754_s1 + $0x8] sm:$0xff]  ;;  %s581_s9 = sshll.u32 %s760_s19, 4 }
   0xd   : > { %612 = vmatprep.subr.mxu1 %v242_v2  ;;  %602 = vmatpush3.msra.mxu0 %v246_v0  ;;  %v230_v7 = vshrl.u32 %v229_v3, 7  ;;  %v243_v8 = vld [vmem:[%s755_s2] sm:$0xff]  ;;  %s219_s12 = scalar_lea.vmem %s753_s0, %s581_s9  ;;  %v413_v12 = vld [vmem:[%s756_s3 + $0x18] sm:$0xff]  ;;  %v412_v19 = vld [vmem:[%s756_s3 + $0x10] sm:$0xff]  ;;  %s224_s29 = scalar_lea.vmem %s758_s5, %s581_s9 }
   0xe   : > { %613 = vmatpush3.msra.mxu1 %v242_v2  ;;  %603 = vmatprep.subr.mxu0 %v245_v1  ;;  %v239_v9 = vld [vmem:[%s754_s1] sm:$0xff]  ;;  %v226_v11 = vld [vmem:[%s219_s12 + $0x8] sm:$0xff] }
   0xf   : > { %614 = vmatprep.subr.mxu1 %v241_v4  ;;  %604 = vmatpush3.msra.mxu0 %v245_v1  ;;  %v225_v10 = vld [vmem:[%s219_s12] sm:$0xff]  ;;  %vm231_vm1 = vcmp.lt.s32.totalorder %v230_v7, 1  ;;  %vm236_vm2 = vcmp.lt.s32.totalorder %v230_v7, 7  ;;  %v235_v15 = vrot.slane %v226_v11, 1  ;;  %v228_v16 = vrot.slane %v226_v11, 7  ;;  %v411_v21 = vld [vmem:[%s756_s3 + $0x8] sm:$0xff] }
  0x10   : > { %615 = vmatpush3.msra.mxu1 %v241_v4  ;;  %605 = vmatprep.subr.mxu0 %v244_v5  ;;  %v227_v13 = vrot.slane %v225_v10, 7  ;;  %v234_v14 = vrot.slane %v225_v10, 1  ;;  %v410_v22 = vld [vmem:[%s756_s3] sm:$0xff] }
  0x11   : > { %616 = vmatprep.subr.mxu1 %v240_v6  ;;  %606 = vmatpush3.msra.mxu0 %v244_v5  ;;  %v578_v30 = vld [vmem:[%s757_s4] ss:$0 sm:$0xff] }
  0x12   : > { %617 = vmatpush3.msra.mxu1 %v240_v6  ;;  %607 = vmatprep.subr.mxu0 %v243_v8  ;;  %v233_v17 = vsel %vm231_vm1, %v228_v16, %v227_v13  ;;  %v232_v18 = vsel %vm231_vm1, %v227_v13, %v228_v16  ;;  %v237_v20 = vsel %vm236_vm2, %v234_v14, %v235_v15 }
  0x13   : > { %609 = vmatprep.mubr.msk.f32.mxu0 %vm247_vm0, %v225_v10  ;;  %608 = vmatpush3.msra.mxu0 %v243_v8  ;;  %v238_v23 = vsel %vm236_vm2, %v235_v15, %v234_v14 }
  0x14   : > { %618 = vmatprep.subr.mxu1 %v239_v9  ;;  %610 = vmatmul.mubr.msk.f32.vlgmr.msra.gmra.mxu0 %vm247_vm0, %v226_v11 }
  0x15   : > { %623 = vmatprep.subr.mxu0 %v413_v12  ;;  %619 = vmatpush3.msra.mxu1 %v239_v9 }
  0x16   : > { %620 = vmatprep.mubr.msk.f32.mxu1 %vm247_vm0, %v233_v17  ;;  %624 = vmatpush3.msra.mxu0 %v413_v12 }
  0x17   : > { %621 = vmatmul.mubr.msk.f32.vlgmr.msra.gmra.mxu1 %vm247_vm0, %v232_v18  ;;  %625 = vmatprep.subr.mxu0 %v412_v19 }
  0x18   : > { %631 = vmatprep.mubr.msk.f32.mxu0 %vm247_vm0, %v237_v20  ;;  %626 = vmatpush3.msra.mxu0 %v412_v19 }
  0x19   : > { %627 = vmatprep.subr.mxu0 %v411_v21 }
  0x1a   : > { %628 = vmatpush3.msra.mxu0 %v411_v21 }
  0x1b   : > { %629 = vmatprep.subr.mxu0 %v410_v22 }
  0x1c   : > { %630 = vmatpush3.msra.mxu0 %v410_v22 }
  0x1d   : > { %632 = vmatmul.mubr.msk.f32.vlgmr.msra.gmra.mxu0 %vm247_vm0, %v238_v23 }
  0xd4   : > { %v611_v24 = vpop.f32.mrf.mxu0 }
  0xd6   : > { %v320_v26 = vpop.f32.mrf.mxu0 }
  0xd7   : > { %v622_v25 = vpop.f32.mrf.mxu1 }
  0xd8   : > { %v407_v28 = vadd.f32 %v622_v25, %v611_v24 }
  0xd9   : > { %v401_v27 = vpop.f32.mrf.mxu1 }
  0xda   : > { %v402_v31 = vadd.f32 %v401_v27, %v320_v26 }
  0xdd   : > { %v633_v29 = vpop.f32.mrf.mxu0 }
  0xde   : > { %v496_v32 = vadd.f32 %v633_v29, %v407_v28 }
  0xdf   : > { %v486_v33 = vpop.f32.mrf.mxu0 }
  0xe0   : > { %v505_v34 = vadd.f32 %v578_v30, %v496_v32  ;;  %v495_v35 = vadd.f32 %v486_v33, %v402_v31 }
  0xe2   : > { %507 = vst.msk [vmem:[%s224_s29 + $0x8] sm:$0xff] %vm247_vm0, %v505_v34  ;;  %v504_v36 = vadd.f32 %v578_v30, %v495_v35 }
  0xe4   : > { %506 = vst.msk [vmem:[%s224_s29] sm:$0xff] %vm247_vm0, %v504_v36 }
  0xe5 PF: > { %s15_s18 = sadd.s32 1, %s648_s18  }
  0xe6   : > { %p12_p4 = scmp.ge.s32.totalorder %s15_s18, 4  }
  0xe8   :  { %14 = sbr.rel (!%p12_p4) target bundleno = 1 (0x1), region = 70 }

// kernel: informer_forward.28
= control target key start
LH: loop header
LB: loop body
LE: loop exit
PB: predicated region body
PF: predicated region fallthrough
CT: control target
= control target key end

     0   :  { %v130_v0 = vmov 0.0   ;;  %vm131_vm0 = vmmov 0   ;;  %vm45_vm1 = vcmask 261120   ;;  %vm98_vm2 = vcmask 781312   ;;  %s170_s1 = inlined_call_operand.vmem [shape: bf16[32,96], index: 1, kind: input, shape index: {}]   ;;  %s171_s0 = inlined_call_operand.vmem [shape: bf16[16,32], index: 0, kind: input, shape index: {}]   ;;  %s172_s2 = inlined_call_operand.vmem [shape: f32[1,96], index: 2, kind: input, shape index: {}]   ;;  %s173_s3 = inlined_call_operand.vmem [shape: bf16[16,96], index: 3, kind: output, shape index: {}]  }
   0x1   :  { %117 = vmatprep.subr.bf16.mxu0 %v130_v0  ;;  %v127_v1 = vld [vmem:[%s170_s1 + $0x8] sm:$0xff]   ;;  %121 = vmatprep.mubr.msk.bf16.mxu0 %vm131_vm0, %v130_v0  ;;  %v128_v2 = vld [vmem:[%s170_s1] sm:$0xff]  }
   0x2   :  { %118 = vmatpush3.bf16.msra.mxu0 %v127_v1  ;;  %v129_v3 = vld [vmem:[%s171_s0] sm:$0xff]  }
   0x3   :  { %119 = vmatprep.subr.bf16.mxu0 %v130_v0  ;;  %v105_v4 = vld [vmem:[%s172_s2] ss:$0 sm:$0xff] }
   0x6   :  { %120 = vmatpush3.bf16.msra.mxu0 %v128_v2 }
   0x9   :  { %122 = vmatmul.mubr.msk.bf16.vlgmr.msra.gmra.mxu0 %vm45_vm1, %v129_v3 }
  0xc9   :  { %v83_v5 = vpop.f32.mrf.mxu0 }
  0xca   :  { %v84_v6 = vadd.f32 %v105_v4, %v83_v5 }
  0xcb   :  { %v123_v7 = vpop.f32.mrf.mxu0 }
  0xcc   :  { %v112_v8 = vpack.c.bf16 %v84_v6, %v84_v6 }
  0xcd   :  { %v86_v9 = vpop.f32.mrf.mxu0 }
  0xce   :  { %99 = vst.msk [vmem:[%s173_s3] sm:$0xf] %vm98_vm2, %v112_v8  ;;  %v87_v10 = vadd.f32 %v105_v4, %v86_v9 }
  0xcf   :  { %v124_v11 = vpop.f32.mrf.mxu0 }
  0xd0   :  { %v113_v12 = vpack.c.bf16 %v87_v10, %v87_v10 }
  0xd2   :  { %100 = vst.msk [vmem:[%s173_s3 + $0x4] sm:$0xf] %vm98_vm2, %v113_v12 }

// kernel: informer_forward.30
= control target key start
LH: loop header
LB: loop body
LE: loop exit
PB: predicated region body
PF: predicated region fallthrough
CT: control target
= control target key end

     0   :  { %v181_v0 = vmov 0.0   ;;  %vm182_vm0 = vmmov 0   ;;  %vm54_vm1 = vcmask 261120   ;;  %s255_s1 = inlined_call_operand.vmem [shape: bf16[32,32], index: 1, kind: input, shape index: {}]   ;;  %s256_s0 = inlined_call_operand.vmem [shape: bf16[16,32], index: 0, kind: input, shape index: {}]   ;;  %s257_s2 = inlined_call_operand.vmem [shape: f32[1,32], index: 2, kind: input, shape index: {}]   ;;  %s258_s3 = inlined_call_operand.vmem [shape: f32[16,32], index: 3, kind: input, shape index: {}]   ;;  %s259_s4 = inlined_call_operand.vmem [shape: f32[1,32], index: 4, kind: input, shape index: {}]   ;;  %s260_s5 = inlined_call_operand.vmem [shape: f32[1,32], index: 5, kind: input, shape index: {}]   ;;  %s261_s6 = inlined_call_operand.vmem [shape: f32[16,32], index: 6, kind: output, shape index: {}]  }
   0x1   :  { %164 = vmatprep.subr.bf16.mxu0 %v181_v0  ;;  %v174_v1 = vld [vmem:[%s255_s1 + $0x8] sm:$0xff]   ;;  %168 = vmatprep.mubr.msk.bf16.mxu0 %vm182_vm0, %v181_v0  ;;  %v175_v2 = vld [vmem:[%s255_s1] sm:$0xff]  }
   0x2   :  { %165 = vmatpush3.bf16.msra.mxu0 %v174_v1  ;;  %v176_v3 = vld [vmem:[%s256_s0] sm:$0xff]   ;;  %v100_v11 = vld [vmem:[%s258_s3 + $0x8] sm:$0xff] }
   0x3   :  { %166 = vmatprep.subr.bf16.mxu0 %v181_v0  ;;  %v154_v4 = vld [vmem:[%s257_s2] ss:$0 sm:$0xff] }
   0x4   :  { %v99_v6 = vld [vmem:[%s258_s3] sm:$0xff] }
   0x5   :  { %v159_v34 = vld [vmem:[%s259_s4] ss:$0 sm:$0xff] }
   0x6   :  { %167 = vmatpush3.bf16.msra.mxu0 %v175_v2  ;;  %v160_v36 = vld [vmem:[%s260_s5] ss:$0 sm:$0xff] }
   0x9   :  { %169 = vmatmul.mubr.msk.bf16.vlgmr.msra.gmra.mxu0 %vm54_vm1, %v176_v3 }
  0xc9   :  { %v92_v5 = vpop.f32.mrf.mxu0 }
  0xca   :  { %v93_v7 = vadd.f32 %v154_v4, %v92_v5 }
  0xcb   :  { %v170_v8 = vpop.f32.mrf.mxu0 }
  0xcc   :  { %v101_v9 = vadd.f32 %v99_v6, %v93_v7 }
  0xcd   :  { %v95_v10 = vpop.f32.mrf.mxu0 }
  0xce   :  { %v96_v12 = vadd.f32 %v154_v4, %v95_v10  ;;  %v103_v13 = vsel %vm54_vm1, %v101_v9, 0.0 }
  0xcf   :  { %104 = vadd.xlane.f32.xlu0 %v103_v13  ;;  %v171_v14 = vpop.f32.mrf.mxu0 }
  0xd0   :  { %v102_v15 = vadd.f32 %v100_v11, %v96_v12 }
  0xd2   :  { %v106_v16 = vsel %vm54_vm1, %v102_v15, 0.0 }
  0xd3   :  { %107 = vadd.xlane.f32.xlu0 %v106_v16 }
 0x158   :  { %v105_v17 = vpop.xlane.xlu0 %104 }
 0x159   :  { %v110_v18 = vmul.f32 0.03125, %v105_v17 }
 0x15b   :  { %v112_v19 = vsub.f32 %v101_v9, %v110_v18 }
 0x15c   :  { %v108_v20 = vpop.xlane.xlu0 %107 }
 0x15d   :  { %v111_v21 = vmul.f32 0.03125, %v108_v20  ;;  %v114_v22 = vmul.f32 %v112_v19, %v112_v19 }
 0x15f   :  { %v113_v23 = vsub.f32 %v102_v15, %v111_v21  ;;  %v116_v24 = vsel %vm54_vm1, %v114_v22, 0.0 }
 0x160   :  { %117 = vadd.xlane.f32.xlu1 %v116_v24 }
 0x161   :  { %v115_v25 = vmul.f32 %v113_v23, %v113_v23 }
 0x163   :  { %v119_v26 = vsel %vm54_vm1, %v115_v25, 0.0 }
 0x164   :  { %120 = vadd.xlane.f32.xlu1 %v119_v26 }
 0x1e9   :  { %v118_v27 = vpop.xlane.xlu1 %117 }
 0x1ea   :  { %v122_v28 = vmul.f32 0.03125, %v118_v27 }
 0x1ec   :  { %v124_v29 = vadd.f32 1e-05, %v122_v28 }
 0x1ed   :  { %v121_v30 = vpop.xlane.xlu1 %120 }
 0x1ee   :  { %177 = vrsqrt.f32 %v124_v29  ;;  %v123_v31 = vmul.f32 0.03125, %v121_v30 }
 0x1f0   :  { %v125_v32 = vadd.f32 1e-05, %v123_v31 }
 0x1f2   :  { %179 = vrsqrt.f32 %v125_v32 }
 0x1fb   :  { %v178_v33 = vpop.eup %177 }
 0x1fc   :  { %v128_v35 = vmul.f32 %v178_v33, %v112_v19 }
 0x1fe   :  { %v137_v37 = vmul.f32 %v159_v34, %v128_v35 }
 0x1ff   :  { %v180_v38 = vpop.eup %179 }
 0x200   :  { %v146_v39 = vadd.f32 %v160_v36, %v137_v37  ;;  %v129_v40 = vmul.f32 %v180_v38, %v113_v23 }
 0x202   :  { %148 = vst.msk [vmem:[%s261_s6] sm:$0xff] %vm54_vm1, %v146_v39  ;;  %v138_v41 = vmul.f32 %v159_v34, %v129_v40 }
 0x204   :  { %v147_v42 = vadd.f32 %v160_v36, %v138_v41 }
 0x206   :  { %149 = vst.msk [vmem:[%s261_s6 + $0x8] sm:$0xff] %vm54_vm1, %v147_v42 }

// kernel: informer_forward.31
= control target key start
LH: loop header
LB: loop body
LE: loop exit
PB: predicated region body
PF: predicated region fallthrough
CT: control target
= control target key end

     0   :  { %v275_v0 = vmov 0.0   ;;  %vm276_vm0 = vmmov 0   ;;  %vm53_vm1 = vcmask 261120   ;;  %s361_s1 = inlined_call_operand.vmem [shape: bf16[32,32], index: 1, kind: input, shape index: {}]   ;;  %s362_s0 = inlined_call_operand.vmem [shape: f32[16,32], index: 0, kind: input, shape index: {}]   ;;  %s363_s3 = inlined_call_operand.vmem [shape: bf16[32,32], index: 3, kind: input, shape index: {}]   ;;  %s364_s2 = inlined_call_operand.vmem [shape: f32[1,32], index: 2, kind: input, shape index: {}]   ;;  %s365_s4 = inlined_call_operand.vmem [shape: f32[1,32], index: 4, kind: input, shape index: {}]   ;;  %s366_s5 = inlined_call_operand.vmem [shape: f32[1,32], index: 5, kind: input, shape index: {}]   ;;  %s367_s6 = inlined_call_operand.vmem [shape: f32[1,32], index: 6, kind: input, shape index: {}]   ;;  %s368_s7 = inlined_call_operand.vmem [shape: f32[16,32], index: 7, kind: output, shape index: {}]  }
   0x1   :  { %245 = vmatprep.subr.bf16.mxu0 %v275_v0  ;;  %v263_v1 = vld [vmem:[%s361_s1 + $0x8] sm:$0xff]   ;;  %249 = vmatprep.mubr.msk.bf16.mxu0 %vm276_vm0, %v275_v0  ;;  %v264_v2 = vld [vmem:[%s361_s1] sm:$0xff]  }
   0x2   :  { %253 = vmatprep.subr.bf16.mxu1 %v275_v0  ;;  %257 = vmatprep.mubr.msk.bf16.mxu1 %vm276_vm0, %v275_v0  ;;  %v27_v3 = vld [vmem:[%s362_s0] sm:$0xff]  ;;  %v28_v4 = vld [vmem:[%s362_s0 + $0x8] sm:$0xff] }
   0x3   :  { %246 = vmatpush3.bf16.msra.mxu0 %v263_v1  ;;  %v29_v5 = vpack.c.bf16 %v28_v4, %v27_v3  ;;  %v265_v6 = vld [vmem:[%s363_s3 + $0x8] sm:$0xff]   ;;  %v266_v7 = vld [vmem:[%s363_s3] sm:$0xff]  }
   0x4   :  { %247 = vmatprep.subr.bf16.mxu0 %v275_v0  ;;  %254 = vmatpush3.bf16.msra.mxu1 %v265_v6  ;;  %v229_v8 = vld [vmem:[%s364_s2] ss:$0 sm:$0xff] }
   0x5   :  { %255 = vmatprep.subr.bf16.mxu1 %v275_v0  ;;  %v233_v26 = vld [vmem:[%s365_s4] ss:$0 sm:$0xff] }
   0x6   :  { %v237_v54 = vld [vmem:[%s366_s5] ss:$0 sm:$0xff] }
   0x7   :  { %248 = vmatpush3.bf16.msra.mxu0 %v264_v2  ;;  %v238_v56 = vld [vmem:[%s367_s6] ss:$0 sm:$0xff] }
   0x8   :  { %256 = vmatpush3.bf16.msra.mxu1 %v266_v7 }
   0xa   :  { %250 = vmatmul.mubr.msk.bf16.vlgmr.msra.gmra.mxu0 %vm53_vm1, %v29_v5 }
  0xca   :  { %v91_v9 = vpop.f32.mrf.mxu0 }
  0xcb   :  { %v92_v10 = vadd.f32 %v229_v8, %v91_v9 }
  0xcc   :  { %v251_v11 = vpop.f32.mrf.mxu0 }
  0xcd   :  { %v100_v12 = vmul.f32 0.70710677, %v92_v10  ;;  %v98_v20 = vmul.f32 0.5, %v92_v10 }
  0xce   :  { %v94_v13 = vpop.f32.mrf.mxu0 }
  0xcf   :  { %267 = verf.f32 %v100_v12  ;;  %v95_v14 = vadd.f32 %v229_v8, %v94_v13 }
  0xd0   :  { %v252_v15 = vpop.f32.mrf.mxu0 }
  0xd1   :  { %v101_v16 = vmul.f32 0.70710677, %v95_v14  ;;  %v99_v21 = vmul.f32 0.5, %v95_v14 }
  0xd3   :  { %269 = verf.f32 %v101_v16 }
  0xdc   :  { %v268_v17 = vpop.eup %267 }
  0xdd   :  { %v104_v18 = vadd.f32 1.0, %v268_v17 }
  0xdf   :  { %v106_v23 = vmul.f32 %v104_v18, %v98_v20 }
  0xe0   :  { %v270_v19 = vpop.eup %269 }
  0xe1   :  { %v105_v22 = vadd.f32 1.0, %v270_v19 }
  0xe3   :  { %v107_v24 = vmul.f32 %v105_v22, %v99_v21 }
  0xe5   :  { %v108_v25 = vpack.c.bf16 %v107_v24, %v106_v23 }
  0xe7   :  { %258 = vmatmul.mubr.msk.bf16.vlgmr.msra.gmra.mxu1 %vm53_vm1, %v108_v25 }
 0x1a7   :  { %v169_v27 = vpop.f32.mrf.mxu1 }
 0x1a8   :  { %v170_v28 = vadd.f32 %v233_v26, %v169_v27 }
 0x1a9   :  { %v259_v29 = vpop.f32.mrf.mxu1 }
 0x1aa   :  { %v176_v30 = vadd.f32 %v170_v28, %v27_v3 }
 0x1ab   :  { %v172_v31 = vpop.f32.mrf.mxu1 }
 0x1ac   :  { %v173_v32 = vadd.f32 %v233_v26, %v172_v31  ;;  %v178_v33 = vsel %vm53_vm1, %v176_v30, 0.0 }
 0x1ad   :  { %179 = vadd.xlane.f32.xlu0 %v178_v33  ;;  %v260_v34 = vpop.f32.mrf.mxu1 }
 0x1ae   :  { %v177_v35 = vadd.f32 %v173_v32, %v28_v4 }
 0x1b0   :  { %v181_v36 = vsel %vm53_vm1, %v177_v35, 0.0 }
 0x1b1   :  { %182 = vadd.xlane.f32.xlu0 %v181_v36 }
 0x236   :  { %v180_v37 = vpop.xlane.xlu0 %179 }
 0x237   :  { %v185_v38 = vmul.f32 0.03125, %v180_v37 }
 0x239   :  { %v187_v39 = vsub.f32 %v176_v30, %v185_v38 }
 0x23a   :  { %v183_v40 = vpop.xlane.xlu0 %182 }
 0x23b   :  { %v186_v41 = vmul.f32 0.03125, %v183_v40  ;;  %v189_v42 = vmul.f32 %v187_v39, %v187_v39 }
 0x23d   :  { %v188_v43 = vsub.f32 %v177_v35, %v186_v41  ;;  %v191_v44 = vsel %vm53_vm1, %v189_v42, 0.0 }
 0x23e   :  { %192 = vadd.xlane.f32.xlu1 %v191_v44 }
 0x23f   :  { %v190_v45 = vmul.f32 %v188_v43, %v188_v43 }
 0x241   :  { %v194_v46 = vsel %vm53_vm1, %v190_v45, 0.0 }
 0x242   :  { %195 = vadd.xlane.f32.xlu1 %v194_v46 }
 0x2c7   :  { %v193_v47 = vpop.xlane.xlu1 %192 }
 0x2c8   :  { %v197_v48 = vmul.f32 0.03125, %v193_v47 }
 0x2ca   :  { %v199_v49 = vadd.f32 1e-05, %v197_v48 }
 0x2cb   :  { %v196_v50 = vpop.xlane.xlu1 %195 }
 0x2cc   :  { %271 = vrsqrt.f32 %v199_v49  ;;  %v198_v51 = vmul.f32 0.03125, %v196_v50 }
 0x2ce   :  { %v200_v52 = vadd.f32 1e-05, %v198_v51 }
 0x2d0   :  { %273 = vrsqrt.f32 %v200_v52 }
 0x2d9   :  { %v272_v53 = vpop.eup %271 }
 0x2da   :  { %v203_v55 = vmul.f32 %v272_v53, %v187_v39 }
 0x2dc   :  { %v212_v57 = vmul.f32 %v237_v54, %v203_v55 }
 0x2dd   :  { %v274_v58 = vpop.eup %273 }
 0x2de   :  { %v221_v59 = vadd.f32 %v238_v56, %v212_v57  ;;  %v204_v60 = vmul.f32 %v274_v58, %v188_v43 }
 0x2e0   :  { %223 = vst.msk [vmem:[%s368_s7] sm:$0xff] %vm53_vm1, %v221_v59  ;;  %v213_v61 = vmul.f32 %v237_v54, %v204_v60 }
 0x2e2   :  { %v222_v62 = vadd.f32 %v238_v56, %v213_v61 }
 0x2e4   :  { %224 = vst.msk [vmem:[%s368_s7 + $0x8] sm:$0xff] %vm53_vm1, %v222_v62 }

// kernel: informer_forward.29
= control target key start
LH: loop header
LB: loop body
LE: loop exit
PB: predicated region body
PF: predicated region fallthrough
CT: control target
= control target key end

     0   :  { %s923_s12 = smov 0   ;;  %s1020_s0 = inlined_call_operand.vmem [shape: bf16[2,8,32], index: 0, kind: input, shape index: {}]   ;;  %s1021_s1 = inlined_call_operand.vmem [shape: bf16[2,8,32], index: 1, kind: input, shape index: {}]   ;;  %s1022_s2 = inlined_call_operand.vmem [shape: bf16[2,8,32], index: 2, kind: input, shape index: {}]   ;;  %s1023_s3 = inlined_call_operand.vmem [shape: bf16[2,8,32], index: 3, kind: output, shape index: {}]  }
   0x1 LB: > { %s760_s13 = sadd.s32 4294967295, %s893_s12   ;;  %p764_p0 = scmp.ge.s32.totalorder %s893_s12, 1  ;;  %s893_s12 = sphi %s923_s12, %s13_s12  }
   0x2   : > { %p154_p1 = scmp.lt.s32.totalorder %s893_s12, 3 }
   0x4   : > { %p155_p2 = pnand %p764_p0, %p154_p1 }
   0x5   : > { %p184_p3 = scmp.lt.s32.totalorder (!%p155_p2), %s760_s13, 1  ;;  %s897_s21 = smov (!%p155_p2), 120  }
   0x6   : > { %158 = sbr.rel (%p155_p2) target bundleno = 1413 (0x585), region = 32  ;;  %s898_s22 = smov (!%p155_p2), 112  }
   0x7   : > { %s899_s23 = smov (!%p155_p2), 104   ;;  %s900_s30 = smov (!%p155_p2), 8  }
   0x8   : > { %s901_s4 = smov (!%p155_p2), 16   ;;  %s902_s5 = smov (!%p155_p2), 24  }
   0xb   : > { %v895_v0 = vmov 0.0   ;;  %vm896_vm0 = vmmov 0   ;;  %s1025_s13 = smov (!%p184_p3, %s760_s13), 1  ;;  %vm204_vm1 = vcmask 64512   ;;  %vm267_vm2 = vcmask 1043456  }
   0xc   : > { %804 = vmatprep.subr.bf16.mxu0 %v895_v0  ;;  %806 = vmatprep.mubr.msk.bf16.mxu0 %vm896_vm0, %v895_v0  ;;  %s937_s14 = sshll.u32 %s1025_s13, 2  ;;  %vm312_vm3 = vcmask 60416   ;;  %vm441_vm4 = vcmask 126016   ;;  %vm561_vm5 = vcmask 191616   ;;  %vm681_vm6 = vcmask 257216  }
   0xd   : > { %810 = vmatprep.subr.bf16.mxu1 %v895_v0  ;;  %812 = vmatprep.mubr.msk.bf16.mxu1 %vm896_vm0, %v895_v0  ;;  %s191_s17 = scalar_lea.vmem %s1021_s1, %s937_s14  ;;  %s187_s20 = scalar_lea.vmem %s1020_s0, %s937_s14 }
   0xe   : > { %v202_v1 = vld [vmem:[%s191_s17] sm:$0xf]  ;;  %s195_s26 = scalar_lea.vmem %s1022_s2, %s937_s14  ;;  %s988_s29 = scalar_lea.vmem %s1023_s3, %s937_s14 }
   0xf   : > { %v209_v2 = vsel %vm204_vm1, %v202_v1, 0  ;;  %v201_v3 = vld [vmem:[%s187_s20] sm:$0xf]  ;;  %v772_v10 = vcombine.low %v202_v1, %v202_v1 }
  0x10   : > { %805 = vmatpush3.bf16.xpose.msra.mxu0 %v209_v2  ;;  %v771_v11 = vcombine.low %v201_v3, %v201_v3  ;;  %v963_v17 = vld [vmem:[%s195_s26] sm:$0xf] }
  0x11   : > { %822 = vmatprep.subr.bf16.mxu0 %v895_v0  ;;  %322 = vrot.lane.b32.xlu1 %v772_v10, %s897_s21  ;;  %v269_v18 = vsel %vm267_vm2, %v963_v17, 0  ;;  %v774_v2 = vcombine.low %v963_v17, %v963_v17 }
  0x12   : > { %811 = vmatpush3.bf16.msra.mxu1 %v269_v18 }
  0x13   : > { %816 = vmatprep.subr.bf16.mxu1 %v895_v0 }
  0x15   : > { %317 = vrot.lane.b32.xlu1 %v771_v11, %s897_s21 }
  0x17   : > { %807 = vmatmul.mubr.msk.bf16.vlgmr.msra.gmra.mxu0 %vm204_vm1, %v201_v3 }
  0x18   : > { %824 = vmatprep.mubr.msk.bf16.mxu0 %vm896_vm0, %v895_v0 }
  0x19   : > { %443 = vrot.lane.b32.xlu1 %v771_v11, %s898_s22 }
  0x1d   : > { %565 = vrot.lane.b32.xlu1 %v772_v10, %s899_s23 }
  0x21   : > { %563 = vrot.lane.b32.xlu1 %v771_v11, %s899_s23 }
  0x83   : > { %v323_v21 = vpop.permute.xlu1 %322 }
  0x84   : > { %v328_v23 = vsel %vm204_vm1, %v323_v21, 0 }
  0x87   : > { %v318_v25 = vpop.permute.xlu1 %317 }
  0x8b   : > { %v444_v27 = vpop.permute.xlu1 %443 }
  0x8f   : > { %v566_v29 = vpop.permute.xlu1 %565 }
  0x90   : > { %v571_v30 = vsel %vm204_vm1, %v566_v29, 0 }
  0x93   : > { %v564_v31 = vpop.permute.xlu1 %563 }
  0xd7   : > { %v245_v4 = vpop.f32.mrf.mxu0 }
  0xd8   : > { %v251_v5 = vmul.f32 0.35355338, %v245_v4 }
  0xd9   : > { %v808_v6 = vpop.f32.mrf.mxu0 }
  0xda   : > { %v252_v7 = vsel %vm204_vm1, %v251_v5, -inf }
  0xdb   : > { %253 = vmax.xlane.f32.xlu0 %v252_v7  ;;  %v248_v8 = vpop.f32.mrf.mxu0 }
  0xdd   : > { %v809_v9 = vpop.f32.mrf.mxu0 }
 0x164   : > { %v254_v12 = vpop.xlane.xlu0 %253 }
 0x165   : > { %v255_v13 = vsub.f32 %v251_v5, %v254_v12 }
 0x167   : > { %v256_v14 = vmul.f32 1.442695, %v255_v13 }
 0x169   : > { %871 = vpow2.f32 %v256_v14 }
 0x176   : > { %v872_v15 = vpop.eup %871 }
 0x177   : > { %v258_v16 = vsel %vm204_vm1, %v872_v15, 0.0 }
 0x178   : > { %259 = vadd.xlane.f32.xlu0 %v258_v16 }
 0x18e   : > { %445 = vrot.lane.b32.xlu0 %v772_v10, %s898_s22 }
 0x201   : > { %v260_v19 = vpop.xlane.xlu0 %259 }
 0x202   : > { %873 = vrcp.f32 %v260_v19 }
 0x205   : > { %v446_v26 = vpop.permute.xlu0 %445 }
 0x206   : > { %v451_v28 = vsel %vm204_vm1, %v446_v26, 0 }
 0x20f   : > { %v874_v20 = vpop.eup %873 }
 0x210   : > { %v262_v22 = vmul.f32 %v874_v20, %v872_v15 }
 0x212   : > { %v263_v24 = vpack.c.bf16 %v262_v22, %v262_v22 }
 0x214   : > { %813 = vmatmul.mubr.msk.bf16.vlgmr.msra.gmra.mxu1 %vm204_vm1, %v263_v24 }
 0x215   : > { %817 = vmatpush3.bf16.xpose.msra.mxu1 %v328_v23  ;;  %818 = vmatprep.mubr.msk.bf16.mxu1 %vm896_vm0, %v895_v0 }
 0x216   : > { %828 = vmatprep.subr.bf16.mxu1 %v895_v0 }
 0x21c   : > { %819 = vmatmul.mubr.msk.bf16.vlgmr.msra.gmra.mxu1 %vm204_vm1, %v318_v25 }
 0x21d   : > { %829 = vmatpush3.bf16.xpose.msra.mxu1 %v451_v28  ;;  %830 = vmatprep.mubr.msk.bf16.mxu1 %vm896_vm0, %v895_v0 }
 0x21e   : > { %840 = vmatprep.subr.bf16.mxu1 %v895_v0 }
 0x224   : > { %831 = vmatmul.mubr.msk.bf16.vlgmr.msra.gmra.mxu1 %vm204_vm1, %v444_v27 }
 0x225   : > { %841 = vmatpush3.bf16.xpose.msra.mxu1 %v571_v30  ;;  %842 = vmatprep.mubr.msk.bf16.mxu1 %vm896_vm0, %v895_v0 }
 0x22c   : > { %843 = vmatmul.mubr.msk.bf16.vlgmr.msra.gmra.mxu1 %vm204_vm1, %v564_v31 }
 0x2d4   : > { %v305_v32 = vpop.f32.mrf.mxu1 }
 0x2d5   : > { %v311_v33 = vpack.c.bf16 %v305_v32, %v305_v32 }
 0x2d6   : > { %v814_v34 = vpop.f32.mrf.mxu1 }
 0x2d7   : > { %313 = vst.msk [vmem:[%s988_s29] sm:$0xf] %vm312_vm3, %v311_v33 }
 0x2d8   : > { %v308_v35 = vpop.f32.mrf.mxu1 }
 0x2da   : > { %v815_v36 = vpop.f32.mrf.mxu1 }
 0x2dc   : > { %v364_v37 = vpop.f32.mrf.mxu1 }
 0x2dd   : > { %v370_v38 = vmul.f32 0.35355338, %v364_v37 }
 0x2de   : > { %v820_v39 = vpop.f32.mrf.mxu1 }
 0x2df   : > { %v371_v40 = vsel %vm204_vm1, %v370_v38, -inf }
 0x2e0   : > { %372 = vmax.xlane.f32.xlu1 %v371_v40  ;;  %v367_v41 = vpop.f32.mrf.mxu1 }
 0x2e2   : > { %v821_v42 = vpop.f32.mrf.mxu1 }
 0x2e4   : > { %v487_v43 = vpop.f32.mrf.mxu1 }
 0x2e5   : > { %v493_v44 = vmul.f32 0.35355338, %v487_v43 }
 0x2e6   : > { %v832_v45 = vpop.f32.mrf.mxu1 }
 0x2e7   : > { %v494_v46 = vsel %vm204_vm1, %v493_v44, -inf }
 0x2e8   : > { %495 = vmax.xlane.f32.xlu0 %v494_v46  ;;  %v490_v47 = vpop.f32.mrf.mxu1 }
 0x2ea   : > { %v833_v48 = vpop.f32.mrf.mxu1 }
 0x2ec   : > { %v607_v49 = vpop.f32.mrf.mxu1 }
 0x2ed   : > { %v613_v50 = vmul.f32 0.35355338, %v607_v49 }
 0x2ee   : > { %v844_v51 = vpop.f32.mrf.mxu1 }
 0x2ef   : > { %v614_v52 = vsel %vm204_vm1, %v613_v50, -inf }
 0x2f0   : > { %615 = vmax.xlane.f32.xlu1 %v614_v52  ;;  %v610_v53 = vpop.f32.mrf.mxu1 }
 0x2f2   : > { %v845_v54 = vpop.f32.mrf.mxu1 }
 0x369   : > { %v373_v55 = vpop.xlane.xlu1 %372 }
 0x36a   : > { %v374_v56 = vsub.f32 %v370_v38, %v373_v55 }
 0x36c   : > { %v375_v57 = vmul.f32 1.442695, %v374_v56 }
 0x36e   : > { %875 = vpow2.f32 %v375_v57 }
 0x371   : > { %v496_v58 = vpop.xlane.xlu0 %495 }
 0x372   : > { %v497_v59 = vsub.f32 %v493_v44, %v496_v58 }
 0x374   : > { %v498_v60 = vmul.f32 1.442695, %v497_v59 }
 0x376   : > { %877 = vpow2.f32 %v498_v60 }
 0x379   : > { %v616_v3 = vpop.xlane.xlu1 %615 }
 0x37a   : > { %v617_v4 = vsub.f32 %v613_v50, %v616_v3 }
 0x37b   : > { %v876_v61 = vpop.eup %875 }
 0x37c   : > { %v377_v62 = vsel %vm204_vm1, %v876_v61, 0.0  ;;  %v618_v5 = vmul.f32 1.442695, %v617_v4 }
 0x37d   : > { %378 = vadd.xlane.f32.xlu1 %v377_v62 }
 0x37e   : > { %879 = vpow2.f32 %v618_v5 }
 0x383   : > { %v878_v63 = vpop.eup %877 }
 0x384   : > { %v500_v1 = vsel %vm204_vm1, %v878_v63, 0.0 }
 0x385   : > { %501 = vadd.xlane.f32.xlu0 %v500_v1 }
 0x38b   : > { %v880_v6 = vpop.eup %879 }
 0x38c   : > { %v620_v7 = vsel %vm204_vm1, %v880_v6, 0.0 }
 0x38e   : > { %506 = vrot.lane.b32.xlu1 %v774_v2, %s898_s22 }
 0x39b   : > { %386 = vrot.lane.b32.xlu0 %v774_v2, %s897_s21 }
 0x3b2   : > { %621 = vadd.xlane.f32.xlu1 %v620_v7 }
 0x3c3   : > { %626 = vrot.lane.b32.xlu1 %v774_v2, %s899_s23 }
 0x406   : > { %v379_v8 = vpop.xlane.xlu1 %378 }
 0x407   : > { %881 = vrcp.f32 %v379_v8 }
 0x40a   : > { %v507_v14 = vpop.permute.xlu1 %506 }
 0x40b   : > { %v512_v16 = vsel %vm267_vm2, %v507_v14, 0 }
 0x40e   : > { %v502_v9 = vpop.xlane.xlu0 %501 }
 0x40f   : > { %883 = vrcp.f32 %v502_v9 }
 0x412   : > { %v387_v10 = vpop.permute.xlu0 %386 }
 0x413   : > { %v392_v11 = vsel %vm267_vm2, %v387_v10, 0 }
 0x414   : > { %v882_v12 = vpop.eup %881  ;;  %823 = vmatpush3.bf16.msra.mxu0 %v392_v11 }
 0x415   : > { %834 = vmatprep.subr.bf16.mxu0 %v895_v0  ;;  %v381_v13 = vmul.f32 %v882_v12, %v876_v61 }
 0x417   : > { %v382_v15 = vpack.c.bf16 %v381_v13, %v381_v13 }
 0x419   : > { %825 = vmatmul.mubr.msk.bf16.vlgmr.msra.gmra.mxu0 %vm204_vm1, %v382_v15 }
 0x41a   : > { %835 = vmatpush3.bf16.msra.mxu0 %v512_v16  ;;  %836 = vmatprep.mubr.msk.bf16.mxu0 %vm896_vm0, %v895_v0 }
 0x41b   : > { %846 = vmatprep.subr.bf16.mxu0 %v895_v0 }
 0x41c   : > { %v884_v17 = vpop.eup %883 }
 0x41d   : > { %v504_v18 = vmul.f32 %v884_v17, %v878_v63 }
 0x41f   : > { %v505_v19 = vpack.c.bf16 %v504_v18, %v504_v18 }
 0x421   : > { %837 = vmatmul.mubr.msk.bf16.vlgmr.msra.gmra.mxu0 %vm204_vm1, %v505_v19 }
 0x422   : > { %848 = vmatprep.mubr.msk.bf16.mxu0 %vm896_vm0, %v895_v0 }
 0x43b   : > { %v622_v20 = vpop.xlane.xlu1 %621 }
 0x43c   : > { %885 = vrcp.f32 %v622_v20 }
 0x43f   : > { %v627_v21 = vpop.permute.xlu1 %626 }
 0x440   : > { %v632_v22 = vsel %vm267_vm2, %v627_v21, 0 }
 0x441   : > { %847 = vmatpush3.bf16.msra.mxu0 %v632_v22 }
 0x449   : > { %v886_v23 = vpop.eup %885 }
 0x44a   : > { %v624_v24 = vmul.f32 %v886_v23, %v880_v6 }
 0x44c   : > { %v625_v25 = vpack.c.bf16 %v624_v24, %v624_v24 }
 0x44e   : > { %849 = vmatmul.mubr.msk.bf16.vlgmr.msra.gmra.mxu0 %vm204_vm1, %v625_v25 }
 0x4d9   : > { %v428_v26 = vpop.f32.mrf.mxu0 }
 0x4da   : > { %v785_v27 = vpack.c.bf16 %v428_v26, %v428_v26 }
 0x4db   : > { %v826_v28 = vpop.f32.mrf.mxu0 }
 0x4dc   : > { %438 = vrot.lane.b32.xlu0 %v785_v27, %s900_s30 }
 0x4dd   : > { %v431_v29 = vpop.f32.mrf.mxu0 }
 0x4df   : > { %v827_v30 = vpop.f32.mrf.mxu0 }
 0x4e1   : > { %v548_v31 = vpop.f32.mrf.mxu0 }
 0x4e2   : > { %v786_v0 = vpack.c.bf16 %v548_v31, %v548_v31 }
 0x4e3   : > { %v838_v32 = vpop.f32.mrf.mxu0 }
 0x4e4   : > { %558 = vrot.lane.b32.xlu1 %v786_v0, %s901_s4 }
 0x4e5   : > { %v551_v33 = vpop.f32.mrf.mxu0 }
 0x4e7   : > { %v839_v34 = vpop.f32.mrf.mxu0 }
 0x50e   : > { %v668_v35 = vpop.f32.mrf.mxu0 }
 0x50f   : > { %v787_v36 = vpack.c.bf16 %v668_v35, %v668_v35 }
 0x510   : > { %v850_v37 = vpop.f32.mrf.mxu0 }
 0x511   : > { %678 = vrot.lane.b32.xlu0 %v787_v36, %s902_s5 }
 0x512   : > { %v671_v38 = vpop.f32.mrf.mxu0 }
 0x514   : > { %v851_v39 = vpop.f32.mrf.mxu0 }
 0x54e   : > { %v439_v40 = vpop.permute.xlu0 %438 }
 0x54f   : > { %442 = vst.msk [vmem:[%s988_s29] sm:$0xf] %vm441_vm4, %v439_v40 }
 0x556   : > { %v559_v41 = vpop.permute.xlu1 %558 }
 0x557   : > { %562 = vst.msk [vmem:[%s988_s29] sm:$0xf] %vm561_vm5, %v559_v41 }
 0x583   : > { %v679_v42 = vpop.permute.xlu0 %678 }
 0x584   : > { %682 = vst.msk [vmem:[%s988_s29] sm:$0xf] %vm681_vm6, %v679_v42 }
 0x585 PF: > { %s13_s12 = sadd.s32 1, %s893_s12  }
 0x586   : > { %p10_p4 = scmp.ge.s32.totalorder %s13_s12, 4  }
 0x588   :  { %12 = sbr.rel (!%p10_p4) target bundleno = 1 (0x1), region = 68 }

// kernel: informer_forward.32
= control target key start
LH: loop header
LB: loop body
LE: loop exit
PB: predicated region body
PF: predicated region fallthrough
CT: control target
= control target key end

     0   :  { %vm16_vm0 = vcmask 261120   ;;  %s118_s0 = inlined_call_operand.vmem [shape: f32[16,32], index: 0, kind: input, shape index: {}]   ;;  %s119_s1 = inlined_call_operand.vmem [shape: f32[1,32], index: 1, kind: input, shape index: {}]   ;;  %s120_s2 = inlined_call_operand.vmem [shape: f32[1,32], index: 2, kind: input, shape index: {}]   ;;  %s121_s3 = inlined_call_operand.vmem [shape: f32[16,32], index: 3, kind: output, shape index: {}]  }
   0x1   :  { %v14_v0 = vld [vmem:[%s118_s0] sm:$0xff]  ;;  %v15_v1 = vld [vmem:[%s118_s0 + $0x8] sm:$0xff] }
   0x2   :  { %v17_v2 = vsel %vm16_vm0, %v14_v0, 0.0  ;;  %v20_v3 = vsel %vm16_vm0, %v15_v1, 0.0  ;;  %v68_v21 = vld [vmem:[%s119_s1] ss:$0 sm:$0xff] }
   0x3   :  { %18 = vadd.xlane.f32.xlu0 %v17_v2  ;;  %v69_v23 = vld [vmem:[%s120_s2] ss:$0 sm:$0xff] }
   0x7   :  { %21 = vadd.xlane.f32.xlu0 %v20_v3 }
  0x8c   :  { %v19_v4 = vpop.xlane.xlu0 %18 }
  0x8d   :  { %v24_v5 = vmul.f32 0.03125, %v19_v4 }
  0x8f   :  { %v26_v6 = vsub.f32 %v14_v0, %v24_v5 }
  0x90   :  { %v22_v7 = vpop.xlane.xlu0 %21 }
  0x91   :  { %v25_v8 = vmul.f32 0.03125, %v22_v7  ;;  %v28_v9 = vmul.f32 %v26_v6, %v26_v6 }
  0x93   :  { %v27_v10 = vsub.f32 %v15_v1, %v25_v8  ;;  %v30_v11 = vsel %vm16_vm0, %v28_v9, 0.0 }
  0x94   :  { %31 = vadd.xlane.f32.xlu1 %v30_v11 }
  0x95   :  { %v29_v12 = vmul.f32 %v27_v10, %v27_v10 }
  0x97   :  { %v33_v13 = vsel %vm16_vm0, %v29_v12, 0.0 }
  0x98   :  { %34 = vadd.xlane.f32.xlu1 %v33_v13 }
 0x11d   :  { %v32_v14 = vpop.xlane.xlu1 %31 }
 0x11e   :  { %v36_v15 = vmul.f32 0.03125, %v32_v14 }
 0x120   :  { %v38_v16 = vadd.f32 1e-05, %v36_v15 }
 0x121   :  { %v35_v17 = vpop.xlane.xlu1 %34 }
 0x122   :  { %70 = vrsqrt.f32 %v38_v16  ;;  %v37_v18 = vmul.f32 0.03125, %v35_v17 }
 0x124   :  { %v39_v19 = vadd.f32 1e-05, %v37_v18 }
 0x126   :  { %72 = vrsqrt.f32 %v39_v19 }
 0x12f   :  { %v71_v20 = vpop.eup %70 }
 0x130   :  { %v42_v22 = vmul.f32 %v71_v20, %v26_v6 }
 0x132   :  { %v51_v24 = vmul.f32 %v68_v21, %v42_v22 }
 0x133   :  { %v73_v25 = vpop.eup %72 }
 0x134   :  { %v60_v26 = vadd.f32 %v69_v23, %v51_v24  ;;  %v43_v27 = vmul.f32 %v73_v25, %v27_v10 }
 0x136   :  { %62 = vst.msk [vmem:[%s121_s3] sm:$0xff] %vm16_vm0, %v60_v26  ;;  %v52_v28 = vmul.f32 %v68_v21, %v43_v27 }
 0x138   :  { %v61_v29 = vadd.f32 %v69_v23, %v52_v28 }
 0x13a   :  { %63 = vst.msk [vmem:[%s121_s3 + $0x8] sm:$0xff] %vm16_vm0, %v61_v29 }

// kernel: informer_forward.38
= control target key start
LH: loop header
LB: loop body
LE: loop exit
PB: predicated region body
PF: predicated region fallthrough
CT: control target
= control target key end

     0   :  { %v130_v0 = vmov 0.0   ;;  %vm131_vm0 = vmmov 0   ;;  %vm45_vm1 = vcmask 261120   ;;  %vm98_vm2 = vcmask 519168   ;;  %s170_s1 = inlined_call_operand.vmem [shape: bf16[32,64], index: 1, kind: input, shape index: {}]   ;;  %s171_s0 = inlined_call_operand.vmem [shape: bf16[16,32], index: 0, kind: input, shape index: {}]   ;;  %s172_s2 = inlined_call_operand.vmem [shape: f32[1,64], index: 2, kind: input, shape index: {}]   ;;  %s173_s3 = inlined_call_operand.vmem [shape: bf16[16,64], index: 3, kind: output, shape index: {}]  }
   0x1   :  { %117 = vmatprep.subr.bf16.mxu0 %v130_v0  ;;  %v127_v1 = vld [vmem:[%s170_s1 + $0x8] sm:$0xff]   ;;  %121 = vmatprep.mubr.msk.bf16.mxu0 %vm131_vm0, %v130_v0  ;;  %v128_v2 = vld [vmem:[%s170_s1] sm:$0xff]  }
   0x2   :  { %118 = vmatpush3.bf16.msra.mxu0 %v127_v1  ;;  %v129_v3 = vld [vmem:[%s171_s0] sm:$0xff]  }
   0x3   :  { %119 = vmatprep.subr.bf16.mxu0 %v130_v0  ;;  %v105_v4 = vld [vmem:[%s172_s2] ss:$0 sm:$0xff] }
   0x6   :  { %120 = vmatpush3.bf16.msra.mxu0 %v128_v2 }
   0x9   :  { %122 = vmatmul.mubr.msk.bf16.vlgmr.msra.gmra.mxu0 %vm45_vm1, %v129_v3 }
  0xc9   :  { %v83_v5 = vpop.f32.mrf.mxu0 }
  0xca   :  { %v84_v6 = vadd.f32 %v105_v4, %v83_v5 }
  0xcb   :  { %v123_v7 = vpop.f32.mrf.mxu0 }
  0xcc   :  { %v112_v8 = vpack.c.bf16 %v84_v6, %v84_v6 }
  0xcd   :  { %v86_v9 = vpop.f32.mrf.mxu0 }
  0xce   :  { %99 = vst.msk [vmem:[%s173_s3] sm:$0xf] %vm98_vm2, %v112_v8  ;;  %v87_v10 = vadd.f32 %v105_v4, %v86_v9 }
  0xcf   :  { %v124_v11 = vpop.f32.mrf.mxu0 }
  0xd0   :  { %v113_v12 = vpack.c.bf16 %v87_v10, %v87_v10 }
  0xd2   :  { %100 = vst.msk [vmem:[%s173_s3 + $0x4] sm:$0xf] %vm98_vm2, %v113_v12 }

// kernel: informer_forward.37
= control target key start
LH: loop header
LB: loop body
LE: loop exit
PB: predicated region body
PF: predicated region fallthrough
CT: control target
= control target key end

     0   :  { %vm52_vm0 = vcmask 261120   ;;  %vm124_vm1 = vcmask 257024   ;;  %s211_s1 = inlined_call_operand.vmem [shape: bf16[32,32], index: 1, kind: input, shape index: {}]   ;;  %s212_s0 = inlined_call_operand.vmem [shape: bf16[32,32], index: 0, kind: input, shape index: {}]   ;;  %s213_s2 = inlined_call_operand.vmem [shape: f32[1,32], index: 2, kind: input, shape index: {}]   ;;  %s214_s3 = inlined_call_operand.vmem [shape: bf16[32,32], index: 3, kind: output, shape index: {}]  }
   0x1   :  { %v160_v0 = vld [vmem:[%s211_s1 + $0x8] sm:$0xff]   ;;  %v161_v1 = vld [vmem:[%s211_s1] sm:$0xff]  }
   0x2   :  { %152 = vmatprep.subr.bf16.mxu0 %v160_v0  ;;  %v162_v2 = vld [vmem:[%s212_s0] sm:$0xff]   ;;  %v163_v3 = vld [vmem:[%s212_s0 + $0x8] sm:$0xff]  }
   0x3   :  { %153 = vmatpush3.bf16.msra.mxu0 %v160_v0  ;;  %156 = vmatprep.mubr.msk.bf16.mxu0 %vm52_vm0, %v162_v2  ;;  %v133_v4 = vld [vmem:[%s213_s2] ss:$0 sm:$0xff] }
   0x4   :  { %154 = vmatprep.subr.bf16.mxu0 %v161_v1 }
   0x7   :  { %155 = vmatpush3.bf16.msra.mxu0 %v161_v1 }
   0xa   :  { %157 = vmatmul.mubr.msk.bf16.vlgmr.msra.gmra.mxu0 %vm52_vm0, %v163_v3 }
  0xca   :  { %v158_v5 = vpop.f32.mrf.mxu0 }
  0xcb   :  { %v102_v6 = vadd.f32 %v158_v5, %v133_v4 }
  0xcc   :  { %v93_v7 = vpop.f32.mrf.mxu0 }
  0xcd   :  { %v146_v8 = vpack.c.bf16 %v102_v6, %v102_v6  ;;  %v94_v9 = vadd.f32 %v133_v4, %v93_v7 }
  0xce   :  { %v159_v10 = vpop.f32.mrf.mxu0 }
  0xcf   :  { %127 = vst.msk [vmem:[%s214_s3 + $0x8] sm:$0xf] %vm124_vm1, %v146_v8  ;;  %v144_v11 = vpack.c.bf16 %v94_v9, %v94_v9  ;;  %v105_v12 = vadd.f32 %v159_v10, %v133_v4 }
  0xd0   :  { %v96_v13 = vpop.f32.mrf.mxu0 }
  0xd1   :  { %125 = vst.msk [vmem:[%s214_s3] sm:$0xf] %vm124_vm1, %v144_v11  ;;  %v147_v14 = vpack.c.bf16 %v105_v12, %v105_v12  ;;  %v97_v15 = vadd.f32 %v133_v4, %v96_v13 }
  0xd3   :  { %128 = vst.msk [vmem:[%s214_s3 + $0xc] sm:$0xf] %vm124_vm1, %v147_v14  ;;  %v145_v16 = vpack.c.bf16 %v97_v15, %v97_v15 }
  0xd5   :  { %126 = vst.msk [vmem:[%s214_s3 + $0x4] sm:$0xf] %vm124_vm1, %v145_v16 }

// kernel: informer_forward.42
= control target key start
LH: loop header
LB: loop body
LE: loop exit
PB: predicated region body
PF: predicated region fallthrough
CT: control target
= control target key end

     0   :  { %vm18_vm0 = vcmask 261120   ;;  %s174_s0 = inlined_call_operand.vmem [shape: f32[32,32], index: 0, kind: input, shape index: {}]   ;;  %s175_s1 = inlined_call_operand.vmem [shape: f32[1,32], index: 1, kind: input, shape index: {}]   ;;  %s176_s2 = inlined_call_operand.vmem [shape: f32[1,32], index: 2, kind: input, shape index: {}]   ;;  %s177_s3 = inlined_call_operand.vmem [shape: f32[32,32], index: 3, kind: output, shape index: {}]  }
   0x1   :  { %v14_v0 = vld [vmem:[%s174_s0] sm:$0xff]  ;;  %v16_v1 = vld [vmem:[%s174_s0 + $0x10] sm:$0xff]  ;;  %v15_v2 = vld [vmem:[%s174_s0 + $0x8] sm:$0xff] }
   0x2   :  { %v19_v3 = vsel %vm18_vm0, %v14_v0, 0.0  ;;  %v25_v4 = vsel %vm18_vm0, %v16_v1, 0.0  ;;  %v17_v5 = vld [vmem:[%s174_s0 + $0x18] sm:$0xff]  ;;  %v22_v6 = vsel %vm18_vm0, %v15_v2, 0.0  ;;  %v102_v41 = vld [vmem:[%s175_s1] ss:$0 sm:$0xff] }
   0x3   :  { %20 = vadd.xlane.f32.xlu0 %v19_v3  ;;  %26 = vadd.xlane.f32.xlu1 %v25_v4  ;;  %v28_v7 = vsel %vm18_vm0, %v17_v5, 0.0  ;;  %v103_v43 = vld [vmem:[%s176_s2] ss:$0 sm:$0xff] }
   0x7   :  { %23 = vadd.xlane.f32.xlu0 %v22_v6  ;;  %29 = vadd.xlane.f32.xlu1 %v28_v7 }
  0x8c   :  { %v21_v8 = vpop.xlane.xlu0 %20  ;;  %v27_v9 = vpop.xlane.xlu1 %26 }
  0x8d   :  { %v32_v10 = vmul.f32 0.03125, %v21_v8  ;;  %v34_v11 = vmul.f32 0.03125, %v27_v9 }
  0x8f   :  { %v36_v12 = vsub.f32 %v14_v0, %v32_v10  ;;  %v38_v13 = vsub.f32 %v16_v1, %v34_v11 }
  0x90   :  { %v24_v14 = vpop.xlane.xlu0 %23  ;;  %v30_v15 = vpop.xlane.xlu1 %29 }
  0x91   :  { %v33_v16 = vmul.f32 0.03125, %v24_v14  ;;  %v35_v17 = vmul.f32 0.03125, %v30_v15  ;;  %v40_v18 = vmul.f32 %v36_v12, %v36_v12  ;;  %v42_v19 = vmul.f32 %v38_v13, %v38_v13 }
  0x93   :  { %v37_v20 = vsub.f32 %v15_v2, %v33_v16  ;;  %v39_v21 = vsub.f32 %v17_v5, %v35_v17  ;;  %v44_v22 = vsel %vm18_vm0, %v40_v18, 0.0  ;;  %v50_v23 = vsel %vm18_vm0, %v42_v19, 0.0 }
  0x94   :  { %45 = vadd.xlane.f32.xlu0 %v44_v22 }
  0x95   :  { %v41_v24 = vmul.f32 %v37_v20, %v37_v20  ;;  %v43_v25 = vmul.f32 %v39_v21, %v39_v21 }
  0x97   :  { %v47_v26 = vsel %vm18_vm0, %v41_v24, 0.0  ;;  %v53_v27 = vsel %vm18_vm0, %v43_v25, 0.0 }
  0x98   :  { %51 = vadd.xlane.f32.xlu0 %v50_v23  ;;  %48 = vadd.xlane.f32.xlu1 %v47_v26 }
  0x9c   :  { %54 = vadd.xlane.f32.xlu1 %v53_v27 }
 0x11d   :  { %v46_v28 = vpop.xlane.xlu0 %45 }
 0x11e   :  { %v56_v29 = vmul.f32 0.03125, %v46_v28 }
 0x120   :  { %v60_v30 = vadd.f32 1e-05, %v56_v29 }
 0x121   :  { %v49_v31 = vpop.xlane.xlu1 %48  ;;  %v52_v32 = vpop.xlane.xlu0 %51 }
 0x122   :  { %104 = vrsqrt.f32 %v60_v30  ;;  %v57_v33 = vmul.f32 0.03125, %v49_v31  ;;  %v58_v34 = vmul.f32 0.03125, %v52_v32 }
 0x124   :  { %v61_v35 = vadd.f32 1e-05, %v57_v33  ;;  %v62_v36 = vadd.f32 1e-05, %v58_v34 }
 0x125   :  { %v55_v37 = vpop.xlane.xlu1 %54 }
 0x126   :  { %106 = vrsqrt.f32 %v61_v35  ;;  %v59_v38 = vmul.f32 0.03125, %v55_v37 }
 0x127   :  { %108 = vrsqrt.f32 %v62_v36 }
 0x128   :  { %v63_v39 = vadd.f32 1e-05, %v59_v38 }
 0x12a   :  { %110 = vrsqrt.f32 %v63_v39 }
 0x12f   :  { %v105_v40 = vpop.eup %104 }
 0x130   :  { %v68_v42 = vmul.f32 %v105_v40, %v36_v12 }
 0x132   :  { %v79_v44 = vmul.f32 %v102_v41, %v68_v42 }
 0x133   :  { %v107_v45 = vpop.eup %106 }
 0x134   :  { %v109_v46 = vpop.eup %108  ;;  %v90_v47 = vadd.f32 %v103_v43, %v79_v44  ;;  %v69_v48 = vmul.f32 %v107_v45, %v37_v20 }
 0x135   :  { %v70_v49 = vmul.f32 %v109_v46, %v38_v13 }
 0x136   :  { %94 = vst.msk [vmem:[%s177_s3] sm:$0xff] %vm18_vm0, %v90_v47  ;;  %v80_v50 = vmul.f32 %v102_v41, %v69_v48 }
 0x137   :  { %v111_v51 = vpop.eup %110  ;;  %v81_v52 = vmul.f32 %v102_v41, %v70_v49 }
 0x138   :  { %v91_v53 = vadd.f32 %v103_v43, %v80_v50  ;;  %v71_v54 = vmul.f32 %v111_v51, %v39_v21 }
 0x139   :  { %v92_v55 = vadd.f32 %v103_v43, %v81_v52 }
 0x13a   :  { %95 = vst.msk [vmem:[%s177_s3 + $0x8] sm:$0xff] %vm18_vm0, %v91_v53  ;;  %v82_v56 = vmul.f32 %v102_v41, %v71_v54 }
 0x13b   :  { %96 = vst.msk [vmem:[%s177_s3 + $0x10] sm:$0xff] %vm18_vm0, %v92_v55 }
 0x13c   :  { %v93_v57 = vadd.f32 %v103_v43, %v82_v56 }
 0x13e   :  { %97 = vst.msk [vmem:[%s177_s3 + $0x18] sm:$0xff] %vm18_vm0, %v93_v57 }

// kernel: informer_forward.35
= control target key start
LH: loop header
LB: loop body
LE: loop exit
PB: predicated region body
PF: predicated region fallthrough
CT: control target
= control target key end

     0   :  { %s1068_s12 = smov 0   ;;  %s1209_s0 = inlined_call_operand.vmem [shape: bf16[2,16,32], index: 0, kind: input, shape index: {}]   ;;  %s1210_s1 = inlined_call_operand.vmem [shape: bf16[2,16,32], index: 1, kind: input, shape index: {}]   ;;  %s1211_s2 = inlined_call_operand.vmem [shape: bf16[2,16,32], index: 2, kind: input, shape index: {}]   ;;  %s1212_s3 = inlined_call_operand.vmem [shape: bf16[2,16,32], index: 3, kind: output, shape index: {}]  }
   0x1 LB: > { %s871_s13 = sadd.s32 4294967295, %s1038_s12   ;;  %p875_p0 = scmp.ge.s32.totalorder %s1038_s12, 1  ;;  %s1038_s12 = sphi %s1068_s12, %s13_s12  }
   0x2   : > { %p157_p1 = scmp.lt.s32.totalorder %s1038_s12, 3 }
   0x4   : > { %p158_p2 = pnand %p875_p0, %p157_p1 }
   0x5   : > { %p191_p3 = scmp.lt.s32.totalorder (!%p158_p2), %s871_s13, 1  ;;  %s1042_s21 = smov (!%p158_p2), 120  }
   0x6   : > { %161 = sbr.rel (%p158_p2) target bundleno = 1435 (0x59b), region = 32  ;;  %s1043_s22 = smov (!%p158_p2), 104  }
   0x7   : > { %s1044_s26 = smov (!%p158_p2), 112   ;;  %s1045_s30 = smov (!%p158_p2), 8  }
   0x8   : > { %s1046_s4 = smov (!%p158_p2), 16   ;;  %s1047_s5 = smov (!%p158_p2), 24  }
   0xb   : > { %v1040_v0 = vmov 0.0   ;;  %vm1041_vm0 = vmmov 0   ;;  %s1214_s13 = smov (!%p191_p3, %s871_s13), 1  ;;  %vm235_vm1 = vcmask 64512   ;;  %v218_v4 = vlaneseq }
   0xc   : > { %933 = vmatprep.subr.bf16.mxu0 %v1040_v0  ;;  %935 = vmatprep.mubr.msk.bf16.mxu0 %vm1041_vm0, %v1040_v0  ;;  %s1082_s14 = sshll.u32 %s1214_s13, 3  ;;  %vm287_vm3 = vcmask 130048   ;;  %vm369_vm5 = vcmask 60416   ;;  %vm509_vm6 = vcmask 126016   ;;  %vm649_vm7 = vcmask 191616  }
   0xd   : > { %939 = vmatprep.subr.bf16.mxu1 %v1040_v0  ;;  %941 = vmatprep.mubr.msk.bf16.mxu1 %vm1041_vm0, %v1040_v0  ;;  %s200_s17 = scalar_lea.vmem %s1210_s1, %s1082_s14  ;;  %s195_s20 = scalar_lea.vmem %s1209_s0, %s1082_s14  ;;  %v1097_v5 = vshrl.u32 %v218_v4, 7  ;;  %v1099_v6 = vand.u32 127, %v218_v4  ;;  %vm789_vm8 = vcmask 257216  }
   0xe   : > { %v997_v1 = vld [vmem:[%s200_s17] sm:$0xff]   ;;  %s205_s25 = scalar_lea.vmem %s1211_s2, %s1082_s14  ;;  %s1151_s29 = scalar_lea.vmem %s1212_s3, %s1082_s14 }
   0xf   : > { %v240_v2 = vsel %vm235_vm1, %v997_v1, 0  ;;  %v998_v3 = vld [vmem:[%s195_s20] sm:$0xff]   ;;  %vm223_vm2 = vcmp.gt.s32.totalorder %v1099_v6, %v1097_v5  ;;  %v1104_v8 = vadd.s32 8, %v1097_v5 }
  0x10   : > { %934 = vmatpush3.bf16.xpose.msra.mxu0 %v240_v2  ;;  %v1124_v28 = vld [vmem:[%s205_s25] sm:$0xff]  }
  0x11   : > { %951 = vmatprep.subr.bf16.mxu0 %v1040_v0  ;;  %vm224_vm4 = vcmp.gt.s32.totalorder %v1099_v6, %v1104_v8  ;;  %940 = vmatpush3.bf16.msra.mxu1 %v1124_v28 }
  0x12   : > { %945 = vmatprep.subr.bf16.mxu1 %v1040_v0 }
  0x17   : > { %936 = vmatmul.mubr.msk.bf16.vlgmr.msra.gmra.mxu0 %vm235_vm1, %v998_v3 }
  0x18   : > { %953 = vmatprep.mubr.msk.bf16.mxu0 %vm1041_vm0, %v1040_v0 }
  0xd7   : > { %v276_v7 = vpop.f32.mrf.mxu0 }
  0xd8   : > { %v283_v9 = vmul.f32 0.35355338, %v276_v7 }
  0xd9   : > { %v937_v10 = vpop.f32.mrf.mxu0 }
  0xda   : > { %v285_v11 = vsel %vm223_vm2, -inf, %v283_v9 }
  0xdb   : > { %v279_v12 = vpop.f32.mrf.mxu0  ;;  %v288_v13 = vsel %vm287_vm3, %v285_v11, -inf }
  0xdc   : > { %v284_v14 = vmul.f32 0.35355338, %v279_v12  ;;  %289 = vmax.xlane.f32.xlu0 %v288_v13 }
  0xdd   : > { %v938_v15 = vpop.f32.mrf.mxu0 }
  0xde   : > { %v286_v16 = vsel %vm224_vm4, -inf, %v284_v14 }
  0xdf   : > { %v291_v17 = vsel %vm287_vm3, %v286_v16, -inf }
  0xe0   : > { %292 = vmax.xlane.f32.xlu0 %v291_v17 }
  0xf6   : > { %374 = vrot.lane.b32.xlu0 %v997_v1, %s1042_s21 }
  0xfa   : > { %654 = vrot.lane.b32.xlu0 %v997_v1, %s1043_s22 }
 0x165   : > { %v290_v18 = vpop.xlane.xlu0 %289 }
 0x166   : > { %v294_v19 = vsub.f32 %v285_v11, %v290_v18 }
 0x168   : > { %v296_v20 = vmul.f32 1.442695, %v294_v19 }
 0x169   : > { %v293_v21 = vpop.xlane.xlu0 %292 }
 0x16a   : > { %1000 = vpow2.f32 %v296_v20  ;;  %v295_v22 = vsub.f32 %v286_v16, %v293_v21 }
 0x16c   : > { %v298_v23 = vmul.f32 1.442695, %v295_v22 }
 0x16d   : > { %v375_v33 = vpop.permute.xlu0 %374 }
 0x16e   : > { %1002 = vpow2.f32 %v298_v23  ;;  %v380_v37 = vsel %vm235_vm1, %v375_v33, 0 }
 0x171   : > { %v655_v41 = vpop.permute.xlu0 %654 }
 0x172   : > { %v660_v43 = vsel %vm235_vm1, %v655_v41, 0 }
 0x177   : > { %v1001_v24 = vpop.eup %1000 }
 0x178   : > { %v300_v25 = vsel %vm287_vm3, %v1001_v24, 0.0 }
 0x179   : > { %301 = vadd.xlane.f32.xlu1 %v300_v25 }
 0x17b   : > { %v1003_v26 = vpop.eup %1002 }
 0x17c   : > { %v303_v27 = vsel %vm287_vm3, %v1003_v26, 0.0 }
 0x17d   : > { %304 = vadd.xlane.f32.xlu1 %v303_v27 }
 0x18e   : > { %372 = vrot.lane.b32.xlu1 %v998_v3, %s1042_s21 }
 0x192   : > { %514 = vrot.lane.b32.xlu1 %v997_v1, %s1044_s26 }
 0x196   : > { %512 = vrot.lane.b32.xlu1 %v998_v3, %s1044_s26 }
 0x19a   : > { %652 = vrot.lane.b32.xlu1 %v998_v3, %s1043_s22 }
 0x202   : > { %v302_v29 = vpop.xlane.xlu1 %301 }
 0x203   : > { %1004 = vrcp.f32 %v302_v29 }
 0x206   : > { %v305_v30 = vpop.xlane.xlu1 %304 }
 0x207   : > { %1006 = vrcp.f32 %v305_v30 }
 0x20a   : > { %v373_v36 = vpop.permute.xlu1 %372 }
 0x20e   : > { %v515_v39 = vpop.permute.xlu1 %514 }
 0x20f   : > { %v520_v40 = vsel %vm235_vm1, %v515_v39, 0 }
 0x210   : > { %v1005_v31 = vpop.eup %1004 }
 0x211   : > { %v307_v34 = vmul.f32 %v1005_v31, %v1001_v24 }
 0x212   : > { %v513_v42 = vpop.permute.xlu1 %512 }
 0x214   : > { %v1007_v32 = vpop.eup %1006 }
 0x215   : > { %v309_v35 = vmul.f32 %v1007_v32, %v1003_v26 }
 0x216   : > { %v653_v44 = vpop.permute.xlu1 %652 }
 0x217   : > { %v310_v38 = vpack.c.bf16 %v309_v35, %v307_v34 }
 0x219   : > { %942 = vmatmul.mubr.msk.bf16.vlgmr.msra.gmra.mxu1 %vm287_vm3, %v310_v38 }
 0x21a   : > { %946 = vmatpush3.bf16.xpose.msra.mxu1 %v380_v37  ;;  %947 = vmatprep.mubr.msk.bf16.mxu1 %vm1041_vm0, %v1040_v0 }
 0x21b   : > { %957 = vmatprep.subr.bf16.mxu1 %v1040_v0 }
 0x221   : > { %948 = vmatmul.mubr.msk.bf16.vlgmr.msra.gmra.mxu1 %vm235_vm1, %v373_v36 }
 0x222   : > { %958 = vmatpush3.bf16.xpose.msra.mxu1 %v520_v40  ;;  %959 = vmatprep.mubr.msk.bf16.mxu1 %vm1041_vm0, %v1040_v0 }
 0x223   : > { %969 = vmatprep.subr.bf16.mxu1 %v1040_v0 }
 0x229   : > { %960 = vmatmul.mubr.msk.bf16.vlgmr.msra.gmra.mxu1 %vm235_vm1, %v513_v42 }
 0x22a   : > { %970 = vmatpush3.bf16.xpose.msra.mxu1 %v660_v43  ;;  %971 = vmatprep.mubr.msk.bf16.mxu1 %vm1041_vm0, %v1040_v0 }
 0x231   : > { %972 = vmatmul.mubr.msk.bf16.vlgmr.msra.gmra.mxu1 %vm235_vm1, %v653_v44 }
 0x2d9   : > { %v354_v45 = vpop.f32.mrf.mxu1 }
 0x2da   : > { %v909_v46 = vpack.c.bf16 %v354_v45, %v354_v45 }
 0x2db   : > { %v943_v47 = vpop.f32.mrf.mxu1 }
 0x2dc   : > { %370 = vst.msk [vmem:[%s1151_s29] sm:$0xf] %vm369_vm5, %v909_v46 }
 0x2dd   : > { %v357_v48 = vpop.f32.mrf.mxu1 }
 0x2de   : > { %v910_v49 = vpack.c.bf16 %v357_v48, %v357_v48 }
 0x2df   : > { %v944_v50 = vpop.f32.mrf.mxu1 }
 0x2e0   : > { %371 = vst.msk [vmem:[%s1151_s29 + $0x4] sm:$0xf] %vm369_vm5, %v910_v49 }
 0x2e1   : > { %v416_v51 = vpop.f32.mrf.mxu1 }
 0x2e2   : > { %v423_v52 = vmul.f32 0.35355338, %v416_v51 }
 0x2e3   : > { %v949_v53 = vpop.f32.mrf.mxu1 }
 0x2e4   : > { %v425_v54 = vsel %vm223_vm2, -inf, %v423_v52 }
 0x2e5   : > { %v419_v55 = vpop.f32.mrf.mxu1  ;;  %v427_v56 = vsel %vm287_vm3, %v425_v54, -inf }
 0x2e6   : > { %v424_v57 = vmul.f32 0.35355338, %v419_v55  ;;  %428 = vmax.xlane.f32.xlu0 %v427_v56 }
 0x2e7   : > { %v950_v58 = vpop.f32.mrf.mxu1 }
 0x2e8   : > { %v426_v59 = vsel %vm224_vm4, -inf, %v424_v57 }
 0x2e9   : > { %v556_v60 = vpop.f32.mrf.mxu1  ;;  %v430_v61 = vsel %vm287_vm3, %v426_v59, -inf }
 0x2ea   : > { %v563_v62 = vmul.f32 0.35355338, %v556_v60  ;;  %431 = vmax.xlane.f32.xlu1 %v430_v61 }
 0x2eb   : > { %v961_v63 = vpop.f32.mrf.mxu1 }
 0x2ec   : > { %v565_v1 = vsel %vm223_vm2, -inf, %v563_v62 }
 0x2ed   : > { %v559_v2 = vpop.f32.mrf.mxu1  ;;  %v567_v3 = vsel %vm287_vm3, %v565_v1, -inf }
 0x2ee   : > { %v564_v4 = vmul.f32 0.35355338, %v559_v2  ;;  %568 = vmax.xlane.f32.xlu0 %v567_v3 }
 0x2ef   : > { %v962_v7 = vpop.f32.mrf.mxu1 }
 0x2f0   : > { %v566_v9 = vsel %vm224_vm4, -inf, %v564_v4 }
 0x2f1   : > { %v696_v10 = vpop.f32.mrf.mxu1  ;;  %v570_v11 = vsel %vm287_vm3, %v566_v9, -inf }
 0x2f2   : > { %v703_v12 = vmul.f32 0.35355338, %v696_v10  ;;  %571 = vmax.xlane.f32.xlu0 %v570_v11 }
 0x2f3   : > { %v973_v13 = vpop.f32.mrf.mxu1 }
 0x2f4   : > { %v705_v14 = vsel %vm223_vm2, -inf, %v703_v12 }
 0x2f5   : > { %v699_v15 = vpop.f32.mrf.mxu1  ;;  %v707_v16 = vsel %vm287_vm3, %v705_v14, -inf }
 0x2f6   : > { %v704_v17 = vmul.f32 0.35355338, %v699_v15  ;;  %708 = vmax.xlane.f32.xlu0 %v707_v16 }
 0x2f7   : > { %v974_v18 = vpop.f32.mrf.mxu1 }
 0x2f8   : > { %v706_v19 = vsel %vm224_vm4, -inf, %v704_v17 }
 0x2f9   : > { %v710_v20 = vsel %vm287_vm3, %v706_v19, -inf }
 0x2fa   : > { %711 = vmax.xlane.f32.xlu1 %v710_v20 }
 0x36f   : > { %v429_v21 = vpop.xlane.xlu0 %428 }
 0x370   : > { %v433_v22 = vsub.f32 %v425_v54, %v429_v21 }
 0x372   : > { %v435_v23 = vmul.f32 1.442695, %v433_v22 }
 0x373   : > { %v432_v24 = vpop.xlane.xlu1 %431 }
 0x374   : > { %1008 = vpow2.f32 %v435_v23  ;;  %v434_v5 = vsub.f32 %v426_v59, %v432_v24 }
 0x376   : > { %v437_v25 = vmul.f32 1.442695, %v434_v5 }
 0x377   : > { %v569_v26 = vpop.xlane.xlu0 %568 }
 0x378   : > { %1010 = vpow2.f32 %v437_v25  ;;  %v573_v27 = vsub.f32 %v565_v1, %v569_v26 }
 0x37a   : > { %v575_v29 = vmul.f32 1.442695, %v573_v27 }
 0x37b   : > { %v572_v30 = vpop.xlane.xlu0 %571 }
 0x37c   : > { %1012 = vpow2.f32 %v575_v29  ;;  %v574_v31 = vsub.f32 %v566_v9, %v572_v30 }
 0x37e   : > { %v577_v32 = vmul.f32 1.442695, %v574_v31 }
 0x37f   : > { %v709_v6 = vpop.xlane.xlu0 %708 }
 0x380   : > { %1014 = vpow2.f32 %v577_v32  ;;  %v713_v8 = vsub.f32 %v705_v14, %v709_v6 }
 0x381   : > { %v1009_v33 = vpop.eup %1008 }
 0x382   : > { %v715_v34 = vmul.f32 1.442695, %v713_v8  ;;  %v439_v35 = vsel %vm287_vm3, %v1009_v33, 0.0 }
 0x383   : > { %440 = vadd.xlane.f32.xlu0 %v439_v35  ;;  %v712_v44 = vpop.xlane.xlu1 %711 }
 0x384   : > { %1016 = vpow2.f32 %v715_v34  ;;  %v714_v45 = vsub.f32 %v706_v19, %v712_v44 }
 0x385   : > { %v1011_v36 = vpop.eup %1010 }
 0x386   : > { %v442_v37 = vsel %vm287_vm3, %v1011_v36, 0.0  ;;  %v717_v46 = vmul.f32 1.442695, %v714_v45 }
 0x387   : > { %443 = vadd.xlane.f32.xlu1 %v442_v37 }
 0x388   : > { %1018 = vpow2.f32 %v717_v46 }
 0x389   : > { %v1013_v38 = vpop.eup %1012 }
 0x38a   : > { %v579_v39 = vsel %vm287_vm3, %v1013_v38, 0.0 }
 0x38b   : > { %580 = vadd.xlane.f32.xlu0 %v579_v39 }
 0x38d   : > { %v1015_v40 = vpop.eup %1014 }
 0x38e   : > { %v582_v41 = vsel %vm287_vm3, %v1015_v40, 0.0 }
 0x38f   : > { %583 = vadd.xlane.f32.xlu1 %v582_v41 }
 0x391   : > { %v1017_v42 = vpop.eup %1016 }
 0x392   : > { %v719_v43 = vsel %vm287_vm3, %v1017_v42, 0.0 }
 0x393   : > { %720 = vadd.xlane.f32.xlu0 %v719_v43 }
 0x395   : > { %v1019_v47 = vpop.eup %1018 }
 0x396   : > { %v722_v48 = vsel %vm287_vm3, %v1019_v47, 0.0 }
 0x3a0   : > { %590 = vrot.lane.b32.xlu1 %v1124_v28, %s1044_s26 }
 0x3a9   : > { %450 = vrot.lane.b32.xlu0 %v1124_v28, %s1042_s21 }
 0x3c4   : > { %723 = vadd.xlane.f32.xlu1 %v722_v48 }
 0x3d5   : > { %730 = vrot.lane.b32.xlu1 %v1124_v28, %s1043_s22 }
 0x40c   : > { %v441_v49 = vpop.xlane.xlu0 %440 }
 0x40d   : > { %1020 = vrcp.f32 %v441_v49 }
 0x410   : > { %v444_v50 = vpop.xlane.xlu1 %443 }
 0x411   : > { %1022 = vrcp.f32 %v444_v50 }
 0x414   : > { %v581_v51 = vpop.xlane.xlu0 %580 }
 0x415   : > { %1024 = vrcp.f32 %v581_v51 }
 0x418   : > { %v584_v52 = vpop.xlane.xlu1 %583 }
 0x419   : > { %1026 = vrcp.f32 %v584_v52 }
 0x41a   : > { %v1021_v53 = vpop.eup %1020 }
 0x41b   : > { %v446_v56 = vmul.f32 %v1021_v53, %v1009_v33 }
 0x41c   : > { %v721_v54 = vpop.xlane.xlu0 %720  ;;  %v591_v28 = vpop.permute.xlu1 %590 }
 0x41d   : > { %1028 = vrcp.f32 %v721_v54 }
 0x41e   : > { %v1023_v55 = vpop.eup %1022 }
 0x41f   : > { %v448_v57 = vmul.f32 %v1023_v55, %v1011_v36 }
 0x420   : > { %v451_v58 = vpop.permute.xlu0 %450 }
 0x421   : > { %952 = vmatpush3.bf16.msra.mxu0 %v451_v58  ;;  %v449_v59 = vpack.c.bf16 %v448_v57, %v446_v56 }
 0x422   : > { %963 = vmatprep.subr.bf16.mxu0 %v1040_v0  ;;  %v1025_v60 = vpop.eup %1024 }
 0x423   : > { %v586_v62 = vmul.f32 %v1025_v60, %v1013_v38 }
 0x424   : > { %954 = vmatmul.mubr.msk.bf16.vlgmr.msra.gmra.mxu0 %vm287_vm3, %v449_v59 }
 0x425   : > { %964 = vmatpush3.bf16.msra.mxu0 %v591_v28  ;;  %965 = vmatprep.mubr.msk.bf16.mxu0 %vm1041_vm0, %v1040_v0 }
 0x426   : > { %v1027_v61 = vpop.eup %1026  ;;  %975 = vmatprep.subr.bf16.mxu0 %v1040_v0 }
 0x427   : > { %v588_v63 = vmul.f32 %v1027_v61, %v1015_v40 }
 0x429   : > { %v589_v1 = vpack.c.bf16 %v588_v63, %v586_v62 }
 0x42a   : > { %v1029_v4 = vpop.eup %1028 }
 0x42b   : > { %v726_v9 = vmul.f32 %v1029_v4, %v1017_v42 }
 0x42c   : > { %966 = vmatmul.mubr.msk.bf16.vlgmr.msra.gmra.mxu0 %vm287_vm3, %v589_v1 }
 0x42d   : > { %977 = vmatprep.mubr.msk.bf16.mxu0 %vm1041_vm0, %v1040_v0 }
 0x44d   : > { %v724_v2 = vpop.xlane.xlu1 %723 }
 0x44e   : > { %1030 = vrcp.f32 %v724_v2 }
 0x451   : > { %v731_v3 = vpop.permute.xlu1 %730 }
 0x452   : > { %976 = vmatpush3.bf16.msra.mxu0 %v731_v3 }
 0x45b   : > { %v1031_v7 = vpop.eup %1030 }
 0x45c   : > { %v728_v10 = vmul.f32 %v1031_v7, %v1019_v47 }
 0x45e   : > { %v729_v11 = vpack.c.bf16 %v728_v10, %v726_v9 }
 0x460   : > { %978 = vmatmul.mubr.msk.bf16.vlgmr.msra.gmra.mxu0 %vm287_vm3, %v729_v11 }
 0x4e4   : > { %v490_v12 = vpop.f32.mrf.mxu0 }
 0x4e5   : > { %v911_v13 = vpack.c.bf16 %v490_v12, %v490_v12 }
 0x4e6   : > { %v955_v14 = vpop.f32.mrf.mxu0 }
 0x4e7   : > { %503 = vrot.lane.b32.xlu1 %v911_v13, %s1045_s30 }
 0x4e8   : > { %v493_v15 = vpop.f32.mrf.mxu0 }
 0x4e9   : > { %v912_v16 = vpack.c.bf16 %v493_v15, %v493_v15 }
 0x4ea   : > { %v956_v0 = vpop.f32.mrf.mxu0 }
 0x4eb   : > { %505 = vrot.lane.b32.xlu0 %v912_v16, %s1045_s30 }
 0x4ec   : > { %v630_v17 = vpop.f32.mrf.mxu0 }
 0x4ed   : > { %v913_v18 = vpack.c.bf16 %v630_v17, %v630_v17 }
 0x4ee   : > { %v967_v19 = vpop.f32.mrf.mxu0 }
 0x4ef   : > { %643 = vrot.lane.b32.xlu1 %v913_v18, %s1046_s4 }
 0x4f0   : > { %v633_v20 = vpop.f32.mrf.mxu0 }
 0x4f1   : > { %v914_v21 = vpack.c.bf16 %v633_v20, %v633_v20 }
 0x4f2   : > { %v968_v22 = vpop.f32.mrf.mxu0 }
 0x4f3   : > { %645 = vrot.lane.b32.xlu0 %v914_v21, %s1046_s4 }
 0x520   : > { %v770_v23 = vpop.f32.mrf.mxu0 }
 0x521   : > { %v915_v24 = vpack.c.bf16 %v770_v23, %v770_v23 }
 0x522   : > { %v979_v5 = vpop.f32.mrf.mxu0 }
 0x523   : > { %783 = vrot.lane.b32.xlu1 %v915_v24, %s1047_s5 }
 0x524   : > { %v773_v25 = vpop.f32.mrf.mxu0 }
 0x525   : > { %v916_v26 = vpack.c.bf16 %v773_v25, %v773_v25 }
 0x526   : > { %v980_v27 = vpop.f32.mrf.mxu0 }
 0x527   : > { %785 = vrot.lane.b32.xlu0 %v916_v26, %s1047_s5 }
 0x559   : > { %v504_v29 = vpop.permute.xlu1 %503 }
 0x55a   : > { %510 = vst.msk [vmem:[%s1151_s29] sm:$0xf] %vm509_vm6, %v504_v29 }
 0x55d   : > { %v506_v30 = vpop.permute.xlu0 %505 }
 0x55e   : > { %511 = vst.msk [vmem:[%s1151_s29 + $0x4] sm:$0xf] %vm509_vm6, %v506_v30 }
 0x561   : > { %v644_v31 = vpop.permute.xlu1 %643 }
 0x562   : > { %650 = vst.msk [vmem:[%s1151_s29] sm:$0xf] %vm649_vm7, %v644_v31 }
 0x565   : > { %v646_v32 = vpop.permute.xlu0 %645 }
 0x566   : > { %651 = vst.msk [vmem:[%s1151_s29 + $0x4] sm:$0xf] %vm649_vm7, %v646_v32 }
 0x595   : > { %v784_v6 = vpop.permute.xlu1 %783 }
 0x596   : > { %790 = vst.msk [vmem:[%s1151_s29] sm:$0xf] %vm789_vm8, %v784_v6 }
 0x599   : > { %v786_v8 = vpop.permute.xlu0 %785 }
 0x59a   : > { %791 = vst.msk [vmem:[%s1151_s29 + $0x4] sm:$0xf] %vm789_vm8, %v786_v8 }
 0x59b PF: > { %s13_s12 = sadd.s32 1, %s1038_s12  }
 0x59c   : > { %p10_p4 = scmp.ge.s32.totalorder %s13_s12, 4  }
 0x59e   :  { %12 = sbr.rel (!%p10_p4) target bundleno = 1 (0x1), region = 68 }

// kernel: informer_forward.39
= control target key start
LH: loop header
LB: loop body
LE: loop exit
PB: predicated region body
PF: predicated region fallthrough
CT: control target
= control target key end

     0   :  { %s1045_s12 = smov 0   ;;  %s1160_s0 = inlined_call_operand.vmem [shape: bf16[2,16,32], index: 0, kind: input, shape index: {}]   ;;  %s1161_s1 = inlined_call_operand.vmem [shape: bf16[2,8,32], index: 1, kind: input, shape index: {}]   ;;  %s1162_s2 = inlined_call_operand.vmem [shape: bf16[2,8,32], index: 2, kind: input, shape index: {}]   ;;  %s1163_s3 = inlined_call_operand.vmem [shape: bf16[2,16,32], index: 3, kind: output, shape index: {}]  }
   0x1 LB: > { %s852_s13 = sadd.s32 4294967295, %s1015_s12   ;;  %p856_p0 = scmp.ge.s32.totalorder %s1015_s12, 1  ;;  %s1015_s12 = sphi %s1045_s12, %s13_s12  }
   0x2   : > { %p155_p1 = scmp.lt.s32.totalorder %s1015_s12, 3 }
   0x4   : > { %p156_p2 = pnand %p856_p0, %p155_p1 }
   0x5   : > { %p187_p3 = scmp.lt.s32.totalorder (!%p156_p2), %s852_s13, 1  ;;  %s1019_s22 = smov (!%p156_p2), 120  }
   0x6   : > { %159 = sbr.rel (%p156_p2) target bundleno = 1433 (0x599), region = 32  ;;  %s1020_s23 = smov (!%p156_p2), 104  }
   0x7   : > { %s1021_s27 = smov (!%p156_p2), 112   ;;  %s1022_s4 = smov (!%p156_p2), 8  }
   0x8   : > { %s1023_s5 = smov (!%p156_p2), 16   ;;  %s1024_s6 = smov (!%p156_p2), 24  }
   0xb   : > { %v1017_v0 = vmov 0.0   ;;  %vm1018_vm0 = vmmov 0   ;;  %s1165_s13 = smov (!%p187_p3, %s852_s13), 1  ;;  %vm215_vm1 = vcmask 64512   ;;  %vm291_vm2 = vcmask 1043456  }
   0xc   : > { %910 = vmatprep.subr.bf16.mxu0 %v1017_v0  ;;  %912 = vmatprep.mubr.msk.bf16.mxu0 %vm1018_vm0, %v1017_v0  ;;  %s884_s14 = sshll.u32 %s1165_s13, 3  ;;  %s859_s15 = sshll.u32 %s1165_s13, 2  ;;  %vm344_vm3 = vcmask 60416   ;;  %vm490_vm4 = vcmask 126016   ;;  %vm630_vm5 = vcmask 191616   ;;  %vm770_vm6 = vcmask 257216  }
   0xd   : > { %916 = vmatprep.subr.bf16.mxu1 %v1017_v0  ;;  %918 = vmatprep.mubr.msk.bf16.mxu1 %vm1018_vm0, %v1017_v0  ;;  %s191_s18 = scalar_lea.vmem %s1160_s0, %s884_s14  ;;  %s195_s21 = scalar_lea.vmem %s1161_s1, %s859_s15 }
   0xe   : > { %v208_v1 = vld [vmem:[%s195_s21] sm:$0xf]  ;;  %s199_s26 = scalar_lea.vmem %s1162_s2, %s859_s15  ;;  %s1118_s30 = scalar_lea.vmem %s1163_s3, %s884_s14 }
   0xf   : > { %v220_v2 = vsel %vm215_vm1, %v208_v1, 0  ;;  %v975_v3 = vld [vmem:[%s191_s18] sm:$0xff]   ;;  %v868_v12 = vcombine.low %v208_v1, %v208_v1 }
  0x10   : > { %911 = vmatpush3.bf16.xpose.msra.mxu0 %v220_v2  ;;  %v1089_v23 = vld [vmem:[%s199_s26] sm:$0xf] }
  0x11   : > { %928 = vmatprep.subr.bf16.mxu0 %v1017_v0  ;;  %v293_v24 = vsel %vm291_vm2, %v1089_v23, 0 }
  0x12   : > { %917 = vmatpush3.bf16.msra.mxu1 %v293_v24 }
  0x13   : > { %922 = vmatprep.subr.bf16.mxu1 %v1017_v0 }
  0x17   : > { %913 = vmatmul.mubr.msk.bf16.vlgmr.msra.gmra.mxu0 %vm215_vm1, %v975_v3 }
  0x18   : > { %930 = vmatprep.mubr.msk.bf16.mxu0 %vm1018_vm0, %v1017_v0 }
  0xd7   : > { %v256_v4 = vpop.f32.mrf.mxu0 }
  0xd8   : > { %v263_v5 = vmul.f32 0.35355338, %v256_v4 }
  0xd9   : > { %v914_v6 = vpop.f32.mrf.mxu0 }
  0xda   : > { %v265_v7 = vsel %vm215_vm1, %v263_v5, -inf }
  0xdb   : > { %266 = vmax.xlane.f32.xlu0 %v265_v7  ;;  %v259_v8 = vpop.f32.mrf.mxu0 }
  0xdc   : > { %v264_v9 = vmul.f32 0.35355338, %v259_v8 }
  0xdd   : > { %v915_v10 = vpop.f32.mrf.mxu0 }
  0xde   : > { %v268_v11 = vsel %vm215_vm1, %v264_v9, -inf }
  0xdf   : > { %269 = vmax.xlane.f32.xlu0 %v268_v11 }
  0xf5   : > { %352 = vrot.lane.b32.xlu0 %v868_v12, %s1019_s22 }
  0xf9   : > { %635 = vrot.lane.b32.xlu0 %v868_v12, %s1020_s23 }
 0x164   : > { %v267_v13 = vpop.xlane.xlu0 %266 }
 0x165   : > { %v271_v14 = vsub.f32 %v263_v5, %v267_v13 }
 0x167   : > { %v273_v15 = vmul.f32 1.442695, %v271_v14 }
 0x168   : > { %v270_v16 = vpop.xlane.xlu0 %269 }
 0x169   : > { %977 = vpow2.f32 %v273_v15  ;;  %v272_v17 = vsub.f32 %v264_v9, %v270_v16 }
 0x16b   : > { %v275_v18 = vmul.f32 1.442695, %v272_v17 }
 0x16c   : > { %v353_v29 = vpop.permute.xlu0 %352 }
 0x16d   : > { %979 = vpow2.f32 %v275_v18  ;;  %v358_v33 = vsel %vm215_vm1, %v353_v29, 0 }
 0x170   : > { %v636_v37 = vpop.permute.xlu0 %635 }
 0x171   : > { %v641_v39 = vsel %vm215_vm1, %v636_v37, 0 }
 0x176   : > { %v978_v19 = vpop.eup %977 }
 0x177   : > { %v277_v20 = vsel %vm215_vm1, %v978_v19, 0.0 }
 0x178   : > { %278 = vadd.xlane.f32.xlu1 %v277_v20 }
 0x17a   : > { %v980_v21 = vpop.eup %979 }
 0x17b   : > { %v280_v22 = vsel %vm215_vm1, %v980_v21, 0.0 }
 0x17c   : > { %281 = vadd.xlane.f32.xlu1 %v280_v22 }
 0x18d   : > { %347 = vrot.lane.b32.xlu1 %v975_v3, %s1019_s22 }
 0x191   : > { %495 = vrot.lane.b32.xlu1 %v868_v12, %s1021_s27 }
 0x195   : > { %493 = vrot.lane.b32.xlu1 %v975_v3, %s1021_s27 }
 0x199   : > { %633 = vrot.lane.b32.xlu1 %v975_v3, %s1020_s23 }
 0x201   : > { %v279_v25 = vpop.xlane.xlu1 %278 }
 0x202   : > { %981 = vrcp.f32 %v279_v25 }
 0x205   : > { %v282_v26 = vpop.xlane.xlu1 %281 }
 0x206   : > { %983 = vrcp.f32 %v282_v26 }
 0x209   : > { %v348_v32 = vpop.permute.xlu1 %347 }
 0x20d   : > { %v496_v35 = vpop.permute.xlu1 %495 }
 0x20e   : > { %v501_v36 = vsel %vm215_vm1, %v496_v35, 0 }
 0x20f   : > { %v982_v27 = vpop.eup %981 }
 0x210   : > { %v284_v30 = vmul.f32 %v982_v27, %v978_v19 }
 0x211   : > { %v494_v38 = vpop.permute.xlu1 %493 }
 0x213   : > { %v984_v28 = vpop.eup %983 }
 0x214   : > { %v286_v31 = vmul.f32 %v984_v28, %v980_v21 }
 0x215   : > { %v634_v40 = vpop.permute.xlu1 %633 }
 0x216   : > { %v287_v34 = vpack.c.bf16 %v286_v31, %v284_v30 }
 0x218   : > { %919 = vmatmul.mubr.msk.bf16.vlgmr.msra.gmra.mxu1 %vm215_vm1, %v287_v34  ;;  %v870_v34 = vcombine.low %v1089_v23, %v1089_v23 }
 0x219   : > { %923 = vmatpush3.bf16.xpose.msra.mxu1 %v358_v33  ;;  %924 = vmatprep.mubr.msk.bf16.mxu1 %vm1018_vm0, %v1017_v0 }
 0x21a   : > { %934 = vmatprep.subr.bf16.mxu1 %v1017_v0 }
 0x220   : > { %925 = vmatmul.mubr.msk.bf16.vlgmr.msra.gmra.mxu1 %vm215_vm1, %v348_v32 }
 0x221   : > { %935 = vmatpush3.bf16.xpose.msra.mxu1 %v501_v36  ;;  %936 = vmatprep.mubr.msk.bf16.mxu1 %vm1018_vm0, %v1017_v0 }
 0x222   : > { %946 = vmatprep.subr.bf16.mxu1 %v1017_v0 }
 0x228   : > { %937 = vmatmul.mubr.msk.bf16.vlgmr.msra.gmra.mxu1 %vm215_vm1, %v494_v38 }
 0x229   : > { %947 = vmatpush3.bf16.xpose.msra.mxu1 %v641_v39  ;;  %948 = vmatprep.mubr.msk.bf16.mxu1 %vm1018_vm0, %v1017_v0 }
 0x230   : > { %949 = vmatmul.mubr.msk.bf16.vlgmr.msra.gmra.mxu1 %vm215_vm1, %v634_v40 }
 0x2d8   : > { %v329_v41 = vpop.f32.mrf.mxu1 }
 0x2d9   : > { %v886_v42 = vpack.c.bf16 %v329_v41, %v329_v41 }
 0x2da   : > { %v920_v43 = vpop.f32.mrf.mxu1 }
 0x2db   : > { %345 = vst.msk [vmem:[%s1118_s30] sm:$0xf] %vm344_vm3, %v886_v42 }
 0x2dc   : > { %v332_v44 = vpop.f32.mrf.mxu1 }
 0x2dd   : > { %v887_v45 = vpack.c.bf16 %v332_v44, %v332_v44 }
 0x2de   : > { %v921_v46 = vpop.f32.mrf.mxu1 }
 0x2df   : > { %346 = vst.msk [vmem:[%s1118_s30 + $0x4] sm:$0xf] %vm344_vm3, %v887_v45 }
 0x2e0   : > { %v394_v47 = vpop.f32.mrf.mxu1 }
 0x2e1   : > { %v401_v48 = vmul.f32 0.35355338, %v394_v47 }
 0x2e2   : > { %v926_v49 = vpop.f32.mrf.mxu1 }
 0x2e3   : > { %v403_v50 = vsel %vm215_vm1, %v401_v48, -inf }
 0x2e4   : > { %404 = vmax.xlane.f32.xlu0 %v403_v50  ;;  %v397_v51 = vpop.f32.mrf.mxu1 }
 0x2e5   : > { %v402_v52 = vmul.f32 0.35355338, %v397_v51 }
 0x2e6   : > { %v927_v53 = vpop.f32.mrf.mxu1 }
 0x2e7   : > { %v406_v54 = vsel %vm215_vm1, %v402_v52, -inf }
 0x2e8   : > { %407 = vmax.xlane.f32.xlu1 %v406_v54  ;;  %v537_v55 = vpop.f32.mrf.mxu1 }
 0x2e9   : > { %v544_v56 = vmul.f32 0.35355338, %v537_v55 }
 0x2ea   : > { %v938_v57 = vpop.f32.mrf.mxu1 }
 0x2eb   : > { %v546_v58 = vsel %vm215_vm1, %v544_v56, -inf }
 0x2ec   : > { %547 = vmax.xlane.f32.xlu0 %v546_v58  ;;  %v540_v59 = vpop.f32.mrf.mxu1 }
 0x2ed   : > { %v545_v60 = vmul.f32 0.35355338, %v540_v59 }
 0x2ee   : > { %v939_v61 = vpop.f32.mrf.mxu1 }
 0x2ef   : > { %v549_v62 = vsel %vm215_vm1, %v545_v60, -inf }
 0x2f0   : > { %550 = vmax.xlane.f32.xlu0 %v549_v62  ;;  %v677_v63 = vpop.f32.mrf.mxu1 }
 0x2f1   : > { %v684_v1 = vmul.f32 0.35355338, %v677_v63 }
 0x2f2   : > { %v950_v2 = vpop.f32.mrf.mxu1 }
 0x2f3   : > { %v686_v3 = vsel %vm215_vm1, %v684_v1, -inf }
 0x2f4   : > { %687 = vmax.xlane.f32.xlu0 %v686_v3  ;;  %v680_v4 = vpop.f32.mrf.mxu1 }
 0x2f5   : > { %v685_v5 = vmul.f32 0.35355338, %v680_v4 }
 0x2f6   : > { %v951_v6 = vpop.f32.mrf.mxu1 }
 0x2f7   : > { %v689_v7 = vsel %vm215_vm1, %v685_v5, -inf }
 0x2f8   : > { %690 = vmax.xlane.f32.xlu1 %v689_v7 }
 0x36d   : > { %v405_v8 = vpop.xlane.xlu0 %404 }
 0x36e   : > { %v409_v9 = vsub.f32 %v401_v48, %v405_v8 }
 0x370   : > { %v411_v10 = vmul.f32 1.442695, %v409_v9 }
 0x371   : > { %v408_v11 = vpop.xlane.xlu1 %407 }
 0x372   : > { %985 = vpow2.f32 %v411_v10  ;;  %v410_v12 = vsub.f32 %v402_v52, %v408_v11 }
 0x374   : > { %v413_v13 = vmul.f32 1.442695, %v410_v12 }
 0x375   : > { %v548_v14 = vpop.xlane.xlu0 %547 }
 0x376   : > { %987 = vpow2.f32 %v413_v13  ;;  %v552_v15 = vsub.f32 %v544_v56, %v548_v14 }
 0x378   : > { %v554_v16 = vmul.f32 1.442695, %v552_v15 }
 0x379   : > { %v551_v17 = vpop.xlane.xlu0 %550 }
 0x37a   : > { %989 = vpow2.f32 %v554_v16  ;;  %v553_v18 = vsub.f32 %v545_v60, %v551_v17 }
 0x37c   : > { %v556_v19 = vmul.f32 1.442695, %v553_v18 }
 0x37d   : > { %v688_v20 = vpop.xlane.xlu0 %687 }
 0x37e   : > { %991 = vpow2.f32 %v556_v19  ;;  %v692_v21 = vsub.f32 %v684_v1, %v688_v20 }
 0x37f   : > { %v986_v22 = vpop.eup %985 }
 0x380   : > { %v694_v24 = vmul.f32 1.442695, %v692_v21  ;;  %v415_v25 = vsel %vm215_vm1, %v986_v22, 0.0 }
 0x381   : > { %416 = vadd.xlane.f32.xlu0 %v415_v25  ;;  %v691_v35 = vpop.xlane.xlu1 %690 }
 0x382   : > { %993 = vpow2.f32 %v694_v24  ;;  %v693_v36 = vsub.f32 %v685_v5, %v691_v35 }
 0x383   : > { %v988_v26 = vpop.eup %987 }
 0x384   : > { %v418_v27 = vsel %vm215_vm1, %v988_v26, 0.0  ;;  %v696_v37 = vmul.f32 1.442695, %v693_v36 }
 0x385   : > { %419 = vadd.xlane.f32.xlu1 %v418_v27 }
 0x386   : > { %995 = vpow2.f32 %v696_v37 }
 0x387   : > { %v990_v28 = vpop.eup %989 }
 0x388   : > { %v558_v29 = vsel %vm215_vm1, %v990_v28, 0.0 }
 0x389   : > { %559 = vadd.xlane.f32.xlu0 %v558_v29 }
 0x38b   : > { %v992_v30 = vpop.eup %991 }
 0x38c   : > { %v561_v31 = vsel %vm215_vm1, %v992_v30, 0.0 }
 0x38d   : > { %562 = vadd.xlane.f32.xlu1 %v561_v31 }
 0x38f   : > { %v994_v32 = vpop.eup %993 }
 0x390   : > { %v698_v33 = vsel %vm215_vm1, %v994_v32, 0.0 }
 0x391   : > { %699 = vadd.xlane.f32.xlu0 %v698_v33 }
 0x393   : > { %v996_v38 = vpop.eup %995 }
 0x394   : > { %v701_v39 = vsel %vm215_vm1, %v996_v38, 0.0 }
 0x39e   : > { %569 = vrot.lane.b32.xlu1 %v870_v34, %s1021_s27 }
 0x3a7   : > { %429 = vrot.lane.b32.xlu0 %v870_v34, %s1019_s22 }
 0x3c2   : > { %702 = vadd.xlane.f32.xlu1 %v701_v39 }
 0x3d3   : > { %709 = vrot.lane.b32.xlu1 %v870_v34, %s1020_s23 }
 0x40a   : > { %v417_v40 = vpop.xlane.xlu0 %416 }
 0x40b   : > { %997 = vrcp.f32 %v417_v40 }
 0x40e   : > { %v420_v41 = vpop.xlane.xlu1 %419 }
 0x40f   : > { %999 = vrcp.f32 %v420_v41 }
 0x412   : > { %v560_v42 = vpop.xlane.xlu0 %559 }
 0x413   : > { %1001 = vrcp.f32 %v560_v42 }
 0x416   : > { %v563_v23 = vpop.xlane.xlu1 %562 }
 0x417   : > { %1003 = vrcp.f32 %v563_v23 }
 0x418   : > { %v998_v44 = vpop.eup %997 }
 0x419   : > { %v422_v49 = vmul.f32 %v998_v44, %v986_v22 }
 0x41a   : > { %v700_v43 = vpop.xlane.xlu0 %699  ;;  %v570_v50 = vpop.permute.xlu1 %569 }
 0x41b   : > { %v575_v53 = vsel %vm291_vm2, %v570_v50, 0  ;;  %1005 = vrcp.f32 %v700_v43 }
 0x41c   : > { %v1000_v45 = vpop.eup %999 }
 0x41d   : > { %v424_v46 = vmul.f32 %v1000_v45, %v988_v26 }
 0x41e   : > { %v430_v47 = vpop.permute.xlu0 %429 }
 0x41f   : > { %v435_v48 = vsel %vm291_vm2, %v430_v47, 0  ;;  %v425_v51 = vpack.c.bf16 %v424_v46, %v422_v49 }
 0x420   : > { %929 = vmatpush3.bf16.msra.mxu0 %v435_v48  ;;  %v1002_v52 = vpop.eup %1001 }
 0x421   : > { %940 = vmatprep.subr.bf16.mxu0 %v1017_v0  ;;  %v565_v56 = vmul.f32 %v1002_v52, %v990_v28 }
 0x423   : > { %931 = vmatmul.mubr.msk.bf16.vlgmr.msra.gmra.mxu0 %vm215_vm1, %v425_v51 }
 0x424   : > { %v1004_v54 = vpop.eup %1003  ;;  %941 = vmatpush3.bf16.msra.mxu0 %v575_v53  ;;  %942 = vmatprep.mubr.msk.bf16.mxu0 %vm1018_vm0, %v1017_v0 }
 0x425   : > { %v567_v55 = vmul.f32 %v1004_v54, %v992_v30  ;;  %952 = vmatprep.subr.bf16.mxu0 %v1017_v0 }
 0x427   : > { %v568_v57 = vpack.c.bf16 %v567_v55, %v565_v56 }
 0x428   : > { %v1006_v61 = vpop.eup %1005 }
 0x429   : > { %v705_v63 = vmul.f32 %v1006_v61, %v994_v32 }
 0x42b   : > { %943 = vmatmul.mubr.msk.bf16.vlgmr.msra.gmra.mxu0 %vm215_vm1, %v568_v57 }
 0x42c   : > { %954 = vmatprep.mubr.msk.bf16.mxu0 %vm1018_vm0, %v1017_v0 }
 0x44b   : > { %v703_v58 = vpop.xlane.xlu1 %702 }
 0x44c   : > { %1007 = vrcp.f32 %v703_v58 }
 0x44f   : > { %v710_v59 = vpop.permute.xlu1 %709 }
 0x450   : > { %v715_v60 = vsel %vm291_vm2, %v710_v59, 0 }
 0x451   : > { %953 = vmatpush3.bf16.msra.mxu0 %v715_v60 }
 0x459   : > { %v1008_v62 = vpop.eup %1007 }
 0x45a   : > { %v707_v1 = vmul.f32 %v1008_v62, %v996_v38 }
 0x45c   : > { %v708_v2 = vpack.c.bf16 %v707_v1, %v705_v63 }
 0x45e   : > { %955 = vmatmul.mubr.msk.bf16.vlgmr.msra.gmra.mxu0 %vm215_vm1, %v708_v2 }
 0x4e3   : > { %v471_v3 = vpop.f32.mrf.mxu0 }
 0x4e4   : > { %v888_v4 = vpack.c.bf16 %v471_v3, %v471_v3 }
 0x4e5   : > { %v932_v5 = vpop.f32.mrf.mxu0 }
 0x4e6   : > { %484 = vrot.lane.b32.xlu1 %v888_v4, %s1022_s4 }
 0x4e7   : > { %v474_v0 = vpop.f32.mrf.mxu0 }
 0x4e8   : > { %v889_v6 = vpack.c.bf16 %v474_v0, %v474_v0 }
 0x4e9   : > { %v933_v7 = vpop.f32.mrf.mxu0 }
 0x4ea   : > { %486 = vrot.lane.b32.xlu0 %v889_v6, %s1022_s4 }
 0x4eb   : > { %v611_v8 = vpop.f32.mrf.mxu0 }
 0x4ec   : > { %v890_v9 = vpack.c.bf16 %v611_v8, %v611_v8 }
 0x4ed   : > { %v944_v10 = vpop.f32.mrf.mxu0 }
 0x4ee   : > { %624 = vrot.lane.b32.xlu1 %v890_v9, %s1023_s5 }
 0x4ef   : > { %v614_v11 = vpop.f32.mrf.mxu0 }
 0x4f0   : > { %v891_v12 = vpack.c.bf16 %v614_v11, %v614_v11 }
 0x4f1   : > { %v945_v13 = vpop.f32.mrf.mxu0 }
 0x4f2   : > { %626 = vrot.lane.b32.xlu0 %v891_v12, %s1023_s5 }
 0x51e   : > { %v751_v14 = vpop.f32.mrf.mxu0 }
 0x51f   : > { %v892_v15 = vpack.c.bf16 %v751_v14, %v751_v14 }
 0x520   : > { %v956_v16 = vpop.f32.mrf.mxu0 }
 0x521   : > { %764 = vrot.lane.b32.xlu1 %v892_v15, %s1024_s6 }
 0x522   : > { %v754_v17 = vpop.f32.mrf.mxu0 }
 0x523   : > { %v893_v18 = vpack.c.bf16 %v754_v17, %v754_v17 }
 0x524   : > { %v957_v19 = vpop.f32.mrf.mxu0 }
 0x525   : > { %766 = vrot.lane.b32.xlu0 %v893_v18, %s1024_s6 }
 0x558   : > { %v485_v20 = vpop.permute.xlu1 %484 }
 0x559   : > { %491 = vst.msk [vmem:[%s1118_s30] sm:$0xf] %vm490_vm4, %v485_v20 }
 0x55c   : > { %v487_v21 = vpop.permute.xlu0 %486 }
 0x55d   : > { %492 = vst.msk [vmem:[%s1118_s30 + $0x4] sm:$0xf] %vm490_vm4, %v487_v21 }
 0x560   : > { %v625_v22 = vpop.permute.xlu1 %624 }
 0x561   : > { %631 = vst.msk [vmem:[%s1118_s30] sm:$0xf] %vm630_vm5, %v625_v22 }
 0x564   : > { %v627_v24 = vpop.permute.xlu0 %626 }
 0x565   : > { %632 = vst.msk [vmem:[%s1118_s30 + $0x4] sm:$0xf] %vm630_vm5, %v627_v24 }
 0x593   : > { %v765_v25 = vpop.permute.xlu1 %764 }
 0x594   : > { %771 = vst.msk [vmem:[%s1118_s30] sm:$0xf] %vm770_vm6, %v765_v25 }
 0x597   : > { %v767_v26 = vpop.permute.xlu0 %766 }
 0x598   : > { %772 = vst.msk [vmem:[%s1118_s30 + $0x4] sm:$0xf] %vm770_vm6, %v767_v26 }
 0x599 PF: > { %s13_s12 = sadd.s32 1, %s1015_s12  }
 0x59a   : > { %p10_p4 = scmp.ge.s32.totalorder %s13_s12, 4  }
 0x59c   :  { %12 = sbr.rel (!%p10_p4) target bundleno = 1 (0x1), region = 68 }

// kernel: informer_forward.43
= control target key start
LH: loop header
LB: loop body
LE: loop exit
PB: predicated region body
PF: predicated region fallthrough
CT: control target
= control target key end

     0   :  { %vm52_vm0 = vcmask 261120   ;;  %vm108_vm1 = vcmask 31744   ;;  %s187_s1 = inlined_call_operand.vmem [shape: bf16[32,4], index: 1, kind: input, shape index: {}]   ;;  %s188_s0 = inlined_call_operand.vmem [shape: bf16[32,32], index: 0, kind: input, shape index: {}]   ;;  %s189_s2 = inlined_call_operand.vmem [shape: f32[1,4], index: 2, kind: input, shape index: {}]   ;;  %s190_s3 = inlined_call_operand.vmem [shape: f32[32,4], index: 3, kind: output, shape index: {}]  }
   0x1   :  { %v136_v0 = vld [vmem:[%s187_s1 + $0x8] sm:$0xff]   ;;  %v137_v1 = vld [vmem:[%s187_s1] sm:$0xff]  }
   0x2   :  { %128 = vmatprep.subr.bf16.mxu0 %v136_v0  ;;  %v138_v2 = vld [vmem:[%s188_s0] sm:$0xff]   ;;  %v139_v3 = vld [vmem:[%s188_s0 + $0x8] sm:$0xff]  }
   0x3   :  { %129 = vmatpush3.bf16.msra.mxu0 %v136_v0  ;;  %132 = vmatprep.mubr.msk.bf16.mxu0 %vm52_vm0, %v138_v2  ;;  %v117_v4 = vld [vmem:[%s189_s2] ss:$0 sm:$0xff] }
   0x4   :  { %130 = vmatprep.subr.bf16.mxu0 %v137_v1 }
   0x7   :  { %131 = vmatpush3.bf16.msra.mxu0 %v137_v1 }
   0xa   :  { %133 = vmatmul.mubr.msk.bf16.vlgmr.msra.gmra.mxu0 %vm52_vm0, %v139_v3 }
  0xca   :  { %v134_v5 = vpop.f32.mrf.mxu0 }
  0xcb   :  { %v102_v6 = vadd.f32 %v134_v5, %v117_v4 }
  0xcc   :  { %v93_v7 = vpop.f32.mrf.mxu0 }
  0xcd   :  { %111 = vst.msk [vmem:[%s190_s3 + $0x10] sm:$0xff] %vm108_vm1, %v102_v6  ;;  %v94_v8 = vadd.f32 %v117_v4, %v93_v7 }
  0xce   :  { %v135_v9 = vpop.f32.mrf.mxu0 }
  0xcf   :  { %109 = vst.msk [vmem:[%s190_s3] sm:$0xff] %vm108_vm1, %v94_v8  ;;  %v105_v10 = vadd.f32 %v135_v9, %v117_v4 }
  0xd0   :  { %v96_v11 = vpop.f32.mrf.mxu0 }
  0xd1   :  { %112 = vst.msk [vmem:[%s190_s3 + $0x18] sm:$0xff] %vm108_vm1, %v105_v10  ;;  %v97_v12 = vadd.f32 %v117_v4, %v96_v11 }
  0xd3   :  { %110 = vst.msk [vmem:[%s190_s3 + $0x8] sm:$0xff] %vm108_vm1, %v97_v12 }

</bundles_post_ra>
